<compile_context>
chip_gen: v7x
topology: tpu7x:2x2x1
jax: 0.10.0
libtpu: 0.0.40
codegen_flags: <defaults>
</compile_context>

<pallas_src>
import jax
import jax.numpy as jnp
from jax.experimental import pallas as pl
from jax.experimental.pallas import tpu as pltpu


def _round_up(x, m):
    return ((x + m - 1) // m) * m


def _choose_tile(n, target=1024, min_tile=128, min_steps=4):
    """Pick the batch tile: big for large N (amortize ~0.35us/step overhead),
    but guarantee >= `min_steps` grid steps for small N, preferring a tile
    that exactly divides the 8-rounded batch so no jnp.pad pass is needed."""
    n8 = _round_up(n, 8)
    if n8 <= min_tile:
        return n8
    tn = min(target, _round_up(pl.cdiv(n8, min_steps), 8))
    tn = max(tn, min_tile)
    # Prefer the largest divisor of n8 that is <= tn (skips the pad pass).
    for cand in range(tn, min_tile - 1, -8):
        if n8 % cand == 0:
            return cand
    return tn


def _mlp_kernel(x_ref, w1_ref, b1_ref, w2_ref, b2_ref, w3_ref, b3_ref, o_ref):
    # Cast the f32 x tile to bf16 in-kernel (cheap VPU work, hides under MXU).
    xb = x_ref[...].astype(jnp.bfloat16)
    # Layer 1: Linear(L, D) + ReLU  (bf16 operands, f32 MXU accumulation)
    h = jnp.dot(xb, w1_ref[...], preferred_element_type=jnp.float32)
    h = jnp.maximum(h + b1_ref[...], 0.0)
    # Dropout(0.5) -> identity in eval mode
    # Layer 2: Linear(D, 256) + ReLU
    h = jnp.dot(h.astype(jnp.bfloat16), w2_ref[...],
                preferred_element_type=jnp.float32)
    h = jnp.maximum(h + b2_ref[...], 0.0)
    # Dropout(0.5) -> identity in eval mode
    # Layer 3: Linear(256, n_classes)  (output lanes zero-padded to 128)
    out = jnp.dot(h.astype(jnp.bfloat16), w3_ref[...],
                  preferred_element_type=jnp.float32)
    o_ref[...] = (out + b3_ref[...]).astype(o_ref.dtype)


def mlp_forward(x, params, *, max_tile=1024):
    """Fused MLP forward.  x: [N, L] float32.  Returns (logits [N, n_classes], None)."""
    w1 = params["w1"].astype(jnp.bfloat16)          # [L, D]
    w2 = params["w2"].astype(jnp.bfloat16)          # [D, 256]
    w3 = params["w3"].astype(jnp.bfloat16)          # [256, n_classes]
    b1 = params["b1"].astype(jnp.float32)           # [1, D]
    b2 = params["b2"].astype(jnp.float32)           # [1, 256]
    b3 = params["b3"].astype(jnp.float32)           # [1, n_classes]

    N, L = x.shape
    D = w1.shape[1]
    H2 = w2.shape[1]
    n_classes = w3.shape[1]

    # Lane-dense head: pad the output width to a multiple of 128.
    c_pad = _round_up(n_classes, 128)
    w3p = jnp.zeros((H2, c_pad), jnp.bfloat16).at[:, :n_classes].set(w3)
    b3p = jnp.zeros((1, c_pad), jnp.float32).at[:, :n_classes].set(b3)

    # Batch tiling (f32 x -> tn must be a multiple of 8).
    tn = _choose_tile(N, target=max_tile)
    n_tiles = pl.cdiv(N, tn)
    n_pad = n_tiles * tn

    x_in = x.astype(jnp.float32)
    if n_pad != N:
        x_in = jnp.pad(x_in, ((0, n_pad - N), (0, 0)))

    # VMEM budget from actual live buffers: single-buffered weights/biases,
    # double-buffered x/out tiles, f32 intermediates + bf16 re-cast copies.
    bytes_weights = 2 * (L * D + D * H2 + H2 * c_pad) + 4 * (D + H2 + c_pad)
    bytes_tiles = 2 * tn * L * 4 + 2 * tn * c_pad * 4
    bytes_interm = tn * (L * 2 + D * 6 + H2 * 6 + c_pad * 4)
    vmem_limit = int(1.25 * (bytes_weights + bytes_tiles + bytes_interm)) + (4 << 20)
    vmem_limit = min(vmem_limit, 64 << 20)

    def build(single_buffer_weights):
        if single_buffer_weights:
            resident = lambda shape: pl.BlockSpec(
                shape, lambda i: (0, 0), pipeline_mode=pl.Buffered(1))
        else:
            resident = lambda shape: pl.BlockSpec(shape, lambda i: (0, 0))
        return pl.pallas_call(
            _mlp_kernel,
            out_shape=jax.ShapeDtypeStruct((n_pad, c_pad), jnp.float32),
            grid=(n_tiles,),
            in_specs=[
                pl.BlockSpec((tn, L), lambda i: (i, 0)),   # x tile (pipelined, f32)
                resident((L, D)),                          # w1 (VMEM-resident)
                resident((1, D)),                          # b1
                resident((D, H2)),                         # w2
                resident((1, H2)),                         # b2
                resident((H2, c_pad)),                     # w3 (lane-padded)
                resident((1, c_pad)),                      # b3 (lane-padded)
            ],
            out_specs=pl.BlockSpec((tn, c_pad), lambda i: (i, 0)),
            compiler_params=pltpu.CompilerParams(
                dimension_semantics=("parallel",),
                vmem_limit_bytes=vmem_limit,
            ),
        )

    args = (x_in, w1, b1, w2, b2, w3p, b3p)
    try:
        out = build(True)(*args)
    except Exception:
        # Graceful fallback if this jax/Mosaic build rejects single-buffered
        # (Buffered(1)) resident operands; semantics are identical.
        out = build(False)(*args)

    logits = out[:N, :n_classes].astype(x.dtype)
    return logits, None   # matches the PyTorch module's (output, None)


def init_params(key, L, D, H2, n_classes, dtype=jnp.float32):
    """Xavier-normal weights, zero biases (like initialize_weights)."""
    k1, k2, k3 = jax.random.split(key, 3)

    def xavier(k, fan_in, fan_out):
        std = (2.0 / (fan_in + fan_out)) ** 0.5
        # stored as [in, out] (transposed vs PyTorch's [out, in])
        return (jax.random.normal(k, (fan_in, fan_out)) * std).astype(dtype)

    return {
        "w1": xavier(k1, L, D),
        "b1": jnp.zeros((1, D), dtype),
        "w2": xavier(k2, D, H2),
        "b2": jnp.zeros((1, H2), dtype),
        "w3": xavier(k3, H2, n_classes),
        "b3": jnp.zeros((1, n_classes), dtype),
    }


def reference_forward(x, p):
    """Reference with the same bf16 operand / f32 accumulation recipe."""
    xb = x.astype(jnp.bfloat16)
    w1 = p["w1"].astype(jnp.bfloat16)
    w2 = p["w2"].astype(jnp.bfloat16)
    w3 = p["w3"].astype(jnp.bfloat16)
    h = jnp.dot(xb, w1, preferred_element_type=jnp.float32) + p["b1"]
    h = jnp.maximum(h, 0.0)
    h = jnp.dot(h.astype(jnp.bfloat16), w2, preferred_element_type=jnp.float32) + p["b2"]
    h = jnp.maximum(h, 0.0)
    out = jnp.dot(h.astype(jnp.bfloat16), w3, preferred_element_type=jnp.float32) + p["b3"]
    return out


if __name__ == "__main__":
    # Module defaults: MLP(L=1024, D=512, n_classes=1), second hidden width 256.
    # N=384 exercises batch tiling (tile chooser picks tn=128 -> 3 grid steps,
    # no padding pass).
    N, L, D, H2, n_classes = 384, 1024, 512, 256, 1

    key = jax.random.PRNGKey(0)
    kx, kp = jax.random.split(key)
    x = jax.random.normal(kx, (N, L), dtype=jnp.float32)
    params = init_params(kp, L, D, H2, n_classes)

    out, aux = mlp_forward(x, params)
    out = jax.block_until_ready(out)

    ref = reference_forward(x, params)
    assert out.shape == (N, n_classes)
    assert aux is None
    assert jnp.allclose(out, ref, atol=1e-2, rtol=1e-2), "mismatch vs JAX reference"

    print("KERNEL_OK")
</pallas_src>

<mosaic_0001>
module attributes {stable_mosaic.version = 11 : i64} {
  func.func @_mlp_kernel(%arg0: i32, %arg1: memref<128x1024xf32, #tpu.memory_space<vmem>>, %arg2: memref<1024x512xbf16, #tpu.memory_space<vmem>>, %arg3: memref<1x512xf32, #tpu.memory_space<vmem>>, %arg4: memref<512x256xbf16, #tpu.memory_space<vmem>>, %arg5: memref<1x256xf32, #tpu.memory_space<vmem>>, %arg6: memref<256x128xbf16, #tpu.memory_space<vmem>>, %arg7: memref<1x128xf32, #tpu.memory_space<vmem>>, %arg8: memref<128x128xf32, #tpu.memory_space<vmem>>) attributes {dimension_semantics = [#tpu.dimension_semantics<parallel>], iteration_bounds = array<i64: 3>, scalar_prefetch = 0 : i64, scratch_operands = 0 : i64, tpu.core_type = #tpu.core_type<tc>, window_params = [{transform_indices = @transform_0, window_bounds = array<i64: 128, 1024>}, {pipeline_mode = #tpu.pipeline_mode<synchronous>, transform_indices = @transform_1, window_bounds = array<i64: 1024, 512>}, {pipeline_mode = #tpu.pipeline_mode<synchronous>, transform_indices = @transform_2, window_bounds = array<i64: 1, 512>}, {pipeline_mode = #tpu.pipeline_mode<synchronous>, transform_indices = @transform_3, window_bounds = array<i64: 512, 256>}, {pipeline_mode = #tpu.pipeline_mode<synchronous>, transform_indices = @transform_4, window_bounds = array<i64: 1, 256>}, {pipeline_mode = #tpu.pipeline_mode<synchronous>, transform_indices = @transform_5, window_bounds = array<i64: 256, 128>}, {pipeline_mode = #tpu.pipeline_mode<synchronous>, transform_indices = @transform_6, window_bounds = array<i64: 1, 128>}, {transform_indices = @transform_7, window_bounds = array<i64: 128, 128>}]} {
    %c0 = arith.constant 0 : index
    %c0_0 = arith.constant 0 : index
    %0 = vector.load %arg1[%c0, %c0_0] : memref<128x1024xf32, #tpu.memory_space<vmem>>, vector<128x1024xf32>
    %1 = arith.truncf %0 : vector<128x1024xf32> to vector<128x1024xbf16>
    %c0_1 = arith.constant 0 : index
    %c0_2 = arith.constant 0 : index
    %2 = vector.load %arg2[%c0_1, %c0_2] : memref<1024x512xbf16, #tpu.memory_space<vmem>>, vector<1024x512xbf16>
    %cst = arith.constant dense<0.000000e+00> : vector<128x512xf32>
    %3 = tpu.matmul %1, %2, %cst {dimension_numbers = #tpu.dot_dimension_numbers<[1], [0], [0], [1], [0, 0, 1, 1], [], []>} : vector<128x1024xbf16>, vector<1024x512xbf16>, vector<128x512xf32> -> vector<128x512xf32>
    %c0_3 = arith.constant 0 : index
    %c0_4 = arith.constant 0 : index
    %4 = vector.load %arg3[%c0_3, %c0_4] : memref<1x512xf32, #tpu.memory_space<vmem>>, vector<1x512xf32>
    %5 = vector.broadcast %4 : vector<1x512xf32> to vector<128x512xf32>
    %6 = arith.addf %3, %5 : vector<128x512xf32>
    %cst_5 = arith.constant 0.000000e+00 : f32
    %7 = vector.broadcast %cst_5 : f32 to vector<128x512xf32>
    %8 = arith.maximumf %6, %7 : vector<128x512xf32>
    %9 = arith.truncf %8 : vector<128x512xf32> to vector<128x512xbf16>
    %c0_6 = arith.constant 0 : index
    %c0_7 = arith.constant 0 : index
    %10 = vector.load %arg4[%c0_6, %c0_7] : memref<512x256xbf16, #tpu.memory_space<vmem>>, vector<512x256xbf16>
    %cst_8 = arith.constant dense<0.000000e+00> : vector<128x256xf32>
    %11 = tpu.matmul %9, %10, %cst_8 {dimension_numbers = #tpu.dot_dimension_numbers<[1], [0], [0], [1], [0, 0, 1, 1], [], []>} : vector<128x512xbf16>, vector<512x256xbf16>, vector<128x256xf32> -> vector<128x256xf32>
    %c0_9 = arith.constant 0 : index
    %c0_10 = arith.constant 0 : index
    %12 = vector.load %arg5[%c0_9, %c0_10] : memref<1x256xf32, #tpu.memory_space<vmem>>, vector<1x256xf32>
    %13 = vector.broadcast %12 : vector<1x256xf32> to vector<128x256xf32>
    %14 = arith.addf %11, %13 : vector<128x256xf32>
    %cst_11 = arith.constant 0.000000e+00 : f32
    %15 = vector.broadcast %cst_11 : f32 to vector<128x256xf32>
    %16 = arith.maximumf %14, %15 : vector<128x256xf32>
    %17 = arith.truncf %16 : vector<128x256xf32> to vector<128x256xbf16>
    %c0_12 = arith.constant 0 : index
    %c0_13 = arith.constant 0 : index
    %18 = vector.load %arg6[%c0_12, %c0_13] : memref<256x128xbf16, #tpu.memory_space<vmem>>, vector<256x128xbf16>
    %cst_14 = arith.constant dense<0.000000e+00> : vector<128x128xf32>
    %19 = tpu.matmul %17, %18, %cst_14 {dimension_numbers = #tpu.dot_dimension_numbers<[1], [0], [0], [1], [0, 0, 1, 1], [], []>} : vector<128x256xbf16>, vector<256x128xbf16>, vector<128x128xf32> -> vector<128x128xf32>
    %c0_15 = arith.constant 0 : index
    %c0_16 = arith.constant 0 : index
    %20 = vector.load %arg7[%c0_15, %c0_16] : memref<1x128xf32, #tpu.memory_space<vmem>>, vector<1x128xf32>
    %21 = vector.broadcast %20 : vector<1x128xf32> to vector<128x128xf32>
    %22 = arith.addf %19, %21 : vector<128x128xf32>
    %c0_17 = arith.constant 0 : index
    %c0_18 = arith.constant 0 : index
    %23 = vector.load %arg8[%c0_17, %c0_18] : memref<128x128xf32, #tpu.memory_space<vmem>>, vector<128x128xf32>
    tpu.vector_store %arg8[%c0_17, %c0_18], %22 {strides = array<i32>} : memref<128x128xf32, #tpu.memory_space<vmem>>, vector<128x128xf32>,
    return
  }
  func.func @transform_0(%arg0: i32) -> (i32, i32) {
    %c0_i32 = arith.constant 0 : i32
    %c0_i32_0 = arith.constant 0 : i32
    return %arg0, %c0_i32 : i32, i32
  }
  func.func @transform_1(%arg0: i32) -> (i32, i32) {
    %c0_i32 = arith.constant 0 : i32
    %c0_i32_0 = arith.constant 0 : i32
    %c0_i32_1 = arith.constant 0 : i32
    return %c0_i32, %c0_i32_0 : i32, i32
  }
  func.func @transform_2(%arg0: i32) -> (i32, i32) {
    %c0_i32 = arith.constant 0 : i32
    %c0_i32_0 = arith.constant 0 : i32
    %c0_i32_1 = arith.constant 0 : i32
    return %c0_i32, %c0_i32_0 : i32, i32
  }
  func.func @transform_3(%arg0: i32) -> (i32, i32) {
    %c0_i32 = arith.constant 0 : i32
    %c0_i32_0 = arith.constant 0 : i32
    %c0_i32_1 = arith.constant 0 : i32
    return %c0_i32, %c0_i32_0 : i32, i32
  }
  func.func @transform_4(%arg0: i32) -> (i32, i32) {
    %c0_i32 = arith.constant 0 : i32
    %c0_i32_0 = arith.constant 0 : i32
    %c0_i32_1 = arith.constant 0 : i32
    return %c0_i32, %c0_i32_0 : i32, i32
  }
  func.func @transform_5(%arg0: i32) -> (i32, i32) {
    %c0_i32 = arith.constant 0 : i32
    %c0_i32_0 = arith.constant 0 : i32
    %c0_i32_1 = arith.constant 0 : i32
    return %c0_i32, %c0_i32_0 : i32, i32
  }
  func.func @transform_6(%arg0: i32) -> (i32, i32) {
    %c0_i32 = arith.constant 0 : i32
    %c0_i32_0 = arith.constant 0 : i32
    %c0_i32_1 = arith.constant 0 : i32
    return %c0_i32, %c0_i32_0 : i32, i32
  }
  func.func @transform_7(%arg0: i32) -> (i32, i32) {
    %c0_i32 = arith.constant 0 : i32
    %c0_i32_0 = arith.constant 0 : i32
    return %arg0, %c0_i32 : i32, i32
  }
}

module attributes {stable_mosaic.version = 11 : i64} {
  func.func @_mlp_kernel(%arg0: i32, %arg1: memref<128x1024xf32, #tpu.memory_space<vmem>>, %arg2: memref<1024x512xbf16, #tpu.memory_space<vmem>>, %arg3: memref<1x512xf32, #tpu.memory_space<vmem>>, %arg4: memref<512x256xbf16, #tpu.memory_space<vmem>>, %arg5: memref<1x256xf32, #tpu.memory_space<vmem>>, %arg6: memref<256x128xbf16, #tpu.memory_space<vmem>>, %arg7: memref<1x128xf32, #tpu.memory_space<vmem>>, %arg8: memref<128x128xf32, #tpu.memory_space<vmem>>) attributes {dimension_semantics = [#tpu.dimension_semantics<parallel>], iteration_bounds = array<i64: 3>, scalar_prefetch = 0 : i64, scratch_operands = 0 : i64, tpu.core_type = #tpu.core_type<tc>, window_params = [{transform_indices = @transform_0, window_bounds = array<i64: 128, 1024>}, {pipeline_mode = #tpu.pipeline_mode<synchronous>, transform_indices = @transform_1, window_bounds = array<i64: 1024, 512>}, {pipeline_mode = #tpu.pipeline_mode<synchronous>, transform_indices = @transform_2, window_bounds = array<i64: 1, 512>}, {pipeline_mode = #tpu.pipeline_mode<synchronous>, transform_indices = @transform_3, window_bounds = array<i64: 512, 256>}, {pipeline_mode = #tpu.pipeline_mode<synchronous>, transform_indices = @transform_4, window_bounds = array<i64: 1, 256>}, {pipeline_mode = #tpu.pipeline_mode<synchronous>, transform_indices = @transform_5, window_bounds = array<i64: 256, 128>}, {pipeline_mode = #tpu.pipeline_mode<synchronous>, transform_indices = @transform_6, window_bounds = array<i64: 1, 128>}, {transform_indices = @transform_7, window_bounds = array<i64: 128, 128>}]} {
    %c0 = arith.constant 0 : index
    %c0_0 = arith.constant 0 : index
    %0 = vector.load %arg1[%c0, %c0_0] : memref<128x1024xf32, #tpu.memory_space<vmem>>, vector<128x1024xf32>
    %1 = arith.truncf %0 : vector<128x1024xf32> to vector<128x1024xbf16>
    %c0_1 = arith.constant 0 : index
    %c0_2 = arith.constant 0 : index
    %2 = vector.load %arg2[%c0_1, %c0_2] : memref<1024x512xbf16, #tpu.memory_space<vmem>>, vector<1024x512xbf16>
    %cst = arith.constant dense<0.000000e+00> : vector<128x512xf32>
    %3 = tpu.matmul %1, %2, %cst {dimension_numbers = #tpu.dot_dimension_numbers<[1], [0], [0], [1], [0, 0, 1, 1], [], []>} : vector<128x1024xbf16>, vector<1024x512xbf16>, vector<128x512xf32> -> vector<128x512xf32>
    %c0_3 = arith.constant 0 : index
    %c0_4 = arith.constant 0 : index
    %4 = vector.load %arg3[%c0_3, %c0_4] : memref<1x512xf32, #tpu.memory_space<vmem>>, vector<1x512xf32>
    %5 = vector.broadcast %4 : vector<1x512xf32> to vector<128x512xf32>
    %6 = arith.addf %3, %5 : vector<128x512xf32>
    %cst_5 = arith.constant 0.000000e+00 : f32
    %7 = vector.broadcast %cst_5 : f32 to vector<128x512xf32>
    %8 = arith.maximumf %6, %7 : vector<128x512xf32>
    %9 = arith.truncf %8 : vector<128x512xf32> to vector<128x512xbf16>
    %c0_6 = arith.constant 0 : index
    %c0_7 = arith.constant 0 : index
    %10 = vector.load %arg4[%c0_6, %c0_7] : memref<512x256xbf16, #tpu.memory_space<vmem>>, vector<512x256xbf16>
    %cst_8 = arith.constant dense<0.000000e+00> : vector<128x256xf32>
    %11 = tpu.matmul %9, %10, %cst_8 {dimension_numbers = #tpu.dot_dimension_numbers<[1], [0], [0], [1], [0, 0, 1, 1], [], []>} : vector<128x512xbf16>, vector<512x256xbf16>, vector<128x256xf32> -> vector<128x256xf32>
    %c0_9 = arith.constant 0 : index
    %c0_10 = arith.constant 0 : index
    %12 = vector.load %arg5[%c0_9, %c0_10] : memref<1x256xf32, #tpu.memory_space<vmem>>, vector<1x256xf32>
    %13 = vector.broadcast %12 : vector<1x256xf32> to vector<128x256xf32>
    %14 = arith.addf %11, %13 : vector<128x256xf32>
    %cst_11 = arith.constant 0.000000e+00 : f32
    %15 = vector.broadcast %cst_11 : f32 to vector<128x256xf32>
    %16 = arith.maximumf %14, %15 : vector<128x256xf32>
    %17 = arith.truncf %16 : vector<128x256xf32> to vector<128x256xbf16>
    %c0_12 = arith.constant 0 : index
    %c0_13 = arith.constant 0 : index
    %18 = vector.load %arg6[%c0_12, %c0_13] : memref<256x128xbf16, #tpu.memory_space<vmem>>, vector<256x128xbf16>
    %cst_14 = arith.constant dense<0.000000e+00> : vector<128x128xf32>
    %19 = tpu.matmul %17, %18, %cst_14 {dimension_numbers = #tpu.dot_dimension_numbers<[1], [0], [0], [1], [0, 0, 1, 1], [], []>} : vector<128x256xbf16>, vector<256x128xbf16>, vector<128x128xf32> -> vector<128x128xf32>
    %c0_15 = arith.constant 0 : index
    %c0_16 = arith.constant 0 : index
    %20 = vector.load %arg7[%c0_15, %c0_16] : memref<1x128xf32, #tpu.memory_space<vmem>>, vector<1x128xf32>
    %21 = vector.broadcast %20 : vector<1x128xf32> to vector<128x128xf32>
    %22 = arith.addf %19, %21 : vector<128x128xf32>
    %c0_17 = arith.constant 0 : index
    %c0_18 = arith.constant 0 : index
    %23 = vector.load %arg8[%c0_17, %c0_18] : memref<128x128xf32, #tpu.memory_space<vmem>>, vector<128x128xf32>
    tpu.vector_store %arg8[%c0_17, %c0_18], %22 {strides = array<i32>} : memref<128x128xf32, #tpu.memory_space<vmem>>, vector<128x128xf32>,
    return
  }
  func.func @transform_0(%arg0: i32) -> (i32, i32) {
    %c0_i32 = arith.constant 0 : i32
    %c0_i32_0 = arith.constant 0 : i32
    return %arg0, %c0_i32 : i32, i32
  }
  func.func @transform_1(%arg0: i32) -> (i32, i32) {
    %c0_i32 = arith.constant 0 : i32
    %c0_i32_0 = arith.constant 0 : i32
    %c0_i32_1 = arith.constant 0 : i32
    return %c0_i32, %c0_i32_0 : i32, i32
  }
  func.func @transform_2(%arg0: i32) -> (i32, i32) {
    %c0_i32 = arith.constant 0 : i32
    %c0_i32_0 = arith.constant 0 : i32
    %c0_i32_1 = arith.constant 0 : i32
    return %c0_i32, %c0_i32_0 : i32, i32
  }
  func.func @transform_3(%arg0: i32) -> (i32, i32) {
    %c0_i32 = arith.constant 0 : i32
    %c0_i32_0 = arith.constant 0 : i32
    %c0_i32_1 = arith.constant 0 : i32
    return %c0_i32, %c0_i32_0 : i32, i32
  }
  func.func @transform_4(%arg0: i32) -> (i32, i32) {
    %c0_i32 = arith.constant 0 : i32
    %c0_i32_0 = arith.constant 0 : i32
    %c0_i32_1 = arith.constant 0 : i32
    return %c0_i32, %c0_i32_0 : i32, i32
  }
  func.func @transform_5(%arg0: i32) -> (i32, i32) {
    %c0_i32 = arith.constant 0 : i32
    %c0_i32_0 = arith.constant 0 : i32
    %c0_i32_1 = arith.constant 0 : i32
    return %c0_i32, %c0_i32_0 : i32, i32
  }
  func.func @transform_6(%arg0: i32) -> (i32, i32) {
    %c0_i32 = arith.constant 0 : i32
    %c0_i32_0 = arith.constant 0 : i32
    %c0_i32_1 = arith.constant 0 : i32
    return %c0_i32, %c0_i32_0 : i32, i32
  }
  func.func @transform_7(%arg0: i32) -> (i32, i32) {
    %c0_i32 = arith.constant 0 : i32
    %c0_i32_0 = arith.constant 0 : i32
    return %arg0, %c0_i32 : i32, i32
  }
}

</mosaic_0001>

<bundles_post_ra>
// kernel: tpu_custom_call.1
= control target key start
LH: loop header
LB: loop body
LE: loop exit
PB: predicated region body
PF: predicated region fallthrough
CT: control target
= control target key end

     0   :  { %s6712_s0 = inlined_call_operand.hbm [shape: f32[384,1024], index: 0, kind: input, shape index: {}]   ;;  %s6713_s1 = inlined_call_operand.hbm [shape: bf16[1024,512], index: 1, kind: input, shape index: {}]   ;;  %s6714_s2 = inlined_call_operand.hbm [shape: f32[1,512], index: 2, kind: input, shape index: {}]   ;;  %s6715_s3 = inlined_call_operand.hbm [shape: bf16[512,256], index: 3, kind: input, shape index: {}]   ;;  %s6716_s4 = inlined_call_operand.hbm [shape: f32[1,256], index: 4, kind: input, shape index: {}]   ;;  %s6717_s5 = inlined_call_operand.hbm [shape: bf16[256,128], index: 5, kind: input, shape index: {}]   ;;  %s6718_s6 = inlined_call_operand.hbm [shape: f32[1,128], index: 6, kind: input, shape index: {}]   ;;  %s6719_s7 = inlined_call_operand.hbm [shape: f32[384,128], index: 7, kind: output, shape index: {}]  }
   0x1   :  { %6723 = sst [smem:[#allocation20_spill]] %s6713_s1 }
   0x2   :  { %12 = vsyncpa [#allocation3], 0 }
   0x3   :  { %14 = vsyncpa [#allocation3 + $0x1], 0 }
   0x4   :  { %15 = vsyncpa [#allocation6], 0 }
   0x5   :  { %16 = vsyncpa [#allocation9], 0 }
   0x6   :  { %17 = vsyncpa [#allocation12], 0 }
   0x7   :  { %18 = vsyncpa [#allocation4], 0 }
   0x8   :  { %20 = vsyncpa [#allocation4 + $0x1], 0  ;;  %s5924_s24 = smov 0   ;;  %s5926_s25 = smov 0  }
   0x9   :  { %s5928_s26 = smov 0   ;;  %s5930_s27 = smov 0  }
   0xa LB: > { %s5867_s28 = smov [#allocation5]   ;;  %s5945_s30 = sadd.s32 4294967295, %s5865_s27   ;;  %s5865_s27 = sphi %s5930_s27, %s6746_s27   ;;  %s5861_s26 = sphi %s5928_s26, %s6745_s26   ;;  %s5857_s25 = sphi %s5926_s25, %s6744_s25   ;;  %s5853_s24 = sphi %s5924_s24, %s6743_s24  }
   0xb   : > { %s221_s29 = sshll.u32 %s5867_s28, 4  ;;  %p4195_p0 = scmp.ge.s32.totalorder %s5865_s27, 1  ;;  %s5950_s29 = int_to_ptr.vmem [resolvable:$true] %s221_s29 }
   0xc   : > { %p6720_p1 = scmp.eq.s32.totalorder %s5945_s30, 0  ;;  %p209_p2 = scmp.lt.s32.totalorder %s5865_s27, 4 }
   0xd   : > { %s5868_s9 = smov [#allocation8]   ;;  %s5869_s12 = smov [#allocation11]  }
   0xe   : > { %p5952_p3 = pnand %p4195_p0, %p209_p2  ;;  %s245_s10 = sshll.u32 %s5868_s9, 4  ;;  %s5964_s10 = int_to_ptr.vmem [resolvable:$true] %s245_s10 }
   0xf   : > { %s5966_s13 = sshll.u32 %s5869_s12, 4  ;;  %s6726_s1 = sld [smem:[#allocation20_spill]]  ;;  %s270_s13 = int_to_ptr.vmem [resolvable:$true] %s5966_s13 }
  0x10   : > { %s6724_s8 = scalar_select %p5952_p3, 1, 0 }
  0x11   : > { %p5005_p4 = pneg %p5952_p3 }
  0x13   : > { %p5960_p5 = pnand %p5005_p4, %p6720_p1 }
  0x15   : > { %s5589_s16 = scalar_lea.hbm %s6726_s1, 32768  ;;  %p5976_p7 = pneg %p5960_p5 }
  0x16   : > { %p5590_p6 = scmp.ne.s32.totalorder %s6726_s1, %s5589_s16  ;;  %p5596_p10 = scmp.lt.u32.totalorder %s5589_s16, %s6726_s1 }
  0x18   : > { %p5592_p8 = pnand %p5976_p7, %p5590_p6 }
  0x1a   : > { %p5593_p9 = pneg %p5592_p8 }
  0x1c   : > { %p5598_p11 = pnand %p5596_p10, %p5593_p9 }
  0x1e   : > { %5601 = shalt.err (!%p5598_p11)
}
  0x1f   : > { %s5602_s22 = scalar_lea.vmem %s5950_s29, 32768  ;;  %p5610_p2 = scmp.lt.s32.totalorder %s5950_s29, %s5950_s29 }
  0x20   : > { %p5603_p12 = scmp.ne.s32.totalorder %s5950_s29, %s5602_s22  ;;  %p5611_p4 = scmp.lt.s32.totalorder %s5602_s22, %s5602_s22 }
  0x22   : > { %p5605_p13 = pnand %p5603_p12, %p5976_p7  ;;  %p5612_p6 = por %p5611_p4, %p5610_p2 }
  0x24   : > { %p5606_p0 = pneg %p5605_p13 }
  0x26   : > { %p5613_p8 = pnand %p5612_p6, %p5606_p0 }
  0x28   : > { %5616 = shalt.err (!%p5613_p8)
}
  0x29   : > { %s5870_s23 = smov 256   ;;  %s5871_s28 = smov 16  }
  0x2a   : > { %5008 = dma.hbm_to_vmem [thread:$0]  (!%p5960_p5), %s6726_s1, 32768, %s5950_s29, [#allocation6], %s5870_s23, %s5870_s23, %s5871_s28  }
  0x2b   : > { %s5617_s16 = scalar_lea.hbm %s6715_s3, 8192 }
  0x2c   : > { %p5618_p9 = scmp.ne.s32.totalorder %s6715_s3, %s5617_s16  ;;  %p5624_p12 = scmp.lt.u32.totalorder %s5617_s16, %s6715_s3 }
  0x2e   : > { %p5620_p10 = pnand %p5618_p9, %p5976_p7 }
  0x30   : > { %p5621_p11 = pneg %p5620_p10 }
  0x32   : > { %p5626_p13 = pnand %p5624_p12, %p5621_p11 }
  0x34   : > { %5629 = shalt.err (!%p5626_p13)
}
  0x35   : > { %s5630_s29 = scalar_lea.vmem %s5964_s10, 8192  ;;  %p5638_p6 = scmp.lt.s32.totalorder %s5964_s10, %s5964_s10 }
  0x36   : > { %p5631_p0 = scmp.ne.s32.totalorder %s5964_s10, %s5630_s29  ;;  %p5639_p8 = scmp.lt.s32.totalorder %s5630_s29, %s5630_s29 }
  0x38   : > { %p5633_p2 = pnand %p5631_p0, %p5976_p7  ;;  %p5640_p9 = por %p5639_p8, %p5638_p6 }
  0x3a   : > { %p5634_p4 = pneg %p5633_p2 }
  0x3c   : > { %p5641_p10 = pnand %p5640_p9, %p5634_p4 }
  0x3e   : > { %5644 = shalt.err (!%p5641_p10)
}
  0x3f   : > { %s5872_s22 = smov 128   ;;  %s5873_s23 = smov 8  }
  0x40   : > { %5014 = dma.hbm_to_vmem [thread:$0]  (!%p5960_p5), %s6715_s3, 8192, %s5964_s10, [#allocation9], %s5872_s22, %s5872_s22, %s5873_s23  }
  0x41   : > { %s5645_s15 = scalar_lea.hbm %s6717_s5, 2048 }
  0x42   : > { %p5646_p11 = scmp.ne.s32.totalorder %s6717_s5, %s5645_s15  ;;  %p5652_p0 = scmp.lt.u32.totalorder %s5645_s15, %s6717_s5 }
  0x44   : > { %p5648_p12 = pnand %p5646_p11, %p5976_p7 }
  0x46   : > { %p5649_p13 = pneg %p5648_p12 }
  0x48   : > { %p5654_p2 = pnand %p5652_p0, %p5649_p13 }
  0x4a   : > { %5657 = shalt.err (!%p5654_p2)
}
  0x4b   : > { %s5658_s21 = scalar_lea.vmem %s270_s13, 2048  ;;  %p5666_p9 = scmp.lt.s32.totalorder %s270_s13, %s270_s13 }
  0x4c   : > { %p5659_p4 = scmp.ne.s32.totalorder %s270_s13, %s5658_s21  ;;  %p5667_p10 = scmp.lt.s32.totalorder %s5658_s21, %s5658_s21 }
  0x4e   : > { %p5661_p6 = pnand %p5659_p4, %p5976_p7  ;;  %p5668_p1 = por %p5667_p10, %p5666_p9 }
  0x50   : > { %p5662_p8 = pneg %p5661_p6 }
  0x52   : > { %p5669_p3 = pnand %p5668_p1, %p5662_p8 }
  0x54   : > { %5672 = shalt.err (!%p5669_p3)
}
  0x55   : > { %s5874_s10 = smov 64   ;;  %s5875_s29 = smov 4  }
  0x56   : > { %5020 = dma.hbm_to_vmem [thread:$0]  (!%p5960_p5), %s6717_s5, 2048, %s270_s13, [#allocation12], %s5874_s10, %s5874_s10, %s5875_s29  }
  0x57   : > { %s5876_s28 = smov [#allocation7]   ;;  %s5877_s12 = smov [#allocation10]  }
  0x58   : > { %s235_s9 = sshll.u32 %s5876_s28, 4  ;;  %s259_s14 = sshll.u32 %s5877_s12, 4  ;;  %s236_s9 = int_to_ptr.vmem [resolvable:$true] %s235_s9  ;;  %s260_s14 = int_to_ptr.vmem [resolvable:$true] %s259_s14 }
  0x59   : > { %s5673_s17 = scalar_lea.hbm %s6714_s2, 64 }
  0x5a   : > { %p5674_p1 = scmp.ne.s32.totalorder %s6714_s2, %s5673_s17  ;;  %p5680_p12 = scmp.lt.u32.totalorder %s5673_s17, %s6714_s2 }
  0x5c   : > { %p5676_p3 = pnand %p5674_p1, %p5976_p7 }
  0x5e   : > { %p5677_p11 = pneg %p5676_p3 }
  0x60   : > { %p5682_p13 = pnand %p5680_p12, %p5677_p11 }
  0x62   : > { %5685 = shalt.err (!%p5682_p13)
}
  0x63   : > { %s5686_s13 = scalar_lea.vmem %s236_s9, 64  ;;  %p5694_p6 = scmp.lt.s32.totalorder %s236_s9, %s236_s9 }
  0x64   : > { %p5687_p0 = scmp.ne.s32.totalorder %s236_s9, %s5686_s13  ;;  %p5695_p8 = scmp.lt.s32.totalorder %s5686_s13, %s5686_s13 }
  0x66   : > { %p5689_p2 = pnand %p5687_p0, %p5976_p7  ;;  %p5696_p9 = por %p5695_p8, %p5694_p6 }
  0x68   : > { %p5690_p4 = pneg %p5689_p2 }
  0x6a   : > { %p5697_p10 = pnand %p5696_p9, %p5690_p4 }
  0x6c   : > { %5700 = shalt.err (!%p5697_p10)
}
  0x6d   : > { %5011 = dma.hbm_to_vmem [thread:$0]  (!%p5960_p5), %s6714_s2, 64, %s236_s9, [#allocation6]  }
  0x6e   : > { %s5701_s28 = scalar_lea.hbm %s6716_s4, 32 }
  0x6f   : > { %p5702_p1 = scmp.ne.s32.totalorder %s6716_s4, %s5701_s28  ;;  %p5708_p12 = scmp.lt.u32.totalorder %s5701_s28, %s6716_s4 }
  0x71   : > { %p5704_p3 = pnand %p5702_p1, %p5976_p7 }
  0x73   : > { %p5705_p11 = pneg %p5704_p3 }
  0x75   : > { %p5710_p13 = pnand %p5708_p12, %p5705_p11 }
  0x77   : > { %5713 = shalt.err (!%p5710_p13)
}
  0x78   : > { %s5714_s18 = scalar_lea.vmem %s260_s14, 32  ;;  %p5722_p6 = scmp.lt.s32.totalorder %s260_s14, %s260_s14 }
  0x79   : > { %p5715_p0 = scmp.ne.s32.totalorder %s260_s14, %s5714_s18  ;;  %p5723_p8 = scmp.lt.s32.totalorder %s5714_s18, %s5714_s18 }
  0x7b   : > { %p5717_p2 = pnand %p5715_p0, %p5976_p7  ;;  %p5724_p9 = por %p5723_p8, %p5722_p6 }
  0x7d   : > { %p5718_p4 = pneg %p5717_p2 }
  0x7f   : > { %p5725_p10 = pnand %p5724_p9, %p5718_p4 }
  0x81   : > { %5728 = shalt.err (!%p5725_p10)
}
  0x82   : > { %5017 = dma.hbm_to_vmem [thread:$0]  (!%p5960_p5), %s6716_s4, 32, %s260_s14, [#allocation9]  }
  0x83   : > { %s5878_s21 = smov [#allocation13]   ;;  %s5729_s1 = scalar_lea.hbm %s6718_s6, 16 }
  0x84   : > { %s283_s13 = sshll.u32 %s5878_s21, 4  ;;  %p5730_p1 = scmp.ne.s32.totalorder %s6718_s6, %s5729_s1  ;;  %s284_s13 = int_to_ptr.vmem [resolvable:$true] %s283_s13 }
  0x85   : > { %p5736_p12 = scmp.lt.u32.totalorder %s5729_s1, %s6718_s6 }
  0x86   : > { %p5732_p3 = pnand %p5730_p1, %p5976_p7 }
  0x88   : > { %p5733_p11 = pneg %p5732_p3 }
  0x8a   : > { %p5738_p13 = pnand %p5736_p12, %p5733_p11 }
  0x8c   : > { %5741 = shalt.err (!%p5738_p13)
}
  0x8d   : > { %s5742_s14 = scalar_lea.vmem %s284_s13, 16  ;;  %s5749_s16 = scalar_lea.vmem %s284_s13, 32 }
  0x8e   : > { %p5743_p0 = scmp.ne.s32.totalorder %s284_s13, %s5742_s14  ;;  %p5750_p6 = scmp.lt.s32.totalorder %s284_s13, %s284_s13 }
  0x8f   : > { %p5751_p8 = scmp.lt.s32.totalorder %s5749_s16, %s5742_s14 }
  0x90   : > { %p5745_p2 = pnand %p5743_p0, %p5976_p7 }
  0x91   : > { %p5752_p9 = por %p5751_p8, %p5750_p6 }
  0x92   : > { %p5746_p4 = pneg %p5745_p2 }
  0x94   : > { %p5753_p10 = pnand %p5752_p9, %p5746_p4 }
  0x96   : > { %5756 = shalt.err (!%p5753_p10)
}
  0x97   : > { %5023 = dma.hbm_to_vmem [thread:$0]  (!%p5960_p5), %s6718_s6, 16, %s284_s13, [#allocation12]  }
  0x98   : > { %s4194_s19 = sadd.s32 4294967294, %s5865_s27   ;;  %s6097_s11 = sadd.s32 1, %s5865_s27  }
  0x99   : > { %s30_s9 = ssub.s32 %s5865_s27, %s6097_s11  ;;  %s33_s20 = sadd.s32 1, %s5861_s26 }
  0x9a   : > { %p31_p7 = scmp.eq.s32.totalorder %s30_s9, 0  ;;  %p40_p1 = scmp.ne.s32.totalorder %s5861_s26, %s5857_s25 }
  0x9b   : > { %p41_p3 = scmp.eq.s32.totalorder %s5865_s27, 0  ;;  %p46_p11 = scmp.ne.s32.totalorder %s5857_s25, %s5853_s24 }
  0x9c   : > { %s6108_s21 = scalar_select %p31_p7, %s5861_s26, %s33_s20  }
  0x9d   : > { %p6110_p12 = por %p41_p3, %p40_p1  ;;  %p6729_p13 = scmp.eq.s32.totalorder %s5945_s30, 0 }
  0x9e   : > { %p196_p0 = scmp.eq.s32.totalorder %s5945_s30, 2  ;;  %p202_p2 = scmp.eq.s32.totalorder %s4194_s19, 2 }
  0x9f   : > { %p6116_p5 = por %p6729_p13, %p46_p11  ;;  %p5038_p4 = scmp.lt.s32.totalorder %s5865_s27, 3 }
  0xa0   : > { %s294_s22 = sand.u32 1, %s5861_s26   ;;  %p6123_p6 = por %p196_p0, %p40_p1 }
  0xa1   : > { %p6127_p8 = por %p202_p2, %p46_p11  ;;  %s4203_s28 = sshll.u32 %s294_s22, 10 }
  0xa2   : > { %s6731_s1 = scalar_select %p6123_p6, 1, 0 }
  0xa3   : > { %s6732_s23 = scalar_select %p6127_p8, 1, 0 }
  0xa4   : > { %s4559_s12 = sshll.u32 %s5865_s27, 14  ;;  %s298_s17 = scalar_lea.vmem [#allocation2], %s4203_s28 }
  0xa5   : > { %s6135_s16 = scalar_lea.hbm %s6712_s0, %s4559_s12  ;;  %s306_s18 = sshll.u32 %s298_s17, 4  ;;  %s6137_s18 = int_to_ptr.vmem [resolvable:$true] %s306_s18 }
  0xa6   : > { %p6141_p9 = pnand %p5038_p4, %p6110_p12  ;;  %s6145_s9 = scalar_lea.sflag [#allocation3], %s294_s22 }
  0xa7   : > { %s5757_s20 = scalar_lea.hbm %s6135_s16, 16384  ;;  %s5762_s29 = scalar_lea.hbm %s6712_s0, 49152 }
  0xa8   : > { %p5758_p10 = scmp.ne.s32.totalorder %s6135_s16, %s5757_s20  ;;  %p5759_p7 = pneg %p6141_p9 }
  0xa9   : > { %p5763_p11 = scmp.lt.u32.totalorder %s6135_s16, %s6712_s0  ;;  %p5764_p12 = scmp.lt.u32.totalorder %s5762_s29, %s5757_s20 }
  0xaa   : > { %p5760_p1 = pnand %p5759_p7, %p5758_p10  ;;  %p5766_p0 = scmp.lt.u32.totalorder %s5757_s20, %s6135_s16 }
  0xab   : > { %p5765_p13 = por %p5764_p12, %p5763_p11 }
  0xac   : > { %p5761_p3 = pneg %p5760_p1 }
  0xad   : > { %p5767_p2 = por %p5766_p0, %p5765_p13 }
  0xaf   : > { %p5768_p4 = pnand %p5767_p2, %p5761_p3 }
  0xb1   : > { %5771 = shalt.err (!%p5768_p4)
}
  0xb2   : > { %s5772_s22 = scalar_lea.vmem %s6137_s18, 16384  ;;  %s5879_s17 = smov [#allocation2]  }
  0xb3   : > { %p5773_p10 = scmp.ne.s32.totalorder %s6137_s18, %s5772_s22  ;;  %s5777_s28 = sshll.u32 %s5879_s17, 4  ;;  %s5778_s28 = int_to_ptr.vmem [resolvable:$false] %s5777_s28 }
  0xb4   : > { %s5779_s12 = scalar_lea.vmem %s5778_s28, 32768  ;;  %p5780_p6 = scmp.lt.s32.totalorder %s6137_s18, %s5778_s28 }
  0xb5   : > { %p5775_p1 = pnand %p5773_p10, %p5759_p7  ;;  %p5781_p11 = scmp.lt.s32.totalorder %s5779_s12, %s5772_s22 }
  0xb7   : > { %p5776_p8 = pneg %p5775_p1  ;;  %p5782_p12 = por %p5781_p11, %p5780_p6 }
  0xb9   : > { %p5783_p13 = pnand %p5782_p12, %p5776_p8 }
  0xbb   : > { %5786 = shalt.err (!%p5783_p13)
}
  0xbc   : > { %s5880_s20 = smov 1024   ;;  %p6734_p7 = scmp.ne.s32.totalorder %s6724_s8, 0 }
  0xbd   : > { %5027 = dma.hbm_to_vmem [thread:$0]  (!%p6141_p9), %s6135_s16, 16384, %s6137_s18, %s6145_s9, %s5880_s20, %s5880_s20, %s5874_s10  }
  0xbe   : > { %318 = sbr.rel (%p6734_p7) target bundleno = 1263 (0x4ef), region = 48  ;;  %s6177_s29 = sand.u32 (!%p6734_p7), 1, %s5857_s25  }
  0xbf   : > { %s4208_s15 = sshll.u32 (!%p6734_p7), %s6177_s29, 10  ;;  %s321_s14 = scalar_lea.sflag (!%p6734_p7), [#allocation3], %s6177_s29 }
  0xc0   : > { %s6181_s22 = scalar_lea.vmem (!%p6734_p7), [#allocation2], %s4208_s15 }
  0xc5   : > { %5832 = dma.done.wait (%p6116_p5), %s321_s14, 16384  }
  0xc6   : > { %5834 = vsyncadd (%p6116_p5), %s321_s14, 4294950912  ;;  %p6735_p6 = scmp.eq.s32.totalorder %s5945_s30, 0 }
  0xc8   : > { %5836 = dma.done.wait (%p6735_p6), [#allocation6], 32832   ;;  %p6736_p8 = pmov %p6735_p6 }
  0xc9   : > { %p6737_p9 = pmov %p6735_p6 }
  0xca   : > { %5838 = vsyncadd (%p6736_p8), [#allocation6], 4294934464 }
  0xcb   : > { %5840 = dma.done.wait (%p6737_p9), [#allocation9], 8224   ;;  %p6738_p3 = pmov %p6735_p6 }
  0xcd   : > { %5842 = vsyncadd (%p6738_p3), [#allocation9], 4294959072  ;;  %p6739_p0 = pmov %p6738_p3 }
  0xcf   : > { %5844 = dma.done.wait (%p6739_p0), [#allocation12], 2064   ;;  %p6740_p2 = pmov %p6739_p0 }
  0xd0   : > { %v5093_v0 = vld [vmem:[#allocation5 + $0x4] ss:$16 sps:$4 sm:$0xff]   ;;  %v5095_v1 = vld [vmem:[#allocation5 + $0xc] ss:$16 sps:$4 sm:$0xff]   ;;  %v5097_v2 = vld [vmem:[#allocation5] ss:$16 sps:$4 sm:$0xff]  }
  0xd1   : > { %5846 = vsyncadd (%p6740_p2), [#allocation12], 4294965232  ;;  %2132 = vmatprep.subr.bf16.mxu0 %v5093_v0  ;;  %v5098_v3 = vld [vmem:[#allocation5 + $0x8] ss:$16 sps:$4 sm:$0xff]   ;;  %2584 = vmatprep.subr.bf16.mxu1 %v5095_v1  ;;  %v5099_v4 = vld [vmem:[#allocation5 + $0x24] ss:$16 sps:$4 sm:$0xff]  }
  0xd2   : > { %2133 = vmatpush1.bf16.msra.mxu0 %v5097_v2  ;;  %2585 = vmatpush1.bf16.msra.mxu1 %v5098_v3  ;;  %v5101_v5 = vld [vmem:[#allocation5 + $0x2c] ss:$16 sps:$4 sm:$0xff]   ;;  %v5103_v6 = vld [vmem:[#allocation5 + $0x20] ss:$16 sps:$4 sm:$0xff]   ;;  %v5104_v7 = vld [vmem:[#allocation5 + $0x28] ss:$16 sps:$4 sm:$0xff]  }
  0xd3   : > { %2134 = vmatprep.subr.bf16.mxu0 %v5099_v4  ;;  %2586 = vmatprep.subr.bf16.mxu1 %v5101_v5  ;;  %v5105_v8 = vld [vmem:[#allocation5 + $0x44] ss:$16 sps:$4 sm:$0xff]   ;;  %v5107_v9 = vld [vmem:[#allocation5 + $0x4c] ss:$16 sps:$4 sm:$0xff]   ;;  %v5109_v10 = vld [vmem:[#allocation5 + $0x40] ss:$16 sps:$4 sm:$0xff]  }
  0xd4   : > { %v5110_v11 = vld [vmem:[#allocation5 + $0x48] ss:$16 sps:$4 sm:$0xff]   ;;  %v5111_v12 = vld [vmem:[#allocation5 + $0x64] ss:$16 sps:$4 sm:$0xff]   ;;  %v5113_v13 = vld [vmem:[#allocation5 + $0x6c] ss:$16 sps:$4 sm:$0xff]  }
  0xd5   : > { %v5115_v14 = vld [vmem:[#allocation5 + $0x60] ss:$16 sps:$4 sm:$0xff]   ;;  %v5116_v15 = vld [vmem:[#allocation5 + $0x68] ss:$16 sps:$4 sm:$0xff]   ;;  %v5117_v16 = vld [vmem:[#allocation5 + $0x84] ss:$16 sps:$4 sm:$0xff]  }
  0xd6   : > { %2135 = vmatpush1.bf16.msra.mxu0 %v5103_v6  ;;  %2587 = vmatpush1.bf16.msra.mxu1 %v5104_v7  ;;  %v5119_v17 = vld [vmem:[#allocation5 + $0x8c] ss:$16 sps:$4 sm:$0xff]   ;;  %v5121_v18 = vld [vmem:[#allocation5 + $0x80] ss:$16 sps:$4 sm:$0xff]   ;;  %v5122_v19 = vld [vmem:[#allocation5 + $0x88] ss:$16 sps:$4 sm:$0xff]  }
  0xd7   : > { %2136 = vmatprep.subr.bf16.mxu0 %v5105_v8  ;;  %2588 = vmatprep.subr.bf16.mxu1 %v5107_v9  ;;  %v5123_v20 = vld [vmem:[#allocation5 + $0xa4] ss:$16 sps:$4 sm:$0xff]   ;;  %v5125_v21 = vld [vmem:[#allocation5 + $0xac] ss:$16 sps:$4 sm:$0xff]   ;;  %v5127_v22 = vld [vmem:[#allocation5 + $0xa0] ss:$16 sps:$4 sm:$0xff]  }
  0xd8   : > { %v5128_v23 = vld [vmem:[#allocation5 + $0xa8] ss:$16 sps:$4 sm:$0xff]   ;;  %v5129_v24 = vld [vmem:[#allocation5 + $0xc4] ss:$16 sps:$4 sm:$0xff]   ;;  %v5131_v25 = vld [vmem:[#allocation5 + $0xcc] ss:$16 sps:$4 sm:$0xff]  }
  0xd9   : > { %v5133_v26 = vld [vmem:[#allocation5 + $0xc0] ss:$16 sps:$4 sm:$0xff]   ;;  %v5134_v27 = vld [vmem:[#allocation5 + $0xc8] ss:$16 sps:$4 sm:$0xff]   ;;  %v5135_v28 = vld [vmem:[#allocation5 + $0xe4] ss:$16 sps:$4 sm:$0xff]  }
  0xda   : > { %2137 = vmatpush1.bf16.msra.mxu0 %v5109_v10  ;;  %2589 = vmatpush1.bf16.msra.mxu1 %v5110_v11  ;;  %v5137_v29 = vld [vmem:[#allocation5 + $0xec] ss:$16 sps:$4 sm:$0xff]   ;;  %v5139_v30 = vld [vmem:[#allocation5 + $0xe0] ss:$16 sps:$4 sm:$0xff]   ;;  %v5140_v31 = vld [vmem:[#allocation5 + $0xe8] ss:$16 sps:$4 sm:$0xff]  }
  0xdb   : > { %2138 = vmatprep.subr.bf16.mxu0 %v5111_v12  ;;  %2590 = vmatprep.subr.bf16.mxu1 %v5113_v13  ;;  %v5141_v32 = vld [vmem:[#allocation5 + $0x104] ss:$16 sps:$4 sm:$0xff]   ;;  %v5143_v33 = vld [vmem:[#allocation5 + $0x10c] ss:$16 sps:$4 sm:$0xff]   ;;  %v5145_v34 = vld [vmem:[#allocation5 + $0x100] ss:$16 sps:$4 sm:$0xff]  }
  0xdc   : > { %v5146_v35 = vld [vmem:[#allocation5 + $0x108] ss:$16 sps:$4 sm:$0xff]   ;;  %v5147_v36 = vld [vmem:[#allocation5 + $0x124] ss:$16 sps:$4 sm:$0xff]   ;;  %v5149_v37 = vld [vmem:[#allocation5 + $0x12c] ss:$16 sps:$4 sm:$0xff]  }
  0xdd   : > { %v5151_v38 = vld [vmem:[#allocation5 + $0x120] ss:$16 sps:$4 sm:$0xff]   ;;  %v5152_v39 = vld [vmem:[#allocation5 + $0x128] ss:$16 sps:$4 sm:$0xff]   ;;  %v5153_v40 = vld [vmem:[#allocation5 + $0x144] ss:$16 sps:$4 sm:$0xff]  }
  0xde   : > { %2139 = vmatpush1.bf16.msra.mxu0 %v5115_v14  ;;  %2591 = vmatpush1.bf16.msra.mxu1 %v5116_v15  ;;  %v5155_v41 = vld [vmem:[#allocation5 + $0x14c] ss:$16 sps:$4 sm:$0xff]   ;;  %v5157_v42 = vld [vmem:[#allocation5 + $0x140] ss:$16 sps:$4 sm:$0xff]   ;;  %v5158_v43 = vld [vmem:[#allocation5 + $0x148] ss:$16 sps:$4 sm:$0xff]  }
  0xdf   : > { %2140 = vmatprep.subr.bf16.mxu0 %v5117_v16  ;;  %2592 = vmatprep.subr.bf16.mxu1 %v5119_v17  ;;  %v5159_v44 = vld [vmem:[#allocation5 + $0x164] ss:$16 sps:$4 sm:$0xff]   ;;  %v5161_v45 = vld [vmem:[#allocation5 + $0x16c] ss:$16 sps:$4 sm:$0xff]   ;;  %v5163_v47 = vld [vmem:[#allocation5 + $0x160] ss:$16 sps:$4 sm:$0xff]  }
  0xe0   : > { %v383_v46 = vld [vmem:[%s6181_s22 + $0x8] sm:$0xff]  ;;  %v5165_v50 = vld [vmem:[#allocation5 + $0x184] ss:$16 sps:$4 sm:$0xff]   ;;  %v5169_v53 = vld [vmem:[#allocation5 + $0x180] ss:$16 sps:$4 sm:$0xff]   ;;  %s4215_s8 = sshll.u32 %s6177_s29, 7 }
  0xe1   : > { %v5164_v48 = vld [vmem:[#allocation5 + $0x168] ss:$16 sps:$4 sm:$0xff]   ;;  %v5167_v52 = vld [vmem:[#allocation5 + $0x18c] ss:$16 sps:$4 sm:$0xff]   ;;  %v5171_v55 = vld [vmem:[#allocation5 + $0x1a4] ss:$16 sps:$4 sm:$0xff]  }
  0xe2   : > { %2141 = vmatpush1.bf16.msra.mxu0 %v5121_v18  ;;  %2593 = vmatpush1.bf16.msra.mxu1 %v5122_v19  ;;  %v391_v49 = vld [vmem:[%s6181_s22 + $0x48] sm:$0xff]  ;;  %v5175_v57 = vld [vmem:[#allocation5 + $0x1a0] ss:$16 sps:$4 sm:$0xff]   ;;  %v5177_v59 = vld [vmem:[#allocation5 + $0x1c4] ss:$16 sps:$4 sm:$0xff]   ;;  %s6629_s10 = scalar_lea.vmem [#allocation14], %s4215_s8 }
  0xe3   : > { %2142 = vmatprep.subr.bf16.mxu0 %v5123_v20  ;;  %2594 = vmatprep.subr.bf16.mxu1 %v5125_v21  ;;  %v511_v51 = vpack.c.bf16 %v391_v49, %v383_v46  ;;  %v5170_v54 = vld [vmem:[#allocation5 + $0x188] ss:$16 sps:$4 sm:$0xff]   ;;  %v5173_v56 = vld [vmem:[#allocation5 + $0x1ac] ss:$16 sps:$4 sm:$0xff]   ;;  %v5181_v61 = vld [vmem:[#allocation5 + $0x1c0] ss:$16 sps:$4 sm:$0xff]  }
  0xe4   : > { %v5176_v58 = vld [vmem:[#allocation5 + $0x1a8] ss:$16 sps:$4 sm:$0xff]   ;;  %v5179_v60 = vld [vmem:[#allocation5 + $0x1cc] ss:$16 sps:$4 sm:$0xff]   ;;  %v5183_v63 = vld [vmem:[#allocation5 + $0x1e4] ss:$16 sps:$4 sm:$0xff]  }
  0xe5   : > { %2164 = vmatprep.mubr.bf16.mxu0 %v511_v51  ;;  %2616 = vmatprep.mubr.bf16.mxu1 %v511_v51  ;;  %v5182_v62 = vld [vmem:[#allocation5 + $0x1c8] ss:$16 sps:$4 sm:$0xff]   ;;  %v5185_v0 = vld [vmem:[#allocation5 + $0x1ec] ss:$16 sps:$4 sm:$0xff]   ;;  %v5187_v1 = vld [vmem:[#allocation5 + $0x1e0] ss:$16 sps:$4 sm:$0xff]  }
  0xe6   : > { %2143 = vmatpush1.bf16.msra.mxu0 %v5127_v22  ;;  %2595 = vmatpush1.bf16.msra.mxu1 %v5128_v23  ;;  %v5188_v2 = vld [vmem:[#allocation5 + $0x1e8] ss:$16 sps:$4 sm:$0xff]   ;;  %v382_v3 = vld [vmem:[%s6181_s22] sm:$0xff]  ;;  %v5194_v6 = vld [vmem:[#allocation5 + $0x20c] ss:$16 sps:$4 sm:$0xff]   ;;  %s4560_s13 = sshll.u32 %s5945_s30, 11 }
  0xe7   : > { %2144 = vmatprep.subr.bf16.mxu0 %v5129_v24  ;;  %2596 = vmatprep.subr.bf16.mxu1 %v5131_v25  ;;  %v390_v4 = vld [vmem:[%s6181_s22 + $0x40] sm:$0xff]  ;;  %v5192_v9 = vld [vmem:[#allocation5 + $0x208] ss:$16 sps:$4 sm:$0xff]   ;;  %v5200_v13 = vld [vmem:[#allocation5 + $0x22c] ss:$16 sps:$4 sm:$0xff]   ;;  %s4064_s16 = sshll.u32 %s6629_s10, 4  ;;  %s6664_s9 = scalar_lea.hbm %s6719_s7, %s4560_s13  ;;  %s6666_s16 = int_to_ptr.vmem [resolvable:$true] %s4064_s16 }
  0xe8   : > { %v5191_v5 = vld [vmem:[#allocation5 + $0x204] ss:$16 sps:$4 sm:$0xff]   ;;  %v5189_v7 = vld [vmem:[#allocation5 + $0x200] ss:$16 sps:$4 sm:$0xff]   ;;  %v510_v8 = vpack.c.bf16 %v390_v4, %v382_v3  ;;  %v399_v10 = vld [vmem:[%s6181_s22 + $0x88] sm:$0xff]  ;;  %s4051_s30 = scalar_lea.sflag [#allocation4], %s6177_s29 }
  0xe9   : > { %v407_v11 = vld [vmem:[%s6181_s22 + $0xc8] sm:$0xff]  ;;  %v5197_v12 = vld [vmem:[#allocation5 + $0x224] ss:$16 sps:$4 sm:$0xff]   ;;  %v5195_v14 = vld [vmem:[#allocation5 + $0x220] ss:$16 sps:$4 sm:$0xff]   ;;  %s5787_s17 = scalar_lea.vmem %s6666_s16, 2048 }
  0xea   : > { %2145 = vmatpush1.bf16.msra.mxu0 %v5133_v26  ;;  %2597 = vmatpush1.bf16.msra.mxu1 %v5134_v27  ;;  %v519_v15 = vpack.c.bf16 %v407_v11, %v399_v10  ;;  %v5198_v16 = vld [vmem:[#allocation5 + $0x228] ss:$16 sps:$4 sm:$0xff]   ;;  %v398_v17 = vld [vmem:[%s6181_s22 + $0x80] sm:$0xff]  ;;  %v5206_v20 = vld [vmem:[#allocation5 + $0x24c] ss:$16 sps:$4 sm:$0xff]   ;;  %p5788_p5 = scmp.ne.s32.totalorder %s6666_s16, %s5787_s17  ;;  %p6741_p4 = scmp.ne.s32.totalorder %s6731_s1, 0 }
  0xeb   : > { %2146 = vmatprep.subr.bf16.mxu0 %v5135_v28  ;;  %2598 = vmatprep.subr.bf16.mxu1 %v5137_v29  ;;  %v406_v18 = vld [vmem:[%s6181_s22 + $0xc0] sm:$0xff]  ;;  %v5204_v22 = vld [vmem:[#allocation5 + $0x248] ss:$16 sps:$4 sm:$0xff]   ;;  %v5212_v27 = vld [vmem:[#allocation5 + $0x26c] ss:$16 sps:$4 sm:$0xff]   ;;  %s5881_s28 = smov [#allocation14]  }
  0xec   : > { %v5203_v19 = vld [vmem:[#allocation5 + $0x244] ss:$16 sps:$4 sm:$0xff]   ;;  %v5201_v21 = vld [vmem:[#allocation5 + $0x240] ss:$16 sps:$4 sm:$0xff]   ;;  %v518_v23 = vpack.c.bf16 %v406_v18, %v398_v17  ;;  %v415_v24 = vld [vmem:[%s6181_s22 + $0x108] sm:$0xff]  ;;  %p5789_p10 = pnand %p5788_p5, %p6741_p4  ;;  %s5791_s12 = sshll.u32 %s5881_s28, 4  ;;  %s5792_s12 = int_to_ptr.vmem [resolvable:$false] %s5791_s12 }
  0xed   : > { %v423_v25 = vld [vmem:[%s6181_s22 + $0x148] sm:$0xff]  ;;  %v5209_v26 = vld [vmem:[#allocation5 + $0x264] ss:$16 sps:$4 sm:$0xff]   ;;  %v5207_v29 = vld [vmem:[#allocation5 + $0x260] ss:$16 sps:$4 sm:$0xff]   ;;  %s5793_s20 = scalar_lea.vmem %s5792_s12, 4096  ;;  %p5794_p11 = scmp.lt.s32.totalorder %s6666_s16, %s5792_s12 }
  0xee   : > { %2147 = vmatpush1.bf16.msra.mxu0 %v5139_v30  ;;  %2599 = vmatpush1.bf16.msra.mxu1 %v5140_v31  ;;  %v527_v28 = vpack.c.bf16 %v423_v25, %v415_v24  ;;  %v5210_v30 = vld [vmem:[#allocation5 + $0x268] ss:$16 sps:$4 sm:$0xff]   ;;  %v414_v31 = vld [vmem:[%s6181_s22 + $0x100] sm:$0xff]  ;;  %p5790_p1 = pneg %p5789_p10  ;;  %p5795_p12 = scmp.lt.s32.totalorder %s5793_s20, %s5787_s17 }
  0xef   : > { %2148 = vmatprep.subr.bf16.mxu0 %v5141_v32  ;;  %2600 = vmatprep.subr.bf16.mxu1 %v5143_v33  ;;  %v422_v32 = vld [vmem:[%s6181_s22 + $0x140] sm:$0xff]  ;;  %v447_v51 = vld [vmem:[%s6181_s22 + $0x208] sm:$0xff] }
  0xf0   : > { %v5215_v33 = vld [vmem:[#allocation5 + $0x284] ss:$16 sps:$4 sm:$0xff]   ;;  %v5225_v49 = vld [vmem:[#allocation5 + $0x2c0] ss:$16 sps:$4 sm:$0xff]   ;;  %v5240_v3 = vld [vmem:[#allocation5 + $0x308] ss:$16 sps:$4 sm:$0xff]   ;;  %p5796_p13 = por %p5795_p12, %p5794_p11 }
  0xf1   : > { %v438_v46 = vld [vmem:[%s6181_s22 + $0x1c0] sm:$0xff]  ;;  %v487_v17 = vld [vmem:[%s6181_s22 + $0x348] sm:$0xff] }
  0xf2   : > { %2149 = vmatpush1.bf16.msra.mxu0 %v5145_v34  ;;  %2601 = vmatpush1.bf16.msra.mxu1 %v5146_v35  ;;  %v5218_v34 = vld [vmem:[#allocation5 + $0x28c] ss:$16 sps:$4 sm:$0xff]   ;;  %v5213_v35 = vld [vmem:[#allocation5 + $0x280] ss:$16 sps:$4 sm:$0xff]   ;;  %v5245_v4 = vld [vmem:[#allocation5 + $0x324] ss:$16 sps:$4 sm:$0xff]   ;;  %p5797_p7 = pnand %p5796_p13, %p5790_p1 }
  0xf3   : > { %2150 = vmatprep.subr.bf16.mxu0 %v5147_v36  ;;  %2602 = vmatprep.subr.bf16.mxu1 %v5149_v37  ;;  %v5216_v36 = vld [vmem:[#allocation5 + $0x288] ss:$16 sps:$4 sm:$0xff]   ;;  %v526_v37 = vpack.c.bf16 %v422_v32, %v414_v31  ;;  %v470_v10 = vld [vmem:[%s6181_s22 + $0x2c0] sm:$0xff] }
  0xf4   : > { %v5251_v11 = vld [vmem:[#allocation5 + $0x344] ss:$16 sps:$4 sm:$0xff]   ;;  %v503_v31 = vld [vmem:[%s6181_s22 + $0x3c8] sm:$0xff] }
  0xf5   : > { %v5257_v18 = vld [vmem:[#allocation5 + $0x364] ss:$16 sps:$4 sm:$0xff]  }
  0xf6   : > { %2151 = vmatpush1.bf16.msra.mxu0 %v5151_v38  ;;  %2603 = vmatpush1.bf16.msra.mxu1 %v5152_v39  ;;  %v431_v38 = vld [vmem:[%s6181_s22 + $0x188] sm:$0xff]  ;;  %v486_v24 = vld [vmem:[%s6181_s22 + $0x340] sm:$0xff] }
  0xf7   : > { %2152 = vmatprep.subr.bf16.mxu0 %v5153_v40  ;;  %2604 = vmatprep.subr.bf16.mxu1 %v5155_v41  ;;  %v439_v39 = vld [vmem:[%s6181_s22 + $0x1c8] sm:$0xff]  ;;  %v5221_v40 = vld [vmem:[#allocation5 + $0x2a4] ss:$16 sps:$4 sm:$0xff]  }
  0xf8   : > { %v5224_v41 = vld [vmem:[#allocation5 + $0x2ac] ss:$16 sps:$4 sm:$0xff]   ;;  %v5263_v25 = vld [vmem:[#allocation5 + $0x384] ss:$16 sps:$4 sm:$0xff]  }
  0xf9   : > { %v5269_v32 = vld [vmem:[#allocation5 + $0x3a4] ss:$16 sps:$4 sm:$0xff]  }
  0xfa   : > { %2153 = vmatpush1.bf16.msra.mxu0 %v5157_v42  ;;  %2605 = vmatpush1.bf16.msra.mxu1 %v5158_v43  ;;  %v5219_v42 = vld [vmem:[#allocation5 + $0x2a0] ss:$16 sps:$4 sm:$0xff]   ;;  %v535_v43 = vpack.c.bf16 %v439_v39, %v431_v38  ;;  %v5275_v39 = vld [vmem:[#allocation5 + $0x3c4] ss:$16 sps:$4 sm:$0xff]  }
  0xfb   : > { %2154 = vmatprep.subr.bf16.mxu0 %v5159_v44  ;;  %2606 = vmatprep.subr.bf16.mxu1 %v5161_v45  ;;  %v5222_v44 = vld [vmem:[#allocation5 + $0x2a8] ss:$16 sps:$4 sm:$0xff]   ;;  %v430_v45 = vld [vmem:[%s6181_s22 + $0x180] sm:$0xff] }
  0xfc   : > { %v502_v38 = vld [vmem:[%s6181_s22 + $0x3c0] sm:$0xff] }
  0xfe   : > { %2155 = vmatpush1.bf16.msra.mxu0 %v5163_v47  ;;  %2607 = vmatpush1.bf16.msra.mxu1 %v5164_v48  ;;  %v5227_v47 = vld [vmem:[#allocation5 + $0x2c4] ss:$16 sps:$4 sm:$0xff]   ;;  %v5230_v48 = vld [vmem:[#allocation5 + $0x2cc] ss:$16 sps:$4 sm:$0xff]  }
  0xff   : > { %2156 = vmatprep.subr.bf16.mxu0 %v5165_v50  ;;  %2608 = vmatprep.subr.bf16.mxu1 %v5167_v52  ;;  %v534_v50 = vpack.c.bf16 %v438_v46, %v430_v45  ;;  %v455_v52 = vld [vmem:[%s6181_s22 + $0x248] sm:$0xff]  ;;  %v393_v45 = vld [vmem:[%s6181_s22 + $0x58] sm:$0xff]  ;;  %v5281_v46 = vld [vmem:[#allocation5 + $0x3e4] ss:$16 sps:$4 sm:$0xff]  }
 0x102   : > { %2157 = vmatpush1.bf16.msra.mxu0 %v5169_v53  ;;  %2609 = vmatpush1.bf16.msra.mxu1 %v5170_v54  ;;  %v5228_v53 = vld [vmem:[#allocation5 + $0x2c8] ss:$16 sps:$4 sm:$0xff]   ;;  %v5233_v54 = vld [vmem:[#allocation5 + $0x2e4] ss:$16 sps:$4 sm:$0xff]  }
 0x103   : > { %2158 = vmatprep.subr.bf16.mxu0 %v5171_v55  ;;  %2610 = vmatprep.subr.bf16.mxu1 %v5173_v56  ;;  %v5236_v55 = vld [vmem:[#allocation5 + $0x2ec] ss:$16 sps:$4 sm:$0xff]   ;;  %v5231_v56 = vld [vmem:[#allocation5 + $0x2e0] ss:$16 sps:$4 sm:$0xff]  }
 0x106   : > { %2159 = vmatpush1.bf16.msra.mxu0 %v5175_v57  ;;  %2611 = vmatpush1.bf16.msra.mxu1 %v5176_v58  ;;  %v5234_v57 = vld [vmem:[#allocation5 + $0x2e8] ss:$16 sps:$4 sm:$0xff]   ;;  %v543_v58 = vpack.c.bf16 %v455_v52, %v447_v51  ;;  %v384_v51 = vld [vmem:[%s6181_s22 + $0x10] sm:$0xff] }
 0x107   : > { %2160 = vmatprep.subr.bf16.mxu0 %v5177_v59  ;;  %2612 = vmatprep.subr.bf16.mxu1 %v5179_v60  ;;  %v446_v59 = vld [vmem:[%s6181_s22 + $0x200] sm:$0xff]  ;;  %v392_v52 = vld [vmem:[%s6181_s22 + $0x50] sm:$0xff] }
 0x108   : > { %v454_v60 = vld [vmem:[%s6181_s22 + $0x240] sm:$0xff] }
 0x10a   : > { %2161 = vmatpush1.bf16.msra.mxu0 %v5181_v61  ;;  %2613 = vmatpush1.bf16.msra.mxu1 %v5182_v62  ;;  %v5239_v61 = vld [vmem:[#allocation5 + $0x304] ss:$16 sps:$4 sm:$0xff]   ;;  %v5242_v62 = vld [vmem:[#allocation5 + $0x30c] ss:$16 sps:$4 sm:$0xff]  }
 0x10b   : > { %2162 = vmatprep.subr.bf16.mxu0 %v5183_v63  ;;  %2614 = vmatprep.subr.bf16.mxu1 %v5185_v0  ;;  %v542_v63 = vpack.c.bf16 %v454_v60, %v446_v59  ;;  %v463_v0 = vld [vmem:[%s6181_s22 + $0x288] sm:$0xff]  ;;  %v5293_v60 = vld [vmem:[#allocation5 + $0x424] ss:$16 sps:$4 sm:$0xff]  }
 0x10c   : > { %v5288_v59 = vld [vmem:[#allocation5 + $0x408] ss:$16 sps:$4 sm:$0xff]  }
 0x10e   : > { %2163 = vmatpush1.bf16.msra.mxu0 %v5187_v1  ;;  %2615 = vmatpush1.bf16.msra.mxu1 %v5188_v2  ;;  %v471_v1 = vld [vmem:[%s6181_s22 + $0x2c8] sm:$0xff]  ;;  %v5237_v2 = vld [vmem:[#allocation5 + $0x300] ss:$16 sps:$4 sm:$0xff]  }
 0x10f   : > { %2245 = vmatprep.subr.bf16.mxu0 %v5191_v5  ;;  %2697 = vmatprep.subr.bf16.mxu1 %v5194_v6  ;;  %v5248_v5 = vld [vmem:[#allocation5 + $0x32c] ss:$16 sps:$4 sm:$0xff]   ;;  %v5243_v6 = vld [vmem:[#allocation5 + $0x320] ss:$16 sps:$4 sm:$0xff]  }
 0x111   : > { %2165 = vmatmul.mubr.bf16.vlgmr.msra.gmra.mrb[0].mxu0 %v510_v8  ;;  %2617 = vmatmul.mubr.bf16.vlgmr.msra.gmra.mrb[0].mxu1 %v510_v8  ;;  %v551_v8 = vpack.c.bf16 %v471_v1, %v463_v0  ;;  %v400_v1 = vld [vmem:[%s6181_s22 + $0x90] sm:$0xff] }
 0x112   : > { %2246 = vmatpush1.bf16.msra.mxu0 %v5189_v7  ;;  %2698 = vmatpush1.bf16.msra.mxu1 %v5192_v9  ;;  %v5246_v7 = vld [vmem:[#allocation5 + $0x328] ss:$16 sps:$4 sm:$0xff]   ;;  %v462_v9 = vld [vmem:[%s6181_s22 + $0x280] sm:$0xff] }
 0x113   : > { %2247 = vmatprep.subr.bf16.mxu0 %v5197_v12  ;;  %2699 = vmatprep.subr.bf16.mxu1 %v5200_v13  ;;  %v5254_v12 = vld [vmem:[#allocation5 + $0x34c] ss:$16 sps:$4 sm:$0xff]   ;;  %v5249_v13 = vld [vmem:[#allocation5 + $0x340] ss:$16 sps:$4 sm:$0xff]  }
 0x114   : > { %2174 = vmatprep.mubr.bf16.mxu0 %v519_v15  ;;  %2626 = vmatprep.mubr.bf16.mxu1 %v519_v15  ;;  %v5252_v15 = vld [vmem:[#allocation5 + $0x348] ss:$16 sps:$4 sm:$0xff]  }
 0x116   : > { %2248 = vmatpush1.bf16.msra.mxu0 %v5195_v14  ;;  %2700 = vmatpush1.bf16.msra.mxu1 %v5198_v16  ;;  %v550_v14 = vpack.c.bf16 %v470_v10, %v462_v9  ;;  %v479_v16 = vld [vmem:[%s6181_s22 + $0x308] sm:$0xff]  ;;  %v5305_v10 = vld [vmem:[#allocation5 + $0x464] ss:$16 sps:$4 sm:$0xff]  }
 0x117   : > { %2249 = vmatprep.subr.bf16.mxu0 %v5203_v19  ;;  %2701 = vmatprep.subr.bf16.mxu1 %v5206_v20  ;;  %v5260_v19 = vld [vmem:[#allocation5 + $0x36c] ss:$16 sps:$4 sm:$0xff]   ;;  %v5255_v20 = vld [vmem:[#allocation5 + $0x360] ss:$16 sps:$4 sm:$0xff]   ;;  %v5300_v9 = vld [vmem:[#allocation5 + $0x448] ss:$16 sps:$4 sm:$0xff]  }
 0x119   : > { %2175 = vmatmul.mubr.bf16.gmra.mrb[4].mxu0 %v518_v23  ;;  %2627 = vmatmul.mubr.bf16.gmra.mrb[4].mxu1 %v518_v23  ;;  %v478_v23 = vld [vmem:[%s6181_s22 + $0x300] sm:$0xff] }
 0x11a   : > { %2250 = vmatpush1.bf16.msra.mxu0 %v5201_v21  ;;  %2702 = vmatpush1.bf16.msra.mxu1 %v5204_v22  ;;  %v559_v21 = vpack.c.bf16 %v487_v17, %v479_v16  ;;  %v5258_v22 = vld [vmem:[#allocation5 + $0x368] ss:$16 sps:$4 sm:$0xff]   ;;  %v424_v16 = vld [vmem:[%s6181_s22 + $0x150] sm:$0xff] }
 0x11b   : > { %2251 = vmatprep.subr.bf16.mxu0 %v5209_v26  ;;  %2703 = vmatprep.subr.bf16.mxu1 %v5212_v27  ;;  %v5266_v26 = vld [vmem:[#allocation5 + $0x38c] ss:$16 sps:$4 sm:$0xff]   ;;  %v5261_v27 = vld [vmem:[#allocation5 + $0x380] ss:$16 sps:$4 sm:$0xff]   ;;  %v5311_v17 = vld [vmem:[#allocation5 + $0x484] ss:$16 sps:$4 sm:$0xff]  }
 0x11c   : > { %2184 = vmatprep.mubr.bf16.mxu0 %v527_v28  ;;  %2636 = vmatprep.mubr.bf16.mxu1 %v527_v28  ;;  %v5264_v28 = vld [vmem:[#allocation5 + $0x388] ss:$16 sps:$4 sm:$0xff]  }
 0x11e   : > { %2252 = vmatpush1.bf16.msra.mxu0 %v5207_v29  ;;  %2704 = vmatpush1.bf16.msra.mxu1 %v5210_v30  ;;  %v558_v29 = vpack.c.bf16 %v486_v24, %v478_v23  ;;  %v495_v30 = vld [vmem:[%s6181_s22 + $0x388] sm:$0xff]  ;;  %v441_v23 = vld [vmem:[%s6181_s22 + $0x1d8] sm:$0xff]  ;;  %v5317_v24 = vld [vmem:[#allocation5 + $0x4a4] ss:$16 sps:$4 sm:$0xff]  }
 0x11f   : > { %2253 = vmatprep.subr.bf16.mxu0 %v5215_v33  ;;  %2705 = vmatprep.subr.bf16.mxu1 %v5218_v34  ;;  %v5272_v33 = vld [vmem:[#allocation5 + $0x3ac] ss:$16 sps:$4 sm:$0xff]   ;;  %v567_v34 = vpack.c.bf16 %v503_v31, %v495_v30  ;;  %v440_v30 = vld [vmem:[%s6181_s22 + $0x1d0] sm:$0xff] }
 0x120   : > { %v5323_v31 = vld [vmem:[#allocation5 + $0x4c4] ss:$16 sps:$4 sm:$0xff]  }
 0x121   : > { %2185 = vmatmul.mubr.bf16.gmra.mrb[8].mxu0 %v526_v37  ;;  %2637 = vmatmul.mubr.bf16.gmra.mrb[8].mxu1 %v526_v37  ;;  %v494_v37 = vld [vmem:[%s6181_s22 + $0x380] sm:$0xff] }
 0x122   : > { %2254 = vmatpush1.bf16.msra.mxu0 %v5213_v35  ;;  %2706 = vmatpush1.bf16.msra.mxu1 %v5216_v36  ;;  %v5267_v35 = vld [vmem:[#allocation5 + $0x3a0] ss:$16 sps:$4 sm:$0xff]   ;;  %v5270_v36 = vld [vmem:[#allocation5 + $0x3a8] ss:$16 sps:$4 sm:$0xff]  }
 0x123   : > { %2255 = vmatprep.subr.bf16.mxu0 %v5221_v40  ;;  %2707 = vmatprep.subr.bf16.mxu1 %v5224_v41  ;;  %v5278_v40 = vld [vmem:[#allocation5 + $0x3cc] ss:$16 sps:$4 sm:$0xff]   ;;  %v5273_v41 = vld [vmem:[#allocation5 + $0x3c0] ss:$16 sps:$4 sm:$0xff]  }
 0x124   : > { %2194 = vmatprep.mubr.bf16.mxu0 %v535_v43  ;;  %2646 = vmatprep.mubr.bf16.mxu1 %v535_v43  ;;  %v566_v43 = vpack.c.bf16 %v502_v38, %v494_v37  ;;  %v457_v37 = vld [vmem:[%s6181_s22 + $0x258] sm:$0xff]  ;;  %v5329_v38 = vld [vmem:[#allocation5 + $0x4e4] ss:$16 sps:$4 sm:$0xff]  }
 0x126   : > { %2256 = vmatpush1.bf16.msra.mxu0 %v5219_v42  ;;  %2708 = vmatpush1.bf16.msra.mxu1 %v5222_v44  ;;  %v5276_v42 = vld [vmem:[#allocation5 + $0x3c8] ss:$16 sps:$4 sm:$0xff]  }
 0x127   : > { %2257 = vmatprep.subr.bf16.mxu0 %v5227_v47  ;;  %2709 = vmatprep.subr.bf16.mxu1 %v5230_v48  ;;  %v385_v44 = vld [vmem:[%s6181_s22 + $0x18] sm:$0xff]  ;;  %v5279_v48 = vld [vmem:[#allocation5 + $0x3e0] ss:$16 sps:$4 sm:$0xff]  }
 0x128   : > { %v5284_v47 = vld [vmem:[#allocation5 + $0x3ec] ss:$16 sps:$4 sm:$0xff]  }
 0x129   : > { %2195 = vmatmul.mubr.bf16.gmra.mrb[12].mxu0 %v534_v50  ;;  %2647 = vmatmul.mubr.bf16.gmra.mrb[12].mxu1 %v534_v50  ;;  %v5282_v50 = vld [vmem:[#allocation5 + $0x3e8] ss:$16 sps:$4 sm:$0xff]  }
 0x12a   : > { %2258 = vmatpush1.bf16.msra.mxu0 %v5225_v49  ;;  %2710 = vmatpush1.bf16.msra.mxu1 %v5228_v53  ;;  %v513_v49 = vpack.c.bf16 %v393_v45, %v385_v44  ;;  %v5287_v53 = vld [vmem:[#allocation5 + $0x404] ss:$16 sps:$4 sm:$0xff]  }
 0x12b   : > { %2259 = vmatprep.subr.bf16.mxu0 %v5233_v54  ;;  %2711 = vmatprep.subr.bf16.mxu1 %v5236_v55  ;;  %v5290_v54 = vld [vmem:[#allocation5 + $0x40c] ss:$16 sps:$4 sm:$0xff]   ;;  %v5285_v55 = vld [vmem:[#allocation5 + $0x400] ss:$16 sps:$4 sm:$0xff]   ;;  %v5335_v45 = vld [vmem:[#allocation5 + $0x504] ss:$16 sps:$4 sm:$0xff]  }
 0x12c   : > { %2204 = vmatprep.mubr.bf16.mxu0 %v543_v58  ;;  %2656 = vmatprep.mubr.bf16.mxu1 %v543_v58  ;;  %v409_v58 = vld [vmem:[%s6181_s22 + $0xd8] sm:$0xff]  ;;  %v456_v44 = vld [vmem:[%s6181_s22 + $0x250] sm:$0xff] }
 0x12e   : > { %2260 = vmatpush1.bf16.msra.mxu0 %v5231_v56  ;;  %2712 = vmatpush1.bf16.msra.mxu1 %v5234_v57  ;;  %v512_v56 = vpack.c.bf16 %v392_v52, %v384_v51  ;;  %v401_v57 = vld [vmem:[%s6181_s22 + $0x98] sm:$0xff]  ;;  %v5341_v52 = vld [vmem:[#allocation5 + $0x524] ss:$16 sps:$4 sm:$0xff]  }
 0x12f   : > { %2261 = vmatprep.subr.bf16.mxu0 %v5239_v61  ;;  %2713 = vmatprep.subr.bf16.mxu1 %v5242_v62  ;;  %v5296_v61 = vld [vmem:[#allocation5 + $0x42c] ss:$16 sps:$4 sm:$0xff]   ;;  %v5291_v62 = vld [vmem:[#allocation5 + $0x420] ss:$16 sps:$4 sm:$0xff]   ;;  %v521_v0 = vpack.c.bf16 %v409_v58, %v401_v57 }
 0x130   : > { %v473_v51 = vld [vmem:[%s6181_s22 + $0x2d8] sm:$0xff]  ;;  %v464_v57 = vld [vmem:[%s6181_s22 + $0x290] sm:$0xff] }
 0x131   : > { %2205 = vmatmul.mubr.bf16.gmra.mrb[16].mxu0 %v542_v63  ;;  %2657 = vmatmul.mubr.bf16.gmra.mrb[16].mxu1 %v542_v63  ;;  %v5294_v63 = vld [vmem:[#allocation5 + $0x428] ss:$16 sps:$4 sm:$0xff]   ;;  %v472_v58 = vld [vmem:[%s6181_s22 + $0x2d0] sm:$0xff] }
 0x132   : > { %2262 = vmatpush1.bf16.msra.mxu0 %v5237_v2  ;;  %2714 = vmatpush1.bf16.msra.mxu1 %v5240_v3  ;;  %v408_v2 = vld [vmem:[%s6181_s22 + $0xd0] sm:$0xff] }
 0x133   : > { %2263 = vmatprep.subr.bf16.mxu0 %v5245_v4  ;;  %2715 = vmatprep.subr.bf16.mxu1 %v5248_v5  ;;  %v5299_v3 = vld [vmem:[#allocation5 + $0x444] ss:$16 sps:$4 sm:$0xff]   ;;  %v5302_v4 = vld [vmem:[#allocation5 + $0x44c] ss:$16 sps:$4 sm:$0xff]   ;;  %v520_v5 = vpack.c.bf16 %v408_v2, %v400_v1  ;;  %v5348_v1 = vld [vmem:[#allocation5 + $0x548] ss:$16 sps:$4 sm:$0xff]  }
 0x134   : > { %2214 = vmatprep.mubr.bf16.mxu0 %v551_v8  ;;  %2666 = vmatprep.mubr.bf16.mxu1 %v551_v8  ;;  %v5297_v8 = vld [vmem:[#allocation5 + $0x440] ss:$16 sps:$4 sm:$0xff]   ;;  %v5353_v2 = vld [vmem:[#allocation5 + $0x564] ss:$16 sps:$4 sm:$0xff]  }
 0x136   : > { %2264 = vmatpush1.bf16.msra.mxu0 %v5243_v6  ;;  %2716 = vmatpush1.bf16.msra.mxu1 %v5246_v7  ;;  %v417_v6 = vld [vmem:[%s6181_s22 + $0x118] sm:$0xff] }
 0x137   : > { %2265 = vmatprep.subr.bf16.mxu0 %v5251_v11  ;;  %2717 = vmatprep.subr.bf16.mxu1 %v5254_v12  ;;  %v425_v7 = vld [vmem:[%s6181_s22 + $0x158] sm:$0xff]  ;;  %v5303_v12 = vld [vmem:[#allocation5 + $0x460] ss:$16 sps:$4 sm:$0xff]  }
 0x138   : > { %v5308_v11 = vld [vmem:[#allocation5 + $0x46c] ss:$16 sps:$4 sm:$0xff]  }
 0x139   : > { %2215 = vmatmul.mubr.bf16.gmra.mrb[20].mxu0 %v550_v14  ;;  %2667 = vmatmul.mubr.bf16.gmra.mrb[20].mxu1 %v550_v14  ;;  %v529_v14 = vpack.c.bf16 %v425_v7, %v417_v6  ;;  %v480_v7 = vld [vmem:[%s6181_s22 + $0x310] sm:$0xff] }
 0x13a   : > { %2266 = vmatpush1.bf16.msra.mxu0 %v5249_v13  ;;  %2718 = vmatpush1.bf16.msra.mxu1 %v5252_v15  ;;  %v5306_v13 = vld [vmem:[#allocation5 + $0x468] ss:$16 sps:$4 sm:$0xff]   ;;  %v416_v15 = vld [vmem:[%s6181_s22 + $0x110] sm:$0xff] }
 0x13b   : > { %2267 = vmatprep.subr.bf16.mxu0 %v5257_v18  ;;  %2719 = vmatprep.subr.bf16.mxu1 %v5260_v19  ;;  %v5314_v18 = vld [vmem:[#allocation5 + $0x48c] ss:$16 sps:$4 sm:$0xff]   ;;  %v5309_v19 = vld [vmem:[#allocation5 + $0x480] ss:$16 sps:$4 sm:$0xff]  }
 0x13c   : > { %2224 = vmatprep.mubr.bf16.mxu0 %v559_v21  ;;  %2676 = vmatprep.mubr.bf16.mxu1 %v559_v21  ;;  %v5312_v21 = vld [vmem:[#allocation5 + $0x488] ss:$16 sps:$4 sm:$0xff]  }
 0x13e   : > { %2268 = vmatpush1.bf16.msra.mxu0 %v5255_v20  ;;  %2720 = vmatpush1.bf16.msra.mxu1 %v5258_v22  ;;  %v528_v20 = vpack.c.bf16 %v424_v16, %v416_v15  ;;  %v433_v22 = vld [vmem:[%s6181_s22 + $0x198] sm:$0xff]  ;;  %v5365_v16 = vld [vmem:[#allocation5 + $0x5a4] ss:$16 sps:$4 sm:$0xff]  }
 0x13f   : > { %2269 = vmatprep.subr.bf16.mxu0 %v5263_v25  ;;  %2721 = vmatprep.subr.bf16.mxu1 %v5266_v26  ;;  %v5320_v25 = vld [vmem:[#allocation5 + $0x4ac] ss:$16 sps:$4 sm:$0xff]   ;;  %v5315_v26 = vld [vmem:[#allocation5 + $0x4a0] ss:$16 sps:$4 sm:$0xff]   ;;  %v5360_v15 = vld [vmem:[#allocation5 + $0x588] ss:$16 sps:$4 sm:$0xff]  }
 0x141   : > { %2225 = vmatmul.mubr.bf16.gmra.mrb[24].mxu0 %v558_v29  ;;  %2677 = vmatmul.mubr.bf16.gmra.mrb[24].mxu1 %v558_v29  ;;  %v432_v29 = vld [vmem:[%s6181_s22 + $0x190] sm:$0xff] }
 0x142   : > { %2270 = vmatpush1.bf16.msra.mxu0 %v5261_v27  ;;  %2722 = vmatpush1.bf16.msra.mxu1 %v5264_v28  ;;  %v537_v27 = vpack.c.bf16 %v441_v23, %v433_v22  ;;  %v5318_v28 = vld [vmem:[#allocation5 + $0x4a8] ss:$16 sps:$4 sm:$0xff]   ;;  %v504_v22 = vld [vmem:[%s6181_s22 + $0x3d0] sm:$0xff] }
 0x143   : > { %2271 = vmatprep.subr.bf16.mxu0 %v5269_v32  ;;  %2723 = vmatprep.subr.bf16.mxu1 %v5272_v33  ;;  %v5326_v32 = vld [vmem:[#allocation5 + $0x4cc] ss:$16 sps:$4 sm:$0xff]   ;;  %v5321_v33 = vld [vmem:[#allocation5 + $0x4c0] ss:$16 sps:$4 sm:$0xff]   ;;  %v5371_v23 = vld [vmem:[#allocation5 + $0x5c4] ss:$16 sps:$4 sm:$0xff]  }
 0x144   : > { %2234 = vmatprep.mubr.bf16.mxu0 %v567_v34  ;;  %2686 = vmatprep.mubr.bf16.mxu1 %v567_v34  ;;  %v5324_v34 = vld [vmem:[#allocation5 + $0x4c8] ss:$16 sps:$4 sm:$0xff]  }
 0x146   : > { %2272 = vmatpush1.bf16.msra.mxu0 %v5267_v35  ;;  %2724 = vmatpush1.bf16.msra.mxu1 %v5270_v36  ;;  %v536_v35 = vpack.c.bf16 %v440_v30, %v432_v29  ;;  %v449_v36 = vld [vmem:[%s6181_s22 + $0x218] sm:$0xff]  ;;  %v395_v29 = vld [vmem:[%s6181_s22 + $0x68] sm:$0xff]  ;;  %v5377_v30 = vld [vmem:[#allocation5 + $0x5e4] ss:$16 sps:$4 sm:$0xff]  }
 0x147   : > { %2273 = vmatprep.subr.bf16.mxu0 %v5275_v39  ;;  %2725 = vmatprep.subr.bf16.mxu1 %v5278_v40  ;;  %v5332_v39 = vld [vmem:[#allocation5 + $0x4ec] ss:$16 sps:$4 sm:$0xff]   ;;  %v545_v40 = vpack.c.bf16 %v457_v37, %v449_v36  ;;  %v394_v36 = vld [vmem:[%s6181_s22 + $0x60] sm:$0xff] }
 0x148   : > { %v5383_v37 = vld [vmem:[#allocation5 + $0x604] ss:$16 sps:$4 sm:$0xff]  }
 0x149   : > { %2235 = vmatmul.mubr.bf16.gmra.mrb[28].mxu0 %v566_v43  ;;  %2687 = vmatmul.mubr.bf16.gmra.mrb[28].mxu1 %v566_v43  ;;  %v448_v43 = vld [vmem:[%s6181_s22 + $0x210] sm:$0xff] }
 0x14a   : > { %2274 = vmatpush1.bf16.msra.mxu0 %v5273_v41  ;;  %2726 = vmatpush1.bf16.msra.mxu1 %v5276_v42  ;;  %v5327_v41 = vld [vmem:[#allocation5 + $0x4e0] ss:$16 sps:$4 sm:$0xff]   ;;  %v5330_v42 = vld [vmem:[#allocation5 + $0x4e8] ss:$16 sps:$4 sm:$0xff]  }
 0x14b   : > { %2275 = vmatprep.subr.bf16.mxu0 %v5281_v46  ;;  %2727 = vmatprep.subr.bf16.mxu1 %v5284_v47  ;;  %v5338_v46 = vld [vmem:[#allocation5 + $0x50c] ss:$16 sps:$4 sm:$0xff]   ;;  %v5333_v47 = vld [vmem:[#allocation5 + $0x500] ss:$16 sps:$4 sm:$0xff]  }
 0x14c   : > { %2277 = vmatprep.mubr.bf16.mxu0 %v513_v49  ;;  %2729 = vmatprep.mubr.bf16.mxu1 %v513_v49  ;;  %v544_v49 = vpack.c.bf16 %v456_v44, %v448_v43  ;;  %v411_v43 = vld [vmem:[%s6181_s22 + $0xe8] sm:$0xff]  ;;  %v5389_v44 = vld [vmem:[#allocation5 + $0x624] ss:$16 sps:$4 sm:$0xff]  }
 0x14e   : > { %2276 = vmatpush1.bf16.msra.mxu0 %v5279_v48  ;;  %2728 = vmatpush1.bf16.msra.mxu1 %v5282_v50  ;;  %v5336_v48 = vld [vmem:[#allocation5 + $0x508] ss:$16 sps:$4 sm:$0xff]  }
 0x14f   : > { %2358 = vmatprep.subr.bf16.mxu0 %v5287_v53  ;;  %2810 = vmatprep.subr.bf16.mxu1 %v5290_v54  ;;  %v465_v50 = vld [vmem:[%s6181_s22 + $0x298] sm:$0xff]  ;;  %v5339_v54 = vld [vmem:[#allocation5 + $0x520] ss:$16 sps:$4 sm:$0xff]  }
 0x150   : > { %v5344_v53 = vld [vmem:[#allocation5 + $0x52c] ss:$16 sps:$4 sm:$0xff]  }
 0x151   : > { %2278 = vmatmul.mubr.bf16.vlgmr.msra.gmra.mrb[0].mxu0 %v512_v56  ;;  %2730 = vmatmul.mubr.bf16.vlgmr.msra.gmra.mrb[0].mxu1 %v512_v56  ;;  %v5342_v56 = vld [vmem:[#allocation5 + $0x528] ss:$16 sps:$4 sm:$0xff]  }
 0x152   : > { %2359 = vmatpush1.bf16.msra.mxu0 %v5285_v55  ;;  %2811 = vmatpush1.bf16.msra.mxu1 %v5288_v59  ;;  %v553_v55 = vpack.c.bf16 %v473_v51, %v465_v50  ;;  %v5347_v59 = vld [vmem:[#allocation5 + $0x544] ss:$16 sps:$4 sm:$0xff]  }
 0x153   : > { %2360 = vmatprep.subr.bf16.mxu0 %v5293_v60  ;;  %2812 = vmatprep.subr.bf16.mxu1 %v5296_v61  ;;  %v5350_v60 = vld [vmem:[#allocation5 + $0x54c] ss:$16 sps:$4 sm:$0xff]   ;;  %v5345_v61 = vld [vmem:[#allocation5 + $0x540] ss:$16 sps:$4 sm:$0xff]   ;;  %v5395_v51 = vld [vmem:[#allocation5 + $0x644] ss:$16 sps:$4 sm:$0xff]  }
 0x154   : > { %2287 = vmatprep.mubr.bf16.mxu0 %v521_v0  ;;  %2739 = vmatprep.mubr.bf16.mxu1 %v521_v0  ;;  %v489_v0 = vld [vmem:[%s6181_s22 + $0x358] sm:$0xff]  ;;  %v410_v50 = vld [vmem:[%s6181_s22 + $0xe0] sm:$0xff] }
 0x156   : > { %2361 = vmatpush1.bf16.msra.mxu0 %v5291_v62  ;;  %2813 = vmatpush1.bf16.msra.mxu1 %v5294_v63  ;;  %v552_v62 = vpack.c.bf16 %v472_v58, %v464_v57  ;;  %v481_v63 = vld [vmem:[%s6181_s22 + $0x318] sm:$0xff]  ;;  %v427_v57 = vld [vmem:[%s6181_s22 + $0x168] sm:$0xff]  ;;  %v5401_v58 = vld [vmem:[#allocation5 + $0x664] ss:$16 sps:$4 sm:$0xff]  }
 0x157   : > { %2362 = vmatprep.subr.bf16.mxu0 %v5299_v3  ;;  %2814 = vmatprep.subr.bf16.mxu1 %v5302_v4  ;;  %v5356_v3 = vld [vmem:[#allocation5 + $0x56c] ss:$16 sps:$4 sm:$0xff]   ;;  %v5351_v4 = vld [vmem:[#allocation5 + $0x560] ss:$16 sps:$4 sm:$0xff]   ;;  %v561_v6 = vpack.c.bf16 %v489_v0, %v481_v63 }
 0x158   : > { %v418_v63 = vld [vmem:[%s6181_s22 + $0x120] sm:$0xff] }
 0x159   : > { %2288 = vmatmul.mubr.bf16.gmra.mrb[4].mxu0 %v520_v5  ;;  %2740 = vmatmul.mubr.bf16.gmra.mrb[4].mxu1 %v520_v5  ;;  %v5354_v5 = vld [vmem:[#allocation5 + $0x568] ss:$16 sps:$4 sm:$0xff]   ;;  %v426_v0 = vld [vmem:[%s6181_s22 + $0x160] sm:$0xff] }
 0x15a   : > { %2363 = vmatpush1.bf16.msra.mxu0 %v5297_v8  ;;  %2815 = vmatpush1.bf16.msra.mxu1 %v5300_v9  ;;  %v488_v8 = vld [vmem:[%s6181_s22 + $0x350] sm:$0xff] }
 0x15b   : > { %2364 = vmatprep.subr.bf16.mxu0 %v5305_v10  ;;  %2816 = vmatprep.subr.bf16.mxu1 %v5308_v11  ;;  %v5359_v9 = vld [vmem:[#allocation5 + $0x584] ss:$16 sps:$4 sm:$0xff]   ;;  %v5362_v10 = vld [vmem:[#allocation5 + $0x58c] ss:$16 sps:$4 sm:$0xff]   ;;  %v560_v11 = vpack.c.bf16 %v488_v8, %v480_v7  ;;  %v5408_v7 = vld [vmem:[#allocation5 + $0x688] ss:$16 sps:$4 sm:$0xff]  }
 0x15c   : > { %2297 = vmatprep.mubr.bf16.mxu0 %v529_v14  ;;  %2749 = vmatprep.mubr.bf16.mxu1 %v529_v14  ;;  %v5357_v14 = vld [vmem:[#allocation5 + $0x580] ss:$16 sps:$4 sm:$0xff]   ;;  %v5413_v8 = vld [vmem:[#allocation5 + $0x6a4] ss:$16 sps:$4 sm:$0xff]  }
 0x15e   : > { %2365 = vmatpush1.bf16.msra.mxu0 %v5303_v12  ;;  %2817 = vmatpush1.bf16.msra.mxu1 %v5306_v13  ;;  %v497_v12 = vld [vmem:[%s6181_s22 + $0x398] sm:$0xff] }
 0x15f   : > { %2366 = vmatprep.subr.bf16.mxu0 %v5311_v17  ;;  %2818 = vmatprep.subr.bf16.mxu1 %v5314_v18  ;;  %v505_v13 = vld [vmem:[%s6181_s22 + $0x3d8] sm:$0xff]  ;;  %v5363_v18 = vld [vmem:[#allocation5 + $0x5a0] ss:$16 sps:$4 sm:$0xff]  }
 0x160   : > { %v5368_v17 = vld [vmem:[#allocation5 + $0x5ac] ss:$16 sps:$4 sm:$0xff]  }
 0x161   : > { %2298 = vmatmul.mubr.bf16.gmra.mrb[8].mxu0 %v528_v20  ;;  %2750 = vmatmul.mubr.bf16.gmra.mrb[8].mxu1 %v528_v20  ;;  %v569_v20 = vpack.c.bf16 %v505_v13, %v497_v12  ;;  %v5414_v12 = vld [vmem:[#allocation5 + $0x6a8] ss:$16 sps:$4 sm:$0xff]   ;;  %v434_v13 = vld [vmem:[%s6181_s22 + $0x1a0] sm:$0xff] }
 0x162   : > { %2367 = vmatpush1.bf16.msra.mxu0 %v5309_v19  ;;  %2819 = vmatpush1.bf16.msra.mxu1 %v5312_v21  ;;  %v5366_v19 = vld [vmem:[#allocation5 + $0x5a8] ss:$16 sps:$4 sm:$0xff]   ;;  %v496_v21 = vld [vmem:[%s6181_s22 + $0x390] sm:$0xff] }
 0x163   : > { %2368 = vmatprep.subr.bf16.mxu0 %v5317_v24  ;;  %2820 = vmatprep.subr.bf16.mxu1 %v5320_v25  ;;  %v5374_v24 = vld [vmem:[#allocation5 + $0x5cc] ss:$16 sps:$4 sm:$0xff]   ;;  %v5369_v25 = vld [vmem:[#allocation5 + $0x5c0] ss:$16 sps:$4 sm:$0xff]  }
 0x164   : > { %2307 = vmatprep.mubr.bf16.mxu0 %v537_v27  ;;  %2759 = vmatprep.mubr.bf16.mxu1 %v537_v27  ;;  %v5372_v27 = vld [vmem:[#allocation5 + $0x5c8] ss:$16 sps:$4 sm:$0xff]  }
 0x166   : > { %2369 = vmatpush1.bf16.msra.mxu0 %v5315_v26  ;;  %2821 = vmatpush1.bf16.msra.mxu1 %v5318_v28  ;;  %v568_v26 = vpack.c.bf16 %v504_v22, %v496_v21  ;;  %v387_v28 = vld [vmem:[%s6181_s22 + $0x28] sm:$0xff]  ;;  %v5425_v22 = vld [vmem:[#allocation5 + $0x6e4] ss:$16 sps:$4 sm:$0xff]  }
 0x167   : > { %2370 = vmatprep.subr.bf16.mxu0 %v5323_v31  ;;  %2822 = vmatprep.subr.bf16.mxu1 %v5326_v32  ;;  %v5380_v31 = vld [vmem:[#allocation5 + $0x5ec] ss:$16 sps:$4 sm:$0xff]   ;;  %v5375_v32 = vld [vmem:[#allocation5 + $0x5e0] ss:$16 sps:$4 sm:$0xff]  }
 0x168   : > { %v459_v21 = vld [vmem:[%s6181_s22 + $0x268] sm:$0xff] }
 0x169   : > { %2308 = vmatmul.mubr.bf16.gmra.mrb[12].mxu0 %v536_v35  ;;  %2760 = vmatmul.mubr.bf16.gmra.mrb[12].mxu1 %v536_v35  ;;  %v386_v35 = vld [vmem:[%s6181_s22 + $0x20] sm:$0xff] }
 0x16a   : > { %2371 = vmatpush1.bf16.msra.mxu0 %v5321_v33  ;;  %2823 = vmatpush1.bf16.msra.mxu1 %v5324_v34  ;;  %v515_v33 = vpack.c.bf16 %v395_v29, %v387_v28  ;;  %v5378_v34 = vld [vmem:[#allocation5 + $0x5e8] ss:$16 sps:$4 sm:$0xff]   ;;  %v458_v28 = vld [vmem:[%s6181_s22 + $0x260] sm:$0xff] }
 0x16b   : > { %2372 = vmatprep.subr.bf16.mxu0 %v5329_v38  ;;  %2824 = vmatprep.subr.bf16.mxu1 %v5332_v39  ;;  %v5386_v38 = vld [vmem:[#allocation5 + $0x60c] ss:$16 sps:$4 sm:$0xff]   ;;  %v5381_v39 = vld [vmem:[#allocation5 + $0x600] ss:$16 sps:$4 sm:$0xff]   ;;  %v5431_v29 = vld [vmem:[#allocation5 + $0x704] ss:$16 sps:$4 sm:$0xff]  }
 0x16c   : > { %2317 = vmatprep.mubr.bf16.mxu0 %v545_v40  ;;  %2769 = vmatprep.mubr.bf16.mxu1 %v545_v40  ;;  %v5384_v40 = vld [vmem:[#allocation5 + $0x608] ss:$16 sps:$4 sm:$0xff]  }
 0x16e   : > { %2373 = vmatpush1.bf16.msra.mxu0 %v5327_v41  ;;  %2825 = vmatpush1.bf16.msra.mxu1 %v5330_v42  ;;  %v514_v41 = vpack.c.bf16 %v394_v36, %v386_v35  ;;  %v403_v42 = vld [vmem:[%s6181_s22 + $0xa8] sm:$0xff]  ;;  %v5437_v36 = vld [vmem:[#allocation5 + $0x724] ss:$16 sps:$4 sm:$0xff]  }
 0x16f   : > { %2374 = vmatprep.subr.bf16.mxu0 %v5335_v45  ;;  %2826 = vmatprep.subr.bf16.mxu1 %v5338_v46  ;;  %v5392_v45 = vld [vmem:[#allocation5 + $0x62c] ss:$16 sps:$4 sm:$0xff]   ;;  %v523_v46 = vpack.c.bf16 %v411_v43, %v403_v42  ;;  %v474_v42 = vld [vmem:[%s6181_s22 + $0x2e0] sm:$0xff] }
 0x170   : > { %v475_v35 = vld [vmem:[%s6181_s22 + $0x2e8] sm:$0xff]  ;;  %v5443_v43 = vld [vmem:[#allocation5 + $0x744] ss:$16 sps:$4 sm:$0xff]  }
 0x171   : > { %2318 = vmatmul.mubr.bf16.gmra.mrb[16].mxu0 %v544_v49  ;;  %2770 = vmatmul.mubr.bf16.gmra.mrb[16].mxu1 %v544_v49  ;;  %v402_v49 = vld [vmem:[%s6181_s22 + $0xa0] sm:$0xff] }
 0x172   : > { %2375 = vmatpush1.bf16.msra.mxu0 %v5333_v47  ;;  %2827 = vmatpush1.bf16.msra.mxu1 %v5336_v48  ;;  %v5387_v47 = vld [vmem:[#allocation5 + $0x620] ss:$16 sps:$4 sm:$0xff]   ;;  %v5390_v48 = vld [vmem:[#allocation5 + $0x628] ss:$16 sps:$4 sm:$0xff]  }
 0x173   : > { %2376 = vmatprep.subr.bf16.mxu0 %v5341_v52  ;;  %2828 = vmatprep.subr.bf16.mxu1 %v5344_v53  ;;  %v5398_v52 = vld [vmem:[#allocation5 + $0x64c] ss:$16 sps:$4 sm:$0xff]   ;;  %v5393_v53 = vld [vmem:[#allocation5 + $0x640] ss:$16 sps:$4 sm:$0xff]  }
 0x174   : > { %2327 = vmatprep.mubr.bf16.mxu0 %v553_v55  ;;  %2779 = vmatprep.mubr.bf16.mxu1 %v553_v55  ;;  %v522_v55 = vpack.c.bf16 %v410_v50, %v402_v49  ;;  %v491_v49 = vld [vmem:[%s6181_s22 + $0x368] sm:$0xff]  ;;  %v5449_v50 = vld [vmem:[#allocation5 + $0x764] ss:$16 sps:$4 sm:$0xff]  }
 0x176   : > { %2377 = vmatpush1.bf16.msra.mxu0 %v5339_v54  ;;  %2829 = vmatpush1.bf16.msra.mxu1 %v5342_v56  ;;  %v5396_v54 = vld [vmem:[#allocation5 + $0x648] ss:$16 sps:$4 sm:$0xff]  }
 0x177   : > { %2378 = vmatprep.subr.bf16.mxu0 %v5347_v59  ;;  %2830 = vmatprep.subr.bf16.mxu1 %v5350_v60  ;;  %v419_v56 = vld [vmem:[%s6181_s22 + $0x128] sm:$0xff] }
 0x178   : > { %v5404_v59 = vld [vmem:[#allocation5 + $0x66c] ss:$16 sps:$4 sm:$0xff]   ;;  %v531_v60 = vpack.c.bf16 %v427_v57, %v419_v56  ;;  %v490_v56 = vld [vmem:[%s6181_s22 + $0x360] sm:$0xff] }
 0x179   : > { %2328 = vmatmul.mubr.bf16.gmra.mrb[20].mxu0 %v552_v62  ;;  %2780 = vmatmul.mubr.bf16.gmra.mrb[20].mxu1 %v552_v62  ;;  %v5402_v62 = vld [vmem:[#allocation5 + $0x668] ss:$16 sps:$4 sm:$0xff]   ;;  %v5455_v57 = vld [vmem:[#allocation5 + $0x784] ss:$16 sps:$4 sm:$0xff]  }
 0x17a   : > { %2379 = vmatpush1.bf16.msra.mxu0 %v5345_v61  ;;  %2831 = vmatpush1.bf16.msra.mxu1 %v5348_v1  ;;  %v5399_v61 = vld [vmem:[#allocation5 + $0x660] ss:$16 sps:$4 sm:$0xff]   ;;  %v5407_v1 = vld [vmem:[#allocation5 + $0x684] ss:$16 sps:$4 sm:$0xff]  }
 0x17b   : > { %2380 = vmatprep.subr.bf16.mxu0 %v5353_v2  ;;  %2832 = vmatprep.subr.bf16.mxu1 %v5356_v3  ;;  %v5410_v2 = vld [vmem:[#allocation5 + $0x68c] ss:$16 sps:$4 sm:$0xff]   ;;  %v530_v3 = vpack.c.bf16 %v426_v0, %v418_v63 }
 0x17c   : > { %2337 = vmatprep.mubr.bf16.mxu0 %v561_v6  ;;  %2789 = vmatprep.mubr.bf16.mxu1 %v561_v6  ;;  %v5405_v6 = vld [vmem:[#allocation5 + $0x680] ss:$16 sps:$4 sm:$0xff]   ;;  %v499_v63 = vld [vmem:[%s6181_s22 + $0x3a8] sm:$0xff] }
 0x17d   : > { %v507_v0 = vld [vmem:[%s6181_s22 + $0x3e8] sm:$0xff] }
 0x17e   : > { %2381 = vmatpush1.bf16.msra.mxu0 %v5351_v4  ;;  %2833 = vmatpush1.bf16.msra.mxu1 %v5354_v5  ;;  %v435_v4 = vld [vmem:[%s6181_s22 + $0x1a8] sm:$0xff] }
 0x17f   : > { %2382 = vmatprep.subr.bf16.mxu0 %v5359_v9  ;;  %2834 = vmatprep.subr.bf16.mxu1 %v5362_v10  ;;  %v443_v5 = vld [vmem:[%s6181_s22 + $0x1e8] sm:$0xff] }
 0x180   : > { %v5416_v9 = vld [vmem:[#allocation5 + $0x6ac] ss:$16 sps:$4 sm:$0xff]   ;;  %v539_v10 = vpack.c.bf16 %v443_v5, %v435_v4  ;;  %v571_v4 = vpack.c.bf16 %v507_v0, %v499_v63  ;;  %v498_v5 = vld [vmem:[%s6181_s22 + $0x3a0] sm:$0xff] }
 0x181   : > { %2338 = vmatmul.mubr.bf16.gmra.mrb[24].mxu0 %v560_v11  ;;  %2790 = vmatmul.mubr.bf16.gmra.mrb[24].mxu1 %v560_v11  ;;  %v5411_v11 = vld [vmem:[#allocation5 + $0x6a0] ss:$16 sps:$4 sm:$0xff]   ;;  %v5492_v63 = vld [vmem:[#allocation8 + $0x50] ss:$8 sps:$4 sm:$0xff]  }
 0x182   : > { %2383 = vmatpush1.bf16.msra.mxu0 %v5357_v14  ;;  %2835 = vmatpush1.bf16.msra.mxu1 %v5360_v15  ;;  %v442_v14 = vld [vmem:[%s6181_s22 + $0x1e0] sm:$0xff]  ;;  %v6345_v0 = vld [vmem:[#allocation8 + $0x150] ss:$8 sps:$4 sm:$0xff]  }
 0x183   : > { %2384 = vmatprep.subr.bf16.mxu0 %v5365_v16  ;;  %2836 = vmatprep.subr.bf16.mxu1 %v5368_v17  ;;  %v5419_v15 = vld [vmem:[#allocation5 + $0x6c4] ss:$16 sps:$4 sm:$0xff]   ;;  %v5422_v16 = vld [vmem:[#allocation5 + $0x6cc] ss:$16 sps:$4 sm:$0xff]   ;;  %v5417_v17 = vld [vmem:[#allocation5 + $0x6c0] ss:$16 sps:$4 sm:$0xff]  }
 0x184   : > { %2347 = vmatprep.mubr.bf16.mxu0 %v569_v20  ;;  %2799 = vmatprep.mubr.bf16.mxu1 %v569_v20  ;;  %v451_v20 = vld [vmem:[%s6181_s22 + $0x228] sm:$0xff] }
 0x186   : > { %2385 = vmatpush1.bf16.msra.mxu0 %v5363_v18  ;;  %2837 = vmatpush1.bf16.msra.mxu1 %v5366_v19  ;;  %v5420_v18 = vld [vmem:[#allocation5 + $0x6c8] ss:$16 sps:$4 sm:$0xff]   ;;  %v538_v19 = vpack.c.bf16 %v442_v14, %v434_v13  ;;  %v5473_v14 = vld [vmem:[#allocation5 + $0x7e4] ss:$16 sps:$4 sm:$0xff]  }
 0x187   : > { %2386 = vmatprep.subr.bf16.mxu0 %v5371_v23  ;;  %2838 = vmatprep.subr.bf16.mxu1 %v5374_v24  ;;  %v5428_v23 = vld [vmem:[#allocation5 + $0x6ec] ss:$16 sps:$4 sm:$0xff]   ;;  %v5423_v24 = vld [vmem:[#allocation5 + $0x6e0] ss:$16 sps:$4 sm:$0xff]  }
 0x189   : > { %2348 = vmatmul.mubr.bf16.gmra.mrb[28].mxu0 %v568_v26  ;;  %2800 = vmatmul.mubr.bf16.gmra.mrb[28].mxu1 %v568_v26  ;;  %v547_v26 = vpack.c.bf16 %v459_v21, %v451_v20  ;;  %v396_v20 = vld [vmem:[%s6181_s22 + $0x70] sm:$0xff]  ;;  %v405_v21 = vld [vmem:[%s6181_s22 + $0xb8] sm:$0xff] }
 0x18a   : > { %2387 = vmatpush1.bf16.msra.mxu0 %v5369_v25  ;;  %2839 = vmatpush1.bf16.msra.mxu1 %v5372_v27  ;;  %v5426_v25 = vld [vmem:[#allocation5 + $0x6e8] ss:$16 sps:$4 sm:$0xff]   ;;  %v450_v27 = vld [vmem:[%s6181_s22 + $0x220] sm:$0xff] }
 0x18b   : > { %2388 = vmatprep.subr.bf16.mxu0 %v5377_v30  ;;  %2840 = vmatprep.subr.bf16.mxu1 %v5380_v31  ;;  %v5434_v30 = vld [vmem:[#allocation5 + $0x70c] ss:$16 sps:$4 sm:$0xff]   ;;  %v5429_v31 = vld [vmem:[#allocation5 + $0x700] ss:$16 sps:$4 sm:$0xff]  }
 0x18c   : > { %2390 = vmatprep.mubr.bf16.mxu0 %v515_v33  ;;  %2842 = vmatprep.mubr.bf16.mxu1 %v515_v33  ;;  %v546_v33 = vpack.c.bf16 %v458_v28, %v450_v27  ;;  %v6303_v27 = vld [vmem:[#allocation8 + $0x100] ss:$8 sps:$4 sm:$0xff]  }
 0x18e   : > { %2389 = vmatpush1.bf16.msra.mxu0 %v5375_v32  ;;  %2841 = vmatpush1.bf16.msra.mxu1 %v5378_v34  ;;  %v5432_v32 = vld [vmem:[#allocation5 + $0x708] ss:$16 sps:$4 sm:$0xff]  }
 0x18f   : > { %2471 = vmatprep.subr.bf16.mxu0 %v5383_v37  ;;  %2923 = vmatprep.subr.bf16.mxu1 %v5386_v38  ;;  %v467_v34 = vld [vmem:[%s6181_s22 + $0x2a8] sm:$0xff]  ;;  %v5435_v38 = vld [vmem:[#allocation5 + $0x720] ss:$16 sps:$4 sm:$0xff]  }
 0x190   : > { %v5440_v37 = vld [vmem:[#allocation5 + $0x72c] ss:$16 sps:$4 sm:$0xff]  }
 0x191   : > { %2391 = vmatmul.mubr.bf16.vlgmr.msra.gmra.mrb[0].mxu0 %v514_v41  ;;  %2843 = vmatmul.mubr.bf16.vlgmr.msra.gmra.mrb[0].mxu1 %v514_v41  ;;  %v466_v41 = vld [vmem:[%s6181_s22 + $0x2a0] sm:$0xff] }
 0x192   : > { %2472 = vmatpush1.bf16.msra.mxu0 %v5381_v39  ;;  %2924 = vmatpush1.bf16.msra.mxu1 %v5384_v40  ;;  %v5438_v39 = vld [vmem:[#allocation5 + $0x728] ss:$16 sps:$4 sm:$0xff]   ;;  %v555_v40 = vpack.c.bf16 %v475_v35, %v467_v34  ;;  %v5480_v35 = vld [vmem:[#allocation8 + $0x10] ss:$8 sps:$4 sm:$0xff]  }
 0x193   : > { %2473 = vmatprep.subr.bf16.mxu0 %v5389_v44  ;;  %2925 = vmatprep.subr.bf16.mxu1 %v5392_v45  ;;  %v5446_v44 = vld [vmem:[#allocation5 + $0x74c] ss:$16 sps:$4 sm:$0xff]   ;;  %v5441_v45 = vld [vmem:[#allocation5 + $0x740] ss:$16 sps:$4 sm:$0xff]  }
 0x194   : > { %2400 = vmatprep.mubr.bf16.mxu0 %v523_v46  ;;  %2852 = vmatprep.mubr.bf16.mxu1 %v523_v46  ;;  %v5444_v46 = vld [vmem:[#allocation5 + $0x748] ss:$16 sps:$4 sm:$0xff]  }
 0x195   : > { %v429_v34 = vld [vmem:[%s6181_s22 + $0x178] sm:$0xff] }
 0x196   : > { %2474 = vmatpush1.bf16.msra.mxu0 %v5387_v47  ;;  %2926 = vmatpush1.bf16.msra.mxu1 %v5390_v48  ;;  %v554_v47 = vpack.c.bf16 %v474_v42, %v466_v41  ;;  %v483_v48 = vld [vmem:[%s6181_s22 + $0x328] sm:$0xff] }
 0x197   : > { %2475 = vmatprep.subr.bf16.mxu0 %v5395_v51  ;;  %2927 = vmatprep.subr.bf16.mxu1 %v5398_v52  ;;  %v5452_v51 = vld [vmem:[#allocation5 + $0x76c] ss:$16 sps:$4 sm:$0xff]   ;;  %v5447_v52 = vld [vmem:[#allocation5 + $0x760] ss:$16 sps:$4 sm:$0xff]  }
 0x198   : > { %v5483_v41 = vld [vmem:[#allocation8 + $0x20] ss:$8 sps:$4 sm:$0xff]  }
 0x199   : > { %2401 = vmatmul.mubr.bf16.gmra.mrb[4].mxu0 %v522_v55  ;;  %2853 = vmatmul.mubr.bf16.gmra.mrb[4].mxu1 %v522_v55  ;;  %v482_v55 = vld [vmem:[%s6181_s22 + $0x320] sm:$0xff] }
 0x19a   : > { %2476 = vmatpush1.bf16.msra.mxu0 %v5393_v53  ;;  %2928 = vmatpush1.bf16.msra.mxu1 %v5396_v54  ;;  %v5450_v53 = vld [vmem:[#allocation5 + $0x768] ss:$16 sps:$4 sm:$0xff]   ;;  %v563_v54 = vpack.c.bf16 %v491_v49, %v483_v48  ;;  %v6319_v42 = vld [vmem:[#allocation8 + $0x120] ss:$8 sps:$4 sm:$0xff]   ;;  %v5486_v49 = vld [vmem:[#allocation8 + $0x30] ss:$8 sps:$4 sm:$0xff]  }
 0x19b   : > { %2477 = vmatprep.subr.bf16.mxu0 %v5401_v58  ;;  %2929 = vmatprep.subr.bf16.mxu1 %v5404_v59  ;;  %v5458_v58 = vld [vmem:[#allocation5 + $0x78c] ss:$16 sps:$4 sm:$0xff]   ;;  %v5453_v59 = vld [vmem:[#allocation5 + $0x780] ss:$16 sps:$4 sm:$0xff]  }
 0x19c   : > { %2410 = vmatprep.mubr.bf16.mxu0 %v531_v60  ;;  %2862 = vmatprep.mubr.bf16.mxu1 %v531_v60  ;;  %v5456_v60 = vld [vmem:[#allocation5 + $0x788] ss:$16 sps:$4 sm:$0xff]  }
 0x19d   : > { %v445_v48 = vld [vmem:[%s6181_s22 + $0x1f8] sm:$0xff] }
 0x19e   : > { %2478 = vmatpush1.bf16.msra.mxu0 %v5399_v61  ;;  %2930 = vmatpush1.bf16.msra.mxu1 %v5402_v62  ;;  %v562_v61 = vpack.c.bf16 %v490_v56, %v482_v55  ;;  %v5461_v62 = vld [vmem:[#allocation5 + $0x7a4] ss:$16 sps:$4 sm:$0xff]  }
 0x19f   : > { %2479 = vmatprep.subr.bf16.mxu0 %v5407_v1  ;;  %2931 = vmatprep.subr.bf16.mxu1 %v5410_v2  ;;  %v5464_v1 = vld [vmem:[#allocation5 + $0x7ac] ss:$16 sps:$4 sm:$0xff]   ;;  %v5459_v2 = vld [vmem:[#allocation5 + $0x7a0] ss:$16 sps:$4 sm:$0xff]  }
 0x1a0   : > { %v5489_v55 = vld [vmem:[#allocation8 + $0x40] ss:$8 sps:$4 sm:$0xff]  }
 0x1a1   : > { %2411 = vmatmul.mubr.bf16.gmra.mrb[8].mxu0 %v530_v3  ;;  %2863 = vmatmul.mubr.bf16.gmra.mrb[8].mxu1 %v530_v3  ;;  %v5462_v3 = vld [vmem:[#allocation5 + $0x7a8] ss:$16 sps:$4 sm:$0xff]   ;;  %v6335_v56 = vld [vmem:[#allocation8 + $0x140] ss:$8 sps:$4 sm:$0xff]  }
 0x1a2   : > { %2480 = vmatpush1.bf16.msra.mxu0 %v5405_v6  ;;  %2932 = vmatpush1.bf16.msra.mxu1 %v5408_v7  ;;  %v506_v6 = vld [vmem:[%s6181_s22 + $0x3e0] sm:$0xff] }
 0x1a3   : > { %2481 = vmatprep.subr.bf16.mxu0 %v5413_v8  ;;  %2933 = vmatprep.subr.bf16.mxu1 %v5416_v9  ;;  %v5467_v7 = vld [vmem:[#allocation5 + $0x7c4] ss:$16 sps:$4 sm:$0xff]   ;;  %v5470_v8 = vld [vmem:[#allocation5 + $0x7cc] ss:$16 sps:$4 sm:$0xff]   ;;  %v570_v13 = vpack.c.bf16 %v506_v6, %v498_v5  ;;  %v5500_v5 = vld [vmem:[#allocation8 + $0x74] ss:$8 sps:$4 sm:$0xff]  }
 0x1a4   : > { %2420 = vmatprep.mubr.bf16.mxu0 %v539_v10  ;;  %2872 = vmatprep.mubr.bf16.mxu1 %v539_v10  ;;  %v389_v9 = vld [vmem:[%s6181_s22 + $0x38] sm:$0xff]  ;;  %v452_v6 = vld [vmem:[%s6181_s22 + $0x230] sm:$0xff] }
 0x1a5   : > { %v397_v10 = vld [vmem:[%s6181_s22 + $0x78] sm:$0xff] }
 0x1a6   : > { %2482 = vmatpush1.bf16.msra.mxu0 %v5411_v11  ;;  %2934 = vmatpush1.bf16.msra.mxu1 %v5414_v12  ;;  %v5465_v11 = vld [vmem:[#allocation5 + $0x7c0] ss:$16 sps:$4 sm:$0xff]   ;;  %v5468_v12 = vld [vmem:[#allocation5 + $0x7c8] ss:$16 sps:$4 sm:$0xff]  }
 0x1a7   : > { %2483 = vmatprep.subr.bf16.mxu0 %v5419_v15  ;;  %2935 = vmatprep.subr.bf16.mxu1 %v5422_v16  ;;  %v5476_v15 = vld [vmem:[#allocation5 + $0x7ec] ss:$16 sps:$4 sm:$0xff]   ;;  %v5471_v16 = vld [vmem:[#allocation5 + $0x7e0] ss:$16 sps:$4 sm:$0xff]  }
 0x1a9   : > { %2421 = vmatmul.mubr.bf16.gmra.mrb[12].mxu0 %v538_v19  ;;  %2873 = vmatmul.mubr.bf16.gmra.mrb[12].mxu1 %v538_v19  ;;  %v388_v19 = vld [vmem:[%s6181_s22 + $0x30] sm:$0xff] }
 0x1aa   : > { %2484 = vmatpush1.bf16.msra.mxu0 %v5417_v17  ;;  %2936 = vmatpush1.bf16.msra.mxu1 %v5420_v18  ;;  %v5474_v17 = vld [vmem:[#allocation5 + $0x7e8] ss:$16 sps:$4 sm:$0xff]   ;;  %v517_v18 = vpack.c.bf16 %v397_v10, %v389_v9  ;;  %v5498_v10 = vld [vmem:[#allocation8 + $0x70] ss:$8 sps:$4 sm:$0xff]  }
 0x1ab   : > { %2485 = vmatprep.subr.bf16.mxu0 %v5425_v22  ;;  %2937 = vmatprep.subr.bf16.mxu1 %v5428_v23  ;;  %v413_v22 = vld [vmem:[%s6181_s22 + $0xf8] sm:$0xff]  ;;  %v5479_v23 = vld [vmem:[#allocation8 + $0x4] ss:$8 sps:$4 sm:$0xff]  }
 0x1ac   : > { %2430 = vmatprep.mubr.bf16.mxu0 %v547_v26  ;;  %2882 = vmatprep.mubr.bf16.mxu1 %v547_v26  ;;  %v5477_v26 = vld [vmem:[#allocation8] ss:$8 sps:$4 sm:$0xff]   ;;  %v525_v28 = vpack.c.bf16 %v413_v22, %v405_v21  ;;  %v477_v9 = vld [vmem:[%s6181_s22 + $0x2f8] sm:$0xff]  ;;  %v5515_v21 = vld [vmem:[#allocation8 + $0xa4] ss:$8 sps:$4 sm:$0xff]  }
 0x1ae   : > { %2486 = vmatpush1.bf16.msra.mxu0 %v5423_v24  ;;  %2938 = vmatpush1.bf16.msra.mxu1 %v5426_v25  ;;  %v6301_v24 = vld [vmem:[#allocation8 + $0x104] ss:$8 sps:$4 sm:$0xff]   ;;  %v516_v25 = vpack.c.bf16 %v396_v20, %v388_v19  ;;  %v493_v19 = vld [vmem:[%s6181_s22 + $0x378] sm:$0xff] }
 0x1af   : > { %2487 = vmatprep.subr.bf16.mxu0 %v5431_v29  ;;  %2939 = vmatprep.subr.bf16.mxu1 %v5434_v30  ;;  %v5482_v29 = vld [vmem:[#allocation8 + $0x14] ss:$8 sps:$4 sm:$0xff]   ;;  %v5507_v20 = vld [vmem:[#allocation8 + $0x90] ss:$8 sps:$4 sm:$0xff]  }
 0x1b0   : > { %v6305_v30 = vld [vmem:[#allocation8 + $0x114] ss:$8 sps:$4 sm:$0xff]  }
 0x1b1   : > { %2431 = vmatmul.mubr.bf16.gmra.mrb[16].mxu0 %v546_v33  ;;  %2883 = vmatmul.mubr.bf16.gmra.mrb[16].mxu1 %v546_v33  ;;  %v421_v33 = vld [vmem:[%s6181_s22 + $0x138] sm:$0xff] }
 0x1b2   : > { %2488 = vmatpush1.bf16.msra.mxu0 %v5429_v31  ;;  %2940 = vmatpush1.bf16.msra.mxu1 %v5432_v32  ;;  %v404_v31 = vld [vmem:[%s6181_s22 + $0xb0] sm:$0xff] }
 0x1b3   : > { %2489 = vmatprep.subr.bf16.mxu0 %v5437_v36  ;;  %2941 = vmatprep.subr.bf16.mxu1 %v5440_v37  ;;  %v412_v32 = vld [vmem:[%s6181_s22 + $0xf0] sm:$0xff] }
 0x1b4   : > { %2440 = vmatprep.mubr.bf16.mxu0 %v555_v40  ;;  %2892 = vmatprep.mubr.bf16.mxu1 %v555_v40  ;;  %v6313_v36 = vld [vmem:[#allocation8 + $0x110] ss:$8 sps:$4 sm:$0xff]   ;;  %v5485_v37 = vld [vmem:[#allocation8 + $0x24] ss:$8 sps:$4 sm:$0xff]   ;;  %v533_v40 = vpack.c.bf16 %v429_v34, %v421_v33 }
 0x1b5   : > { %v5519_v33 = vld [vmem:[#allocation8 + $0xb0] ss:$8 sps:$4 sm:$0xff]   ;;  %v5527_v34 = vld [vmem:[#allocation8 + $0xc4] ss:$8 sps:$4 sm:$0xff]  }
 0x1b6   : > { %2490 = vmatpush1.bf16.msra.mxu0 %v5435_v38  ;;  %2942 = vmatpush1.bf16.msra.mxu1 %v5438_v39  ;;  %v6316_v38 = vld [vmem:[#allocation8 + $0x124] ss:$8 sps:$4 sm:$0xff]   ;;  %v524_v39 = vpack.c.bf16 %v412_v32, %v404_v31  ;;  %v501_v31 = vld [vmem:[%s6181_s22 + $0x3b8] sm:$0xff] }
 0x1b7   : > { %2491 = vmatprep.subr.bf16.mxu0 %v5443_v43  ;;  %2943 = vmatprep.subr.bf16.mxu1 %v5446_v44  ;;  %v5488_v43 = vld [vmem:[#allocation8 + $0x34] ss:$8 sps:$4 sm:$0xff]  }
 0x1b8   : > { %v6322_v44 = vld [vmem:[#allocation8 + $0x134] ss:$8 sps:$4 sm:$0xff]  }
 0x1b9   : > { %2441 = vmatmul.mubr.bf16.gmra.mrb[20].mxu0 %v554_v47  ;;  %2893 = vmatmul.mubr.bf16.gmra.mrb[20].mxu1 %v554_v47  ;;  %v437_v47 = vld [vmem:[%s6181_s22 + $0x1b8] sm:$0xff] }
 0x1ba   : > { %2492 = vmatpush1.bf16.msra.mxu0 %v5441_v45  ;;  %2944 = vmatpush1.bf16.msra.mxu1 %v5444_v46  ;;  %v420_v45 = vld [vmem:[%s6181_s22 + $0x130] sm:$0xff]  ;;  %v509_v32 = vld [vmem:[%s6181_s22 + $0x3f8] sm:$0xff] }
 0x1bb   : > { %2493 = vmatprep.subr.bf16.mxu0 %v5449_v50  ;;  %2945 = vmatprep.subr.bf16.mxu1 %v5452_v51  ;;  %v428_v46 = vld [vmem:[%s6181_s22 + $0x170] sm:$0xff] }
 0x1bc   : > { %2450 = vmatprep.mubr.bf16.mxu0 %v563_v54  ;;  %2902 = vmatprep.mubr.bf16.mxu1 %v563_v54  ;;  %v6329_v50 = vld [vmem:[#allocation8 + $0x130] ss:$8 sps:$4 sm:$0xff]   ;;  %v5491_v51 = vld [vmem:[#allocation8 + $0x44] ss:$8 sps:$4 sm:$0xff]   ;;  %v541_v54 = vpack.c.bf16 %v445_v48, %v437_v47 }
 0x1bd   : > { %v5539_v47 = vld [vmem:[#allocation8 + $0xe4] ss:$8 sps:$4 sm:$0xff]  }
 0x1be   : > { %2494 = vmatpush1.bf16.msra.mxu0 %v5447_v52  ;;  %2946 = vmatpush1.bf16.msra.mxu1 %v5450_v53  ;;  %v6332_v52 = vld [vmem:[#allocation8 + $0x144] ss:$8 sps:$4 sm:$0xff]   ;;  %v532_v53 = vpack.c.bf16 %v428_v46, %v420_v45  ;;  %v5531_v45 = vld [vmem:[#allocation8 + $0xd0] ss:$8 sps:$4 sm:$0xff]  }
 0x1bf   : > { %2495 = vmatprep.subr.bf16.mxu0 %v5455_v57  ;;  %2947 = vmatprep.subr.bf16.mxu1 %v5458_v58  ;;  %v5494_v57 = vld [vmem:[#allocation8 + $0x54] ss:$8 sps:$4 sm:$0xff]   ;;  %v6363_v48 = vld [vmem:[#allocation8 + $0x164] ss:$8 sps:$4 sm:$0xff]  }
 0x1c0   : > { %v6338_v58 = vld [vmem:[#allocation8 + $0x154] ss:$8 sps:$4 sm:$0xff]  }
 0x1c1   : > { %2451 = vmatmul.mubr.bf16.gmra.mrb[24].mxu0 %v562_v61  ;;  %2903 = vmatmul.mubr.bf16.gmra.mrb[24].mxu1 %v562_v61  ;;  %v453_v61 = vld [vmem:[%s6181_s22 + $0x238] sm:$0xff] }
 0x1c2   : > { %2496 = vmatpush1.bf16.msra.mxu0 %v5453_v59  ;;  %2948 = vmatpush1.bf16.msra.mxu1 %v5456_v60  ;;  %v436_v59 = vld [vmem:[%s6181_s22 + $0x1b0] sm:$0xff] }
 0x1c3   : > { %2497 = vmatprep.subr.bf16.mxu0 %v5461_v62  ;;  %2949 = vmatprep.subr.bf16.mxu1 %v5464_v1  ;;  %v444_v60 = vld [vmem:[%s6181_s22 + $0x1f0] sm:$0xff]  ;;  %v461_v62 = vld [vmem:[%s6181_s22 + $0x278] sm:$0xff] }
 0x1c4   : > { %2460 = vmatprep.mubr.bf16.mxu0 %v571_v4  ;;  %2912 = vmatprep.mubr.bf16.mxu1 %v571_v4  ;;  %v5497_v1 = vld [vmem:[#allocation8 + $0x64] ss:$8 sps:$4 sm:$0xff]   ;;  %v5495_v4 = vld [vmem:[#allocation8 + $0x60] ss:$8 sps:$4 sm:$0xff]  }
 0x1c6   : > { %2498 = vmatpush1.bf16.msra.mxu0 %v5459_v2  ;;  %2950 = vmatpush1.bf16.msra.mxu1 %v5462_v3  ;;  %v540_v2 = vpack.c.bf16 %v444_v60, %v436_v59  ;;  %v549_v3 = vpack.c.bf16 %v461_v62, %v453_v61  ;;  %v6376_v59 = vld [vmem:[#allocation8 + $0x184] ss:$8 sps:$4 sm:$0xff]   ;;  %v6378_v60 = vld [vmem:[#allocation8 + $0x180] ss:$8 sps:$4 sm:$0xff]   ;;  %v6382_v61 = vld [vmem:[#allocation8 + $0x194] ss:$8 sps:$4 sm:$0xff]  }
 0x1c7   : > { %2499 = vmatprep.subr.bf16.mxu0 %v5467_v7  ;;  %2951 = vmatprep.subr.bf16.mxu1 %v5470_v8  ;;  %v460_v7 = vld [vmem:[%s6181_s22 + $0x270] sm:$0xff]  ;;  %v469_v8 = vld [vmem:[%s6181_s22 + $0x2b8] sm:$0xff] }
 0x1c8   : > { %v6384_v62 = vld [vmem:[#allocation8 + $0x190] ss:$8 sps:$4 sm:$0xff]  }
 0x1c9   : > { %2461 = vmatmul.mubr.bf16.gmra.mrb[28].mxu0 %v570_v13  ;;  %2913 = vmatmul.mubr.bf16.gmra.mrb[28].mxu1 %v570_v13  ;;  %v557_v13 = vpack.c.bf16 %v477_v9, %v469_v8  ;;  %v6414_v8 = vld [vmem:[#allocation8 + $0x1e0] ss:$8 sps:$4 sm:$0xff]   ;;  %v6418_v9 = vld [vmem:[#allocation8 + $0x1f4] ss:$8 sps:$4 sm:$0xff]  }
 0x1ca   : > { %2500 = vmatpush1.bf16.msra.mxu0 %v5465_v11  ;;  %2952 = vmatpush1.bf16.msra.mxu1 %v5468_v12  ;;  %v5503_v11 = vld [vmem:[#allocation8 + $0x84] ss:$8 sps:$4 sm:$0xff]   ;;  %v548_v12 = vpack.c.bf16 %v460_v7, %v452_v6  ;;  %v6408_v6 = vld [vmem:[#allocation8 + $0x1d0] ss:$8 sps:$4 sm:$0xff]  }
 0x1cb   : > { %2501 = vmatprep.subr.bf16.mxu0 %v5473_v14  ;;  %2953 = vmatprep.subr.bf16.mxu1 %v5476_v15  ;;  %v5501_v14 = vld [vmem:[#allocation8 + $0x80] ss:$8 sps:$4 sm:$0xff]   ;;  %v5509_v15 = vld [vmem:[#allocation8 + $0x94] ss:$8 sps:$4 sm:$0xff]   ;;  %v6412_v7 = vld [vmem:[#allocation8 + $0x1e4] ss:$8 sps:$4 sm:$0xff]  }
 0x1cc   : > { %2503 = vmatprep.mubr.bf16.mxu0 %v517_v18  ;;  %2955 = vmatprep.mubr.bf16.mxu1 %v517_v18  ;;  %v485_v18 = vld [vmem:[%s6181_s22 + $0x338] sm:$0xff] }
 0x1ce   : > { %2502 = vmatpush1.bf16.msra.mxu0 %v5471_v16  ;;  %2954 = vmatpush1.bf16.msra.mxu1 %v5474_v17  ;;  %v468_v16 = vld [vmem:[%s6181_s22 + $0x2b0] sm:$0xff] }
 0x1cf   : > { %3528 = vmatprep.subr.bf16.mxu0 %v5479_v23  ;;  %4625 = vmatprep.subr.bf16.mxu1 %v6301_v24  ;;  %v476_v17 = vld [vmem:[%s6181_s22 + $0x2f0] sm:$0xff]  ;;  %v565_v23 = vpack.c.bf16 %v493_v19, %v485_v18 }
 0x1d0   : > { %v556_v22 = vpack.c.bf16 %v476_v17, %v468_v16 }
 0x1d1   : > { %2504 = vmatmul.mubr.bf16.vlgmr.msra.gmra.mrb[0].mxu0 %v516_v25  ;;  %2956 = vmatmul.mubr.bf16.vlgmr.msra.gmra.mrb[0].mxu1 %v516_v25  ;;  %v5513_v25 = vld [vmem:[#allocation8 + $0xa0] ss:$8 sps:$4 sm:$0xff]  }
 0x1d2   : > { %2513 = vmatprep.mubr.bf16.mxu0 %v525_v28  ;;  %2965 = vmatprep.mubr.bf16.mxu1 %v525_v28  ;;  %v484_v28 = vld [vmem:[%s6181_s22 + $0x330] sm:$0xff] }
 0x1d3   : > { %3529 = vmatpush1.bf16.msra.mxu0 %v5477_v26  ;;  %4641 = vmatpush1.bf16.msra.mxu1 %v6303_v27  ;;  %v5521_v26 = vld [vmem:[#allocation8 + $0xb4] ss:$8 sps:$4 sm:$0xff]  }
 0x1d4   : > { %3530 = vmatprep.subr.bf16.mxu0 %v5482_v29  ;;  %4626 = vmatprep.subr.bf16.mxu1 %v6305_v30  ;;  %v492_v29 = vld [vmem:[%s6181_s22 + $0x370] sm:$0xff] }
 0x1d7   : > { %3531 = vmatpush1.bf16.msra.mxu0 %v5480_v35  ;;  %4642 = vmatpush1.bf16.msra.mxu1 %v6313_v36  ;;  %v564_v35 = vpack.c.bf16 %v492_v29, %v484_v28 }
 0x1d8   : > { %3532 = vmatprep.subr.bf16.mxu0 %v5485_v37  ;;  %4627 = vmatprep.subr.bf16.mxu1 %v6316_v38  ;;  %v573_v37 = vpack.c.bf16 %v509_v32, %v501_v31 }
 0x1d9   : > { %2514 = vmatmul.mubr.bf16.gmra.mrb[4].mxu0 %v524_v39  ;;  %2966 = vmatmul.mubr.bf16.gmra.mrb[4].mxu1 %v524_v39  ;;  %v5525_v39 = vld [vmem:[#allocation8 + $0xc0] ss:$8 sps:$4 sm:$0xff]  }
 0x1da   : > { %2523 = vmatprep.mubr.bf16.mxu0 %v533_v40  ;;  %2975 = vmatprep.mubr.bf16.mxu1 %v533_v40  ;;  %v5533_v40 = vld [vmem:[#allocation8 + $0xd4] ss:$8 sps:$4 sm:$0xff]  }
 0x1db   : > { %3533 = vmatpush1.bf16.msra.mxu0 %v5483_v41  ;;  %4643 = vmatpush1.bf16.msra.mxu1 %v6319_v42  ;;  %v500_v41 = vld [vmem:[%s6181_s22 + $0x3b0] sm:$0xff] }
 0x1dc   : > { %3534 = vmatprep.subr.bf16.mxu0 %v5488_v43  ;;  %4628 = vmatprep.subr.bf16.mxu1 %v6322_v44  ;;  %v508_v43 = vld [vmem:[%s6181_s22 + $0x3f0] sm:$0xff] }
 0x1dd   : > { %v572_v46 = vpack.c.bf16 %v508_v43, %v500_v41 }
 0x1df   : > { %3535 = vmatpush1.bf16.msra.mxu0 %v5486_v49  ;;  %4644 = vmatpush1.bf16.msra.mxu1 %v6329_v50  ;;  %v5537_v49 = vld [vmem:[#allocation8 + $0xe0] ss:$8 sps:$4 sm:$0xff]  }
 0x1e0   : > { %3536 = vmatprep.subr.bf16.mxu0 %v5491_v51  ;;  %4629 = vmatprep.subr.bf16.mxu1 %v6332_v52  ;;  %v6365_v51 = vld [vmem:[#allocation8 + $0x160] ss:$8 sps:$4 sm:$0xff]  }
 0x1e1   : > { %2524 = vmatmul.mubr.bf16.gmra.mrb[8].mxu0 %v532_v53  ;;  %2976 = vmatmul.mubr.bf16.gmra.mrb[8].mxu1 %v532_v53  ;;  %v5545_v53 = vld [vmem:[#allocation8 + $0xf4] ss:$8 sps:$4 sm:$0xff]  }
 0x1e2   : > { %2533 = vmatprep.mubr.bf16.mxu0 %v541_v54  ;;  %2985 = vmatprep.mubr.bf16.mxu1 %v541_v54  ;;  %v6369_v54 = vld [vmem:[#allocation8 + $0x174] ss:$8 sps:$4 sm:$0xff]  }
 0x1e3   : > { %3537 = vmatpush1.bf16.msra.mxu0 %v5489_v55  ;;  %4645 = vmatpush1.bf16.msra.mxu1 %v6335_v56  ;;  %v5543_v55 = vld [vmem:[#allocation8 + $0xf0] ss:$8 sps:$4 sm:$0xff]  }
 0x1e4   : > { %3538 = vmatprep.subr.bf16.mxu0 %v5494_v57  ;;  %4630 = vmatprep.subr.bf16.mxu1 %v6338_v58  ;;  %v6371_v57 = vld [vmem:[#allocation8 + $0x170] ss:$8 sps:$4 sm:$0xff]  }
 0x1e7   : > { %3539 = vmatpush1.bf16.msra.mxu0 %v5492_v63  ;;  %4646 = vmatpush1.bf16.msra.mxu1 %v6345_v0  ;;  %v6388_v63 = vld [vmem:[#allocation8 + $0x1a4] ss:$8 sps:$4 sm:$0xff]  }
 0x1e8   : > { %3540 = vmatprep.subr.bf16.mxu0 %v5497_v1  ;;  %4631 = vmatprep.subr.bf16.mxu1 %v6363_v48  ;;  %v6390_v1 = vld [vmem:[#allocation8 + $0x1a0] ss:$8 sps:$4 sm:$0xff]  }
 0x1e9   : > { %2534 = vmatmul.mubr.bf16.gmra.mrb[12].mxu0 %v540_v2  ;;  %2986 = vmatmul.mubr.bf16.gmra.mrb[12].mxu1 %v540_v2  ;;  %v6396_v2 = vld [vmem:[#allocation8 + $0x1b0] ss:$8 sps:$4 sm:$0xff]  }
 0x1ea   : > { %2543 = vmatprep.mubr.bf16.mxu0 %v549_v3  ;;  %2995 = vmatprep.mubr.bf16.mxu1 %v549_v3  ;;  %v6400_v3 = vld [vmem:[#allocation8 + $0x1c4] ss:$8 sps:$4 sm:$0xff]  }
 0x1eb   : > { %3541 = vmatpush1.bf16.msra.mxu0 %v5495_v4  ;;  %4647 = vmatpush1.bf16.msra.mxu1 %v6365_v51  ;;  %v6402_v4 = vld [vmem:[#allocation8 + $0x1c0] ss:$8 sps:$4 sm:$0xff]  }
 0x1ec   : > { %3542 = vmatprep.subr.bf16.mxu0 %v5500_v5  ;;  %4632 = vmatprep.subr.bf16.mxu1 %v6369_v54  ;;  %v6406_v5 = vld [vmem:[#allocation8 + $0x1d4] ss:$8 sps:$4 sm:$0xff]  }
 0x1ef   : > { %3543 = vmatpush1.bf16.msra.mxu0 %v5498_v10  ;;  %4648 = vmatpush1.bf16.msra.mxu1 %v6371_v57  ;;  %v6420_v10 = vld [vmem:[#allocation8 + $0x1f0] ss:$8 sps:$4 sm:$0xff]  }
 0x1f0   : > { %3544 = vmatprep.subr.bf16.mxu0 %v5503_v11  ;;  %4633 = vmatprep.subr.bf16.mxu1 %v6376_v59  ;;  %v832_v11 = vlaneseq }
 0x1f1   : > { %2544 = vmatmul.mubr.bf16.gmra.mrb[16].mxu0 %v548_v12  ;;  %2996 = vmatmul.mubr.bf16.gmra.mrb[16].mxu1 %v548_v12 }
 0x1f2   : > { %2553 = vmatprep.mubr.bf16.mxu0 %v557_v13  ;;  %3005 = vmatprep.mubr.bf16.mxu1 %v557_v13  ;;  %v6424_v12 = vshrl.u32 %v832_v11, 7 }
 0x1f3   : > { %3545 = vmatpush1.bf16.msra.mxu0 %v5501_v14  ;;  %4649 = vmatpush1.bf16.msra.mxu1 %v6378_v60 }
 0x1f4   : > { %3546 = vmatprep.subr.bf16.mxu0 %v5509_v15  ;;  %4634 = vmatprep.subr.bf16.mxu1 %v6382_v61  ;;  %v834_v13 = vsub.s32 0, %v6424_v12  ;;  %v842_v14 = vsub.s32 2, %v6424_v12  ;;  %v830_v15 = vld [vmem:[#allocation7] sm:$0xf]  ;;  %v838_v16 = vsub.s32 1, %v6424_v12  ;;  %v846_v17 = vsub.s32 3, %v6424_v12 }
 0x1f6   : > { %v6432_v18 = vrot.slane %v830_v15, %v834_v13  ;;  %v6434_v19 = vrot.slane %v830_v15, %v842_v14 }
 0x1f7   : > { %3547 = vmatpush1.bf16.msra.mxu0 %v5507_v20  ;;  %4650 = vmatpush1.bf16.msra.mxu1 %v6384_v62  ;;  %v6438_v20 = vrot.slane %v830_v15, %v838_v16 }
 0x1f8   : > { %3548 = vmatprep.subr.bf16.mxu0 %v5515_v21  ;;  %4635 = vmatprep.subr.bf16.mxu1 %v6388_v63  ;;  %v6440_v21 = vrot.slane %v830_v15, %v846_v17 }
 0x1f9   : > { %2554 = vmatmul.mubr.bf16.gmra.mrb[20].mxu0 %v556_v22  ;;  %3006 = vmatmul.mubr.bf16.gmra.mrb[20].mxu1 %v556_v22 }
 0x1fa   : > { %2563 = vmatprep.mubr.bf16.mxu0 %v565_v23  ;;  %3015 = vmatprep.mubr.bf16.mxu1 %v565_v23 }
 0x1fb   : > { %3549 = vmatpush1.bf16.msra.mxu0 %v5513_v25  ;;  %4651 = vmatpush1.bf16.msra.mxu1 %v6390_v1 }
 0x1fc   : > { %3550 = vmatprep.subr.bf16.mxu0 %v5521_v26 }
 0x1ff   : > { %3551 = vmatpush1.bf16.msra.mxu0 %v5519_v33 }
 0x200   : > { %3552 = vmatprep.subr.bf16.mxu0 %v5527_v34 }
 0x201   : > { %2564 = vmatmul.mubr.bf16.gmra.mrb[24].mxu0 %v564_v35  ;;  %3016 = vmatmul.mubr.bf16.gmra.mrb[24].mxu1 %v564_v35 }
 0x202   : > { %2573 = vmatprep.mubr.bf16.mxu0 %v573_v37  ;;  %3025 = vmatprep.mubr.bf16.mxu1 %v573_v37 }
 0x203   : > { %3553 = vmatpush1.bf16.msra.mxu0 %v5525_v39 }
 0x204   : > { %3554 = vmatprep.subr.bf16.mxu0 %v5533_v40 }
 0x207   : > { %3555 = vmatpush1.bf16.msra.mxu0 %v5531_v45 }
 0x208   : > { %3556 = vmatprep.subr.bf16.mxu0 %v5539_v47 }
 0x209   : > { %2574 = vmatmul.mubr.bf16.gmra.mrb[28].mxu0 %v572_v46  ;;  %3026 = vmatmul.mubr.bf16.gmra.mrb[28].mxu1 %v572_v46 }
 0x20b   : > { %3557 = vmatpush1.bf16.msra.mxu0 %v5537_v49 }
 0x20c   : > { %3558 = vmatprep.subr.bf16.mxu0 %v5545_v53 }
 0x20f   : > { %3559 = vmatpush1.bf16.msra.mxu0 %v5543_v55 }
 0x210   : > { %3641 = vmatprep.subr.bf16.mxu0 %v6301_v24  ;;  %v6394_v24 = vld [vmem:[#allocation8 + $0x1b4] ss:$8 sps:$4 sm:$0xff]  }
 0x211   : > { %4636 = vmatprep.subr.bf16.mxu1 %v6394_v24 }
 0x212   : > { %4652 = vmatpush1.bf16.msra.mxu1 %v6396_v2 }
 0x213   : > { %4637 = vmatprep.subr.bf16.mxu1 %v6400_v3 }
 0x216   : > { %4653 = vmatpush1.bf16.msra.mxu1 %v6402_v4 }
 0x217   : > { %4638 = vmatprep.subr.bf16.mxu1 %v6406_v5 }
 0x21a   : > { %4654 = vmatpush1.bf16.msra.mxu1 %v6408_v6 }
 0x21b   : > { %4639 = vmatprep.subr.bf16.mxu1 %v6412_v7 }
 0x21e   : > { %4655 = vmatpush1.bf16.msra.mxu1 %v6414_v8 }
 0x21f   : > { %4640 = vmatprep.subr.bf16.mxu1 %v6418_v9 }
 0x222   : > { %4656 = vmatpush1.bf16.msra.mxu1 %v6420_v10 }
 0x2a4   : > { %v2505_v22 = vpop.f32.mrb[0].mxu0  ;;  %v2957_v23 = vpop.f32.mrb[0].mxu1 }
 0x2a5   : > { %v4657_v25 = vadd.f32 %v2505_v22, %v6432_v18  ;;  %v4689_v26 = vadd.f32 %v2957_v23, %v6434_v19  ;;  %v2507_v28 = vpop.f32.mrb[1].mxu0  ;;  %v2959_v29 = vpop.f32.mrb[1].mxu1 }
 0x2a6   : > { %v4658_v31 = vadd.f32 %v2507_v28, %v6438_v20  ;;  %v4690_v32 = vadd.f32 %v2959_v29, %v6440_v21  ;;  %v2509_v33 = vpop.f32.mrb[2].mxu0  ;;  %v2961_v34 = vpop.f32.mrb[2].mxu1 }
 0x2a7   : > { %v4659_v35 = vadd.f32 %v2509_v33, %v6432_v18  ;;  %v4691_v37 = vadd.f32 %v2961_v34, %v6434_v19  ;;  %v2511_v39 = vpop.f32.mrb[3].mxu0  ;;  %v2963_v40 = vpop.f32.mrb[3].mxu1  ;;  %v3036_v45 = vmax.f32 %v4657_v25, 0.0  ;;  %v3038_v46 = vmax.f32 %v4689_v26, 0.0 }
 0x2a8   : > { %v4660_v41 = vadd.f32 %v2511_v39, %v6438_v20  ;;  %v4692_v43 = vadd.f32 %v2963_v40, %v6440_v21  ;;  %v3037_v53 = vmax.f32 %v4658_v31, 0.0  ;;  %v3039_v55 = vmax.f32 %v4690_v32, 0.0 }
 0x2a9   : > { %v3040_v47 = vmax.f32 %v4659_v35, 0.0  ;;  %v3042_v49 = vmax.f32 %v4691_v37, 0.0 }
 0x2aa   : > { %v3041_v11 = vmax.f32 %v4660_v41, 0.0  ;;  %v3043_v14 = vmax.f32 %v4692_v43, 0.0 }
 0x2ab   : > { %v3100_v15 = vpack.c.bf16 %v3040_v47, %v3036_v45  ;;  %v6450_v17 = vpack.c.bf16 %v3042_v49, %v3038_v46 }
 0x2ac   : > { %v3101_v22 = vpack.c.bf16 %v3041_v11, %v3037_v53  ;;  %v6452_v23 = vpack.c.bf16 %v3043_v14, %v3039_v55  ;;  %v2515_v28 = vpop.f32.mrb[4].mxu0  ;;  %v2967_v29 = vpop.f32.mrb[4].mxu1 }
 0x2ad   : > { %v4661_v33 = vadd.f32 %v2515_v28, %v6432_v18  ;;  %v4693_v34 = vadd.f32 %v2967_v29, %v6434_v19  ;;  %v2517_v25 = vpop.f32.mrb[5].mxu0  ;;  %v2969_v26 = vpop.f32.mrb[5].mxu1 }
 0x2ae   : > { %v4662_v35 = vadd.f32 %v2517_v25, %v6438_v20  ;;  %v4694_v31 = vadd.f32 %v2969_v26, %v6440_v21  ;;  %v2519_v32 = vpop.f32.mrb[6].mxu0  ;;  %v2971_v37 = vpop.f32.mrb[6].mxu1  ;;  %3560 = vmatprep.mubr.bf16.mxu0 %v3101_v22 }
 0x2af   : > { %v4663_v39 = vadd.f32 %v2519_v32, %v6432_v18  ;;  %v4695_v40 = vadd.f32 %v2971_v37, %v6434_v19  ;;  %v2521_v41 = vpop.f32.mrb[7].mxu0  ;;  %v2973_v43 = vpop.f32.mrb[7].mxu1  ;;  %3561 = vmatmul.mubr.bf16.vlgmr.msra.gmra.mrb[32].mxu0 %v3100_v15  ;;  %v3044_v47 = vmax.f32 %v4661_v33, 0.0  ;;  %v3046_v49 = vmax.f32 %v4693_v34, 0.0 }
 0x2b0   : > { %v4664_v45 = vadd.f32 %v2521_v41, %v6438_v20  ;;  %v4696_v46 = vadd.f32 %v2973_v43, %v6440_v21  ;;  %3642 = vmatpush1.bf16.msra.mxu0 %v6303_v27  ;;  %v3045_v11 = vmax.f32 %v4662_v35, 0.0  ;;  %v3047_v14 = vmax.f32 %v4694_v31, 0.0 }
 0x2b1   : > { %v3048_v53 = vmax.f32 %v4663_v39, 0.0  ;;  %v3050_v55 = vmax.f32 %v4695_v40, 0.0  ;;  %3643 = vmatprep.subr.bf16.mxu0 %v6305_v30 }
 0x2b2   : > { %v3049_v22 = vmax.f32 %v4664_v45, 0.0  ;;  %v3051_v28 = vmax.f32 %v4696_v46, 0.0 }
 0x2b3   : > { %v3104_v29 = vpack.c.bf16 %v3048_v53, %v3044_v47  ;;  %v6464_v25 = vpack.c.bf16 %v3050_v55, %v3046_v49 }
 0x2b4   : > { %v3105_v15 = vpack.c.bf16 %v3049_v22, %v3045_v11  ;;  %v6466_v26 = vpack.c.bf16 %v3051_v28, %v3047_v14  ;;  %v2525_v32 = vpop.f32.mrb[8].mxu0  ;;  %v2977_v37 = vpop.f32.mrb[8].mxu1  ;;  %3644 = vmatpush1.bf16.msra.mxu0 %v6313_v36 }
 0x2b5   : > { %v4665_v27 = vadd.f32 %v2525_v32, %v6432_v18  ;;  %v4697_v33 = vadd.f32 %v2977_v37, %v6434_v19  ;;  %v2527_v34 = vpop.f32.mrb[9].mxu0  ;;  %v2979_v30 = vpop.f32.mrb[9].mxu1  ;;  %3645 = vmatprep.subr.bf16.mxu0 %v6316_v38 }
 0x2b6   : > { %v4666_v35 = vadd.f32 %v2527_v34, %v6438_v20  ;;  %v4698_v31 = vadd.f32 %v2979_v30, %v6440_v21  ;;  %v2529_v39 = vpop.f32.mrb[10].mxu0  ;;  %v2981_v40 = vpop.f32.mrb[10].mxu1  ;;  %3570 = vmatprep.mubr.bf16.mxu0 %v3105_v15 }
 0x2b7   : > { %v4667_v41 = vadd.f32 %v2529_v39, %v6432_v18  ;;  %v4699_v43 = vadd.f32 %v2981_v40, %v6434_v19  ;;  %v2531_v36 = vpop.f32.mrb[11].mxu0  ;;  %v2983_v45 = vpop.f32.mrb[11].mxu1  ;;  %3571 = vmatmul.mubr.bf16.gmra.mrb[36].mxu0 %v3104_v29  ;;  %v3052_v38 = vmax.f32 %v4665_v27, 0.0  ;;  %v3054_v49 = vmax.f32 %v4697_v33, 0.0 }
 0x2b8   : > { %v4668_v46 = vadd.f32 %v2531_v36, %v6438_v20  ;;  %v4700_v47 = vadd.f32 %v2983_v45, %v6440_v21  ;;  %3646 = vmatpush1.bf16.msra.mxu0 %v6319_v42  ;;  %v3053_v11 = vmax.f32 %v4666_v35, 0.0  ;;  %v3055_v14 = vmax.f32 %v4698_v31, 0.0 }
 0x2b9   : > { %v3056_v53 = vmax.f32 %v4667_v41, 0.0  ;;  %v3058_v55 = vmax.f32 %v4699_v43, 0.0  ;;  %3647 = vmatprep.subr.bf16.mxu0 %v6322_v44 }
 0x2ba   : > { %v3057_v22 = vmax.f32 %v4668_v46, 0.0  ;;  %v3059_v28 = vmax.f32 %v4700_v47, 0.0 }
 0x2bb   : > { %v3108_v15 = vpack.c.bf16 %v3056_v53, %v3052_v38  ;;  %v6480_v32 = vpack.c.bf16 %v3058_v55, %v3054_v49 }
 0x2bc   : > { %v3109_v29 = vpack.c.bf16 %v3057_v22, %v3053_v11  ;;  %v6482_v37 = vpack.c.bf16 %v3059_v28, %v3055_v14  ;;  %v2535_v34 = vpop.f32.mrb[12].mxu0  ;;  %v2987_v30 = vpop.f32.mrb[12].mxu1  ;;  %3648 = vmatpush1.bf16.msra.mxu0 %v6329_v50 }
 0x2bd   : > { %v4669_v42 = vadd.f32 %v2535_v34, %v6432_v18  ;;  %v4701_v27 = vadd.f32 %v2987_v30, %v6434_v19  ;;  %v2537_v33 = vpop.f32.mrb[13].mxu0  ;;  %v2989_v44 = vpop.f32.mrb[13].mxu1  ;;  %3649 = vmatprep.subr.bf16.mxu0 %v6332_v52 }
 0x2be   : > { %v4670_v35 = vadd.f32 %v2537_v33, %v6438_v20  ;;  %v4702_v31 = vadd.f32 %v2989_v44, %v6440_v21  ;;  %v2539_v39 = vpop.f32.mrb[14].mxu0  ;;  %v2991_v40 = vpop.f32.mrb[14].mxu1  ;;  %3580 = vmatprep.mubr.bf16.mxu0 %v3109_v29 }
 0x2bf   : > { %v4671_v41 = vadd.f32 %v2539_v39, %v6432_v18  ;;  %v4703_v43 = vadd.f32 %v2991_v40, %v6434_v19  ;;  %v2541_v50 = vpop.f32.mrb[15].mxu0  ;;  %v2993_v36 = vpop.f32.mrb[15].mxu1  ;;  %3581 = vmatmul.mubr.bf16.gmra.mrb[40].mxu0 %v3108_v15  ;;  %v3060_v52 = vmax.f32 %v4669_v42, 0.0  ;;  %v3062_v47 = vmax.f32 %v4701_v27, 0.0 }
 0x2c0   : > { %v4672_v45 = vadd.f32 %v2541_v50, %v6438_v20  ;;  %v4704_v46 = vadd.f32 %v2993_v36, %v6440_v21  ;;  %3650 = vmatpush1.bf16.msra.mxu0 %v6335_v56  ;;  %v3061_v53 = vmax.f32 %v4670_v35, 0.0  ;;  %v3063_v55 = vmax.f32 %v4702_v31, 0.0 }
 0x2c1   : > { %v3064_v38 = vmax.f32 %v4671_v41, 0.0  ;;  %v3066_v49 = vmax.f32 %v4703_v43, 0.0  ;;  %3651 = vmatprep.subr.bf16.mxu0 %v6338_v58 }
 0x2c2   : > { %v3065_v11 = vmax.f32 %v4672_v45, 0.0  ;;  %v3067_v14 = vmax.f32 %v4704_v46, 0.0 }
 0x2c3   : > { %v3112_v22 = vpack.c.bf16 %v3064_v38, %v3060_v52  ;;  %v6496_v28 = vpack.c.bf16 %v3066_v49, %v3062_v47 }
 0x2c4   : > { %v3113_v15 = vpack.c.bf16 %v3065_v11, %v3061_v53  ;;  %v6498_v29 = vpack.c.bf16 %v3067_v14, %v3063_v55  ;;  %v2545_v34 = vpop.f32.mrb[16].mxu0  ;;  %v2997_v30 = vpop.f32.mrb[16].mxu1  ;;  %3652 = vmatpush1.bf16.msra.mxu0 %v6345_v0 }
 0x2c5   : > { %v4673_v56 = vadd.f32 %v2545_v34, %v6432_v18  ;;  %v4705_v42 = vadd.f32 %v2997_v30, %v6434_v19  ;;  %v2547_v27 = vpop.f32.mrb[17].mxu0  ;;  %v2999_v58 = vpop.f32.mrb[17].mxu1  ;;  %3653 = vmatprep.subr.bf16.mxu0 %v6363_v48 }
 0x2c6   : > { %v4674_v33 = vadd.f32 %v2547_v27, %v6438_v20  ;;  %v4706_v44 = vadd.f32 %v2999_v58, %v6440_v21  ;;  %v2549_v35 = vpop.f32.mrb[18].mxu0  ;;  %v3001_v31 = vpop.f32.mrb[18].mxu1  ;;  %3590 = vmatprep.mubr.bf16.mxu0 %v3113_v15 }
 0x2c7   : > { %v4675_v39 = vadd.f32 %v2549_v35, %v6432_v18  ;;  %v4707_v40 = vadd.f32 %v3001_v31, %v6434_v19  ;;  %v2551_v0 = vpop.f32.mrb[19].mxu0  ;;  %v3003_v41 = vpop.f32.mrb[19].mxu1  ;;  %3591 = vmatmul.mubr.bf16.gmra.mrb[44].mxu0 %v3112_v22  ;;  %v3068_v48 = vmax.f32 %v4673_v56, 0.0  ;;  %v3070_v36 = vmax.f32 %v4705_v42, 0.0 }
 0x2c8   : > { %v4676_v43 = vadd.f32 %v2551_v0, %v6438_v20  ;;  %v4708_v50 = vadd.f32 %v3003_v41, %v6440_v21  ;;  %3654 = vmatpush1.bf16.msra.mxu0 %v6365_v51  ;;  %v3069_v52 = vmax.f32 %v4674_v33, 0.0  ;;  %v3071_v47 = vmax.f32 %v4706_v44, 0.0 }
 0x2c9   : > { %v3072_v45 = vmax.f32 %v4675_v39, 0.0  ;;  %v3074_v46 = vmax.f32 %v4707_v40, 0.0  ;;  %3655 = vmatprep.subr.bf16.mxu0 %v6369_v54 }
 0x2ca   : > { %v3073_v38 = vmax.f32 %v4676_v43, 0.0  ;;  %v3075_v49 = vmax.f32 %v4708_v50, 0.0 }
 0x2cb   : > { %v3116_v53 = vpack.c.bf16 %v3072_v45, %v3068_v48  ;;  %v3118_v55 = vpack.c.bf16 %v3074_v46, %v3070_v36 }
 0x2cc   : > { %v3117_v11 = vpack.c.bf16 %v3073_v38, %v3069_v52  ;;  %v3119_v14 = vpack.c.bf16 %v3075_v49, %v3071_v47  ;;  %v2555_v22 = vpop.f32.mrb[20].mxu0  ;;  %v3007_v15 = vpop.f32.mrb[20].mxu1  ;;  %3656 = vmatpush1.bf16.msra.mxu0 %v6371_v57 }
 0x2cd   : > { %v4677_v51 = vadd.f32 %v2555_v22, %v6432_v18  ;;  %v4709_v34 = vadd.f32 %v3007_v15, %v6434_v19  ;;  %v2557_v30 = vpop.f32.mrb[21].mxu0  ;;  %v3009_v56 = vpop.f32.mrb[21].mxu1  ;;  %3657 = vmatprep.subr.bf16.mxu0 %v6376_v59 }
 0x2ce   : > { %v4678_v54 = vadd.f32 %v2557_v30, %v6438_v20  ;;  %v4710_v42 = vadd.f32 %v3009_v56, %v6440_v21  ;;  %v2559_v27 = vpop.f32.mrb[22].mxu0  ;;  %v3011_v58 = vpop.f32.mrb[22].mxu1  ;;  %3600 = vmatprep.mubr.bf16.mxu0 %v3117_v11  ;;  %3713 = vmatprep.mubr.bf16.mxu1 %v3119_v14 }
 0x2cf   : > { %v4679_v33 = vadd.f32 %v2559_v27, %v6432_v18  ;;  %v4711_v57 = vadd.f32 %v3011_v58, %v6434_v19  ;;  %v2561_v44 = vpop.f32.mrb[23].mxu0  ;;  %v3013_v35 = vpop.f32.mrb[23].mxu1  ;;  %3601 = vmatmul.mubr.bf16.gmra.mrb[48].mxu0 %v3116_v53  ;;  %3714 = vmatmul.mubr.bf16.vlgmr.msra.gmra.mrb[32].mxu1 %v3118_v55  ;;  %v3076_v39 = vmax.f32 %v4677_v51, 0.0  ;;  %v3078_v40 = vmax.f32 %v4709_v34, 0.0 }
 0x2d0   : > { %v4680_v31 = vadd.f32 %v2561_v44, %v6438_v20  ;;  %v4712_v59 = vadd.f32 %v3013_v35, %v6440_v21  ;;  %3658 = vmatpush1.bf16.msra.mxu0 %v6378_v60  ;;  %v3077_v43 = vmax.f32 %v4678_v54, 0.0  ;;  %v3079_v50 = vmax.f32 %v4710_v42, 0.0 }
 0x2d1   : > { %v3080_v0 = vmax.f32 %v4679_v33, 0.0  ;;  %v3082_v41 = vmax.f32 %v4711_v57, 0.0  ;;  %3659 = vmatprep.subr.bf16.mxu0 %v6382_v61 }
 0x2d2   : > { %v3081_v48 = vmax.f32 %v4680_v31, 0.0  ;;  %v3083_v36 = vmax.f32 %v4712_v59, 0.0 }
 0x2d3   : > { %v3120_v45 = vpack.c.bf16 %v3080_v0, %v3076_v39  ;;  %v3122_v46 = vpack.c.bf16 %v3082_v41, %v3078_v40 }
 0x2d4   : > { %v3121_v52 = vpack.c.bf16 %v3081_v48, %v3077_v43  ;;  %v3123_v47 = vpack.c.bf16 %v3083_v36, %v3079_v50  ;;  %v2565_v38 = vpop.f32.mrb[24].mxu0  ;;  %v3017_v49 = vpop.f32.mrb[24].mxu1  ;;  %3660 = vmatpush1.bf16.msra.mxu0 %v6384_v62 }
 0x2d5   : > { %v4681_v60 = vadd.f32 %v2565_v38, %v6432_v18  ;;  %v4713_v53 = vadd.f32 %v3017_v49, %v6434_v19  ;;  %v2567_v55 = vpop.f32.mrb[25].mxu0  ;;  %v3019_v11 = vpop.f32.mrb[25].mxu1  ;;  %3661 = vmatprep.subr.bf16.mxu0 %v6388_v63 }
 0x2d6   : > { %v4682_v61 = vadd.f32 %v2567_v55, %v6438_v20  ;;  %v4714_v14 = vadd.f32 %v3019_v11, %v6440_v21  ;;  %v2569_v22 = vpop.f32.mrb[26].mxu0  ;;  %v3021_v15 = vpop.f32.mrb[26].mxu1  ;;  %3610 = vmatprep.mubr.bf16.mxu0 %v3121_v52  ;;  %3723 = vmatprep.mubr.bf16.mxu1 %v3123_v47 }
 0x2d7   : > { %v4683_v51 = vadd.f32 %v2569_v22, %v6432_v18  ;;  %v4715_v62 = vadd.f32 %v3021_v15, %v6434_v19  ;;  %v2571_v34 = vpop.f32.mrb[27].mxu0  ;;  %v3023_v30 = vpop.f32.mrb[27].mxu1  ;;  %3611 = vmatmul.mubr.bf16.gmra.mrb[52].mxu0 %v3120_v45  ;;  %3724 = vmatmul.mubr.bf16.gmra.mrb[36].mxu1 %v3122_v46  ;;  %v3084_v54 = vmax.f32 %v4681_v60, 0.0  ;;  %v3086_v42 = vmax.f32 %v4713_v53, 0.0 }
 0x2d8   : > { %v4684_v56 = vadd.f32 %v2571_v34, %v6438_v20  ;;  %v4716_v63 = vadd.f32 %v3023_v30, %v6440_v21  ;;  %3662 = vmatpush1.bf16.msra.mxu0 %v6390_v1  ;;  %v3085_v33 = vmax.f32 %v4682_v61, 0.0  ;;  %v3087_v57 = vmax.f32 %v4714_v14, 0.0 }
 0x2d9   : > { %v3088_v27 = vmax.f32 %v4683_v51, 0.0  ;;  %v3090_v58 = vmax.f32 %v4715_v62, 0.0  ;;  %3663 = vmatprep.subr.bf16.mxu0 %v6394_v24 }
 0x2da   : > { %v3089_v44 = vmax.f32 %v4684_v56, 0.0  ;;  %v3091_v35 = vmax.f32 %v4716_v63, 0.0 }
 0x2db   : > { %v3124_v31 = vpack.c.bf16 %v3088_v27, %v3084_v54  ;;  %v3126_v59 = vpack.c.bf16 %v3090_v58, %v3086_v42 }
 0x2dc   : > { %v3125_v39 = vpack.c.bf16 %v3089_v44, %v3085_v33  ;;  %v3127_v40 = vpack.c.bf16 %v3091_v35, %v3087_v57  ;;  %v2575_v0 = vpop.f32.mrb[28].mxu0  ;;  %v3027_v41 = vpop.f32.mrb[28].mxu1  ;;  %3664 = vmatpush1.bf16.msra.mxu0 %v6396_v2 }
 0x2dd   : > { %v4685_v1 = vadd.f32 %v2575_v0, %v6432_v18  ;;  %v4717_v43 = vadd.f32 %v3027_v41, %v6434_v19  ;;  %v2577_v50 = vpop.f32.mrb[29].mxu0  ;;  %v3029_v48 = vpop.f32.mrb[29].mxu1  ;;  %3665 = vmatprep.subr.bf16.mxu0 %v6400_v3 }
 0x2de   : > { %v4686_v24 = vadd.f32 %v2577_v50, %v6438_v20  ;;  %v4718_v36 = vadd.f32 %v3029_v48, %v6440_v21  ;;  %v2579_v45 = vpop.f32.mrb[30].mxu0  ;;  %v3031_v46 = vpop.f32.mrb[30].mxu1  ;;  %3620 = vmatprep.mubr.bf16.mxu0 %v3125_v39  ;;  %3733 = vmatprep.mubr.bf16.mxu1 %v3127_v40 }
 0x2df   : > { %v4687_v52 = vadd.f32 %v2579_v45, %v6432_v18  ;;  %v4719_v2 = vadd.f32 %v3031_v46, %v6434_v19  ;;  %v2581_v47 = vpop.f32.mrb[31].mxu0  ;;  %v3033_v38 = vpop.f32.mrb[31].mxu1  ;;  %3621 = vmatmul.mubr.bf16.gmra.mrb[56].mxu0 %v3124_v31  ;;  %3734 = vmatmul.mubr.bf16.gmra.mrb[40].mxu1 %v3126_v59  ;;  %v3092_v60 = vmax.f32 %v4685_v1, 0.0  ;;  %v3094_v53 = vmax.f32 %v4717_v43, 0.0 }
 0x2e0   : > { %v4688_v49 = vadd.f32 %v2581_v47, %v6438_v20  ;;  %v4720_v3 = vadd.f32 %v3033_v38, %v6440_v21  ;;  %3666 = vmatpush1.bf16.msra.mxu0 %v6402_v4  ;;  %v3093_v61 = vmax.f32 %v4686_v24, 0.0  ;;  %v3095_v18 = vmax.f32 %v4718_v36, 0.0  ;;  %v5573_v4 = vld [vmem:[#allocation11 + $0x40] sm:$0xff]   ;;  %v5580_v20 = vld [vmem:[#allocation11 + $0x18] sm:$0xff]  }
 0x2e1   : > { %v3096_v55 = vmax.f32 %v4687_v52, 0.0  ;;  %v3098_v11 = vmax.f32 %v4719_v2, 0.0  ;;  %3667 = vmatprep.subr.bf16.mxu0 %v6406_v5  ;;  %v5574_v5 = vld [vmem:[#allocation11] sm:$0xff]   ;;  %4561 = vmatprep.subr.bf16.mxu1 %v5573_v4 }
 0x2e2   : > { %v3097_v14 = vmax.f32 %v4688_v49, 0.0  ;;  %v3099_v19 = vmax.f32 %v4720_v3, 0.0  ;;  %4562 = vmatpush3.bf16.msra.mxu1 %v5574_v5  ;;  %v5581_v21 = vld [vmem:[#allocation11 + $0x60] sm:$0xff]  }
 0x2e3   : > { %v3128_v22 = vpack.c.bf16 %v3096_v55, %v3092_v60  ;;  %v3130_v15 = vpack.c.bf16 %v3098_v11, %v3094_v53 }
 0x2e4   : > { %v3129_v51 = vpack.c.bf16 %v3097_v14, %v3093_v61  ;;  %v3131_v62 = vpack.c.bf16 %v3099_v19, %v3095_v18  ;;  %3668 = vmatpush1.bf16.msra.mxu0 %v6408_v6  ;;  %v5575_v6 = vld [vmem:[#allocation11 + $0x48] sm:$0xff]  }
 0x2e5   : > { %3669 = vmatprep.subr.bf16.mxu0 %v6412_v7  ;;  %v5576_v7 = vld [vmem:[#allocation11 + $0x8] sm:$0xff]   ;;  %4563 = vmatprep.subr.bf16.mxu1 %v5575_v6 }
 0x2e6   : > { %3630 = vmatprep.mubr.bf16.mxu0 %v3129_v51  ;;  %3743 = vmatprep.mubr.bf16.mxu1 %v3131_v62 }
 0x2e7   : > { %3631 = vmatmul.mubr.bf16.gmra.mrb[60].mxu0 %v3128_v22  ;;  %3744 = vmatmul.mubr.bf16.gmra.mrb[44].mxu1 %v3130_v15 }
 0x2e8   : > { %3670 = vmatpush1.bf16.msra.mxu0 %v6414_v8  ;;  %3673 = vmatprep.mubr.bf16.mxu0 %v6452_v23  ;;  %v5577_v8 = vld [vmem:[#allocation11 + $0x50] sm:$0xff]   ;;  %v5583_v23 = vld [vmem:[#allocation11 + $0x68] sm:$0xff]  }
 0x2e9   : > { %3671 = vmatprep.subr.bf16.mxu0 %v6418_v9  ;;  %4564 = vmatpush3.bf16.msra.mxu1 %v5576_v7  ;;  %v5578_v9 = vld [vmem:[#allocation11 + $0x10] sm:$0xff]  }
 0x2ea   : > { %4565 = vmatprep.subr.bf16.mxu1 %v5577_v8 }
 0x2ec   : > { %3672 = vmatpush1.bf16.msra.mxu0 %v6420_v10  ;;  %v5579_v10 = vld [vmem:[#allocation11 + $0x58] sm:$0xff]  }
 0x2ed   : > { %4566 = vmatpush3.bf16.msra.mxu1 %v5578_v9 }
 0x2ee   : > { %4567 = vmatprep.subr.bf16.mxu1 %v5579_v10 }
 0x2ef   : > { %3674 = vmatmul.mubr.bf16.vlgmr.msra.gmra.mrb[32].mxu0 %v6450_v17  ;;  %v5582_v17 = vld [vmem:[#allocation11 + $0x20] sm:$0xff]  }
 0x2f0   : > { %3683 = vmatprep.mubr.bf16.mxu0 %v6466_v26  ;;  %v5585_v26 = vld [vmem:[#allocation11 + $0x70] sm:$0xff]  }
 0x2f1   : > { %4568 = vmatpush3.bf16.msra.mxu1 %v5580_v20 }
 0x2f2   : > { %4569 = vmatprep.subr.bf16.mxu1 %v5581_v21 }
 0x2f5   : > { %4570 = vmatpush3.bf16.msra.mxu1 %v5582_v17 }
 0x2f6   : > { %4571 = vmatprep.subr.bf16.mxu1 %v5583_v23 }
 0x2f7   : > { %3684 = vmatmul.mubr.bf16.gmra.mrb[36].mxu0 %v6464_v25  ;;  %v5584_v25 = vld [vmem:[#allocation11 + $0x28] sm:$0xff]  }
 0x2f8   : > { %3693 = vmatprep.mubr.bf16.mxu0 %v6482_v37  ;;  %v5587_v37 = vld [vmem:[#allocation11 + $0x78] sm:$0xff]  }
 0x2f9   : > { %4572 = vmatpush3.bf16.msra.mxu1 %v5584_v25 }
 0x2fa   : > { %4573 = vmatprep.subr.bf16.mxu1 %v5585_v26 }
 0x2ff   : > { %3694 = vmatmul.mubr.bf16.gmra.mrb[40].mxu0 %v6480_v32  ;;  %v5586_v32 = vld [vmem:[#allocation11 + $0x30] sm:$0xff]  }
 0x300   : > { %3703 = vmatprep.mubr.bf16.mxu0 %v6498_v29  ;;  %4574 = vmatpush3.bf16.msra.mxu1 %v5586_v32  ;;  %v3196_v29 = vld [vmem:[#allocation10] sm:$0x3] }
 0x301   : > { %4575 = vmatprep.subr.bf16.mxu1 %v5587_v37  ;;  %v6563_v34 = vrot.slane %v3196_v29, %v834_v13  ;;  %v6567_v30 = vrot.slane %v3196_v29, %v838_v16 }
 0x307   : > { %3704 = vmatmul.mubr.bf16.gmra.mrb[44].mxu0 %v6496_v28  ;;  %v5588_v28 = vld [vmem:[#allocation11 + $0x38] sm:$0xff]  }
 0x308   : > { %4576 = vmatpush3.bf16.msra.mxu1 %v5588_v28 }
 0x3a2   : > { %v3602_v56 = vpop.f32.mrb[48].mxu0  ;;  %v3715_v63 = vpop.f32.mrb[32].mxu1 }
 0x3a3   : > { %v3603_v54 = vadd.f32 %v3602_v56, %v6563_v34  ;;  %v3604_v42 = vpop.f32.mrb[49].mxu0  ;;  %v3717_v27 = vpop.f32.mrb[33].mxu1 }
 0x3a4   : > { %v3605_v58 = vadd.f32 %v3604_v42, %v6567_v30  ;;  %v3606_v33 = vpop.f32.mrb[50].mxu0  ;;  %v3719_v57 = vpop.f32.mrb[34].mxu1 }
 0x3a5   : > { %v3716_v44 = vadd.f32 %v3715_v63, %v3603_v54  ;;  %v3607_v35 = vadd.f32 %v3606_v33, %v6563_v34  ;;  %v3608_v31 = vpop.f32.mrb[51].mxu0  ;;  %v3721_v13 = vpop.f32.mrb[35].mxu1 }
 0x3a6   : > { %v3718_v59 = vadd.f32 %v3717_v27, %v3605_v58  ;;  %v3609_v12 = vadd.f32 %v3608_v31, %v6567_v30 }
 0x3a7   : > { %v3720_v16 = vadd.f32 %v3719_v57, %v3607_v35  ;;  %v3770_v40 = vmax.f32 %v3716_v44, 0.0 }
 0x3a8   : > { %v3722_v39 = vadd.f32 %v3721_v13, %v3609_v12  ;;  %v3771_v41 = vmax.f32 %v3718_v59, 0.0 }
 0x3a9   : > { %v3772_v0 = vmax.f32 %v3720_v16, 0.0 }
 0x3aa   : > { %v3773_v1 = vmax.f32 %v3722_v39, 0.0  ;;  %v3612_v43 = vpop.f32.mrb[52].mxu0  ;;  %v3725_v50 = vpop.f32.mrb[36].mxu1 }
 0x3ab   : > { %v6573_v48 = vpack.c.bf16 %v3772_v0, %v3770_v40  ;;  %v3613_v24 = vadd.f32 %v3612_v43, %v6563_v34  ;;  %v3614_v36 = vpop.f32.mrb[53].mxu0  ;;  %v3727_v45 = vpop.f32.mrb[37].mxu1 }
 0x3ac   : > { %v6576_v46 = vpack.c.bf16 %v3773_v1, %v3771_v41  ;;  %v3615_v52 = vadd.f32 %v3614_v36, %v6567_v30  ;;  %v3616_v2 = vpop.f32.mrb[54].mxu0  ;;  %v3729_v47 = vpop.f32.mrb[38].mxu1 }
 0x3ad   : > { %v3726_v38 = vadd.f32 %v3725_v50, %v3613_v24  ;;  %v3617_v49 = vadd.f32 %v3616_v2, %v6563_v34  ;;  %v3618_v3 = vpop.f32.mrb[55].mxu0  ;;  %v3731_v60 = vpop.f32.mrb[39].mxu1 }
 0x3ae   : > { %v3728_v53 = vadd.f32 %v3727_v45, %v3615_v52  ;;  %v3619_v55 = vadd.f32 %v3618_v3, %v6567_v30 }
 0x3af   : > { %v3730_v11 = vadd.f32 %v3729_v47, %v3617_v49  ;;  %v3774_v18 = vmax.f32 %v3726_v38, 0.0 }
 0x3b0   : > { %v3732_v61 = vadd.f32 %v3731_v60, %v3619_v55  ;;  %v3775_v19 = vmax.f32 %v3728_v53, 0.0 }
 0x3b1   : > { %v3776_v14 = vmax.f32 %v3730_v11, 0.0 }
 0x3b2   : > { %v3777_v22 = vmax.f32 %v3732_v61, 0.0  ;;  %v3622_v15 = vpop.f32.mrb[56].mxu0  ;;  %v3735_v51 = vpop.f32.mrb[40].mxu1 }
 0x3b3   : > { %v6581_v62 = vpack.c.bf16 %v3776_v14, %v3774_v18  ;;  %v3623_v4 = vadd.f32 %v3622_v15, %v6563_v34  ;;  %v3624_v5 = vpop.f32.mrb[57].mxu0  ;;  %v3737_v6 = vpop.f32.mrb[41].mxu1 }
 0x3b4   : > { %v6584_v7 = vpack.c.bf16 %v3777_v22, %v3775_v19  ;;  %v3625_v8 = vadd.f32 %v3624_v5, %v6567_v30  ;;  %v3626_v9 = vpop.f32.mrb[58].mxu0  ;;  %v3739_v10 = vpop.f32.mrb[42].mxu1 }
 0x3b5   : > { %v3736_v20 = vadd.f32 %v3735_v51, %v3623_v4  ;;  %v3627_v21 = vadd.f32 %v3626_v9, %v6563_v34  ;;  %v3628_v17 = vpop.f32.mrb[59].mxu0  ;;  %v3741_v23 = vpop.f32.mrb[43].mxu1 }
 0x3b6   : > { %v3738_v25 = vadd.f32 %v3737_v6, %v3625_v8  ;;  %v3629_v26 = vadd.f32 %v3628_v17, %v6567_v30 }
 0x3b7   : > { %v3740_v32 = vadd.f32 %v3739_v10, %v3627_v21  ;;  %v3778_v28 = vmax.f32 %v3736_v20, 0.0 }
 0x3b8   : > { %v3742_v37 = vadd.f32 %v3741_v23, %v3629_v26  ;;  %v3779_v56 = vmax.f32 %v3738_v25, 0.0 }
 0x3b9   : > { %v3780_v29 = vmax.f32 %v3740_v32, 0.0 }
 0x3ba   : > { %v3781_v63 = vmax.f32 %v3742_v37, 0.0  ;;  %v3632_v54 = vpop.f32.mrb[60].mxu0  ;;  %v3745_v42 = vpop.f32.mrb[44].mxu1 }
 0x3bb   : > { %v6589_v27 = vpack.c.bf16 %v3780_v29, %v3778_v28  ;;  %v3633_v58 = vadd.f32 %v3632_v54, %v6563_v34  ;;  %v3634_v33 = vpop.f32.mrb[61].mxu0  ;;  %v3747_v57 = vpop.f32.mrb[45].mxu1 }
 0x3bc   : > { %v6592_v44 = vpack.c.bf16 %v3781_v63, %v3779_v56  ;;  %v3635_v35 = vadd.f32 %v3634_v33, %v6567_v30  ;;  %v3636_v31 = vpop.f32.mrb[62].mxu0  ;;  %v3749_v13 = vpop.f32.mrb[46].mxu1 }
 0x3bd   : > { %v3746_v59 = vadd.f32 %v3745_v42, %v3633_v58  ;;  %v3637_v12 = vadd.f32 %v3636_v31, %v6563_v34  ;;  %v3638_v16 = vpop.f32.mrb[63].mxu0  ;;  %v3751_v39 = vpop.f32.mrb[47].mxu1 }
 0x3be   : > { %v3748_v40 = vadd.f32 %v3747_v57, %v3635_v35  ;;  %v3639_v0 = vadd.f32 %v3638_v16, %v6567_v30 }
 0x3bf   : > { %v3750_v41 = vadd.f32 %v3749_v13, %v3637_v12  ;;  %v3782_v43 = vmax.f32 %v3746_v59, 0.0 }
 0x3c0   : > { %v3752_v1 = vadd.f32 %v3751_v39, %v3639_v0  ;;  %v3783_v24 = vmax.f32 %v3748_v40, 0.0 }
 0x3c1   : > { %v3784_v50 = vmax.f32 %v3750_v41, 0.0 }
 0x3c2   : > { %v3785_v36 = vmax.f32 %v3752_v1, 0.0  ;;  %v3675_v45 = vpop.f32.mrb[32].mxu0 }
 0x3c3   : > { %v6597_v52 = vpack.c.bf16 %v3784_v50, %v3782_v43  ;;  %v4721_v2 = vadd.f32 %v3675_v45, %v6563_v34  ;;  %v3677_v47 = vpop.f32.mrb[33].mxu0 }
 0x3c4   : > { %v6600_v38 = vpack.c.bf16 %v3785_v36, %v3783_v24  ;;  %v4722_v49 = vadd.f32 %v3677_v47, %v6567_v30  ;;  %v3679_v3 = vpop.f32.mrb[34].mxu0 }
 0x3c5   : > { %v4723_v60 = vadd.f32 %v3679_v3, %v6563_v34  ;;  %v3681_v53 = vpop.f32.mrb[35].mxu0  ;;  %v3754_v11 = vmax.f32 %v4721_v2, 0.0 }
 0x3c6   : > { %v4724_v55 = vadd.f32 %v3681_v53, %v6567_v30  ;;  %v3755_v18 = vmax.f32 %v4722_v49, 0.0 }
 0x3c7   : > { %v3756_v61 = vmax.f32 %v4723_v60, 0.0 }
 0x3c8   : > { %v3757_v14 = vmax.f32 %v4724_v55, 0.0 }
 0x3c9   : > { %v3786_v19 = vpack.c.bf16 %v3756_v61, %v3754_v11 }
 0x3ca   : > { %v3787_v22 = vpack.c.bf16 %v3757_v14, %v3755_v18  ;;  %v3685_v15 = vpop.f32.mrb[36].mxu0 }
 0x3cb   : > { %v4725_v51 = vadd.f32 %v3685_v15, %v6563_v34  ;;  %v3687_v4 = vpop.f32.mrb[37].mxu0 }
 0x3cc   : > { %v4726_v5 = vadd.f32 %v3687_v4, %v6567_v30  ;;  %v3689_v6 = vpop.f32.mrb[38].mxu0  ;;  %3969 = vmatprep.mubr.bf16.mxu1 %v3787_v22 }
 0x3cd   : > { %v4727_v8 = vadd.f32 %v3689_v6, %v6563_v34  ;;  %v3691_v9 = vpop.f32.mrb[39].mxu0  ;;  %3970 = vmatmul.mubr.bf16.vlgmr.msra.gmra.mrb[48].mxu1 %v3786_v19  ;;  %v3758_v20 = vmax.f32 %v4725_v51, 0.0 }
 0x3ce   : > { %v4728_v10 = vadd.f32 %v3691_v9, %v6567_v30  ;;  %v3759_v17 = vmax.f32 %v4726_v5, 0.0 }
 0x3cf   : > { %v3760_v21 = vmax.f32 %v4727_v8, 0.0 }
 0x3d0   : > { %v3761_v23 = vmax.f32 %v4728_v10, 0.0 }
 0x3d1   : > { %v3788_v25 = vpack.c.bf16 %v3760_v21, %v3758_v20 }
 0x3d2   : > { %v3789_v26 = vpack.c.bf16 %v3761_v23, %v3759_v17  ;;  %v3695_v32 = vpop.f32.mrb[40].mxu0 }
 0x3d3   : > { %v4729_v37 = vadd.f32 %v3695_v32, %v6563_v34  ;;  %v3697_v28 = vpop.f32.mrb[41].mxu0 }
 0x3d4   : > { %v4730_v29 = vadd.f32 %v3697_v28, %v6567_v30  ;;  %v3699_v56 = vpop.f32.mrb[42].mxu0  ;;  %3977 = vmatprep.mubr.bf16.mxu1 %v3789_v26 }
 0x3d5   : > { %v4731_v63 = vadd.f32 %v3699_v56, %v6563_v34  ;;  %v3701_v54 = vpop.f32.mrb[43].mxu0  ;;  %3978 = vmatmul.mubr.bf16.gmra.mrb[52].mxu1 %v3788_v25  ;;  %v3762_v58 = vmax.f32 %v4729_v37, 0.0 }
 0x3d6   : > { %v4732_v42 = vadd.f32 %v3701_v54, %v6567_v30  ;;  %v3763_v57 = vmax.f32 %v4730_v29, 0.0 }
 0x3d7   : > { %v3764_v33 = vmax.f32 %v4731_v63, 0.0 }
 0x3d8   : > { %v3765_v35 = vmax.f32 %v4732_v42, 0.0 }
 0x3d9   : > { %v3790_v31 = vpack.c.bf16 %v3764_v33, %v3762_v58 }
 0x3da   : > { %v3791_v13 = vpack.c.bf16 %v3765_v35, %v3763_v57  ;;  %v3705_v59 = vpop.f32.mrb[44].mxu0 }
 0x3db   : > { %v4733_v12 = vadd.f32 %v3705_v59, %v6563_v34  ;;  %v3707_v16 = vpop.f32.mrb[45].mxu0 }
 0x3dc   : > { %v4734_v39 = vadd.f32 %v3707_v16, %v6567_v30  ;;  %v3709_v40 = vpop.f32.mrb[46].mxu0  ;;  %3985 = vmatprep.mubr.bf16.mxu1 %v3791_v13 }
 0x3dd   : > { %v4735_v0 = vadd.f32 %v3709_v40, %v6563_v34  ;;  %v3711_v41 = vpop.f32.mrb[47].mxu0  ;;  %3986 = vmatmul.mubr.bf16.gmra.mrb[56].mxu1 %v3790_v31  ;;  %v3766_v43 = vmax.f32 %v4733_v12, 0.0 }
 0x3de   : > { %v4736_v1 = vadd.f32 %v3711_v41, %v6567_v30  ;;  %v3767_v24 = vmax.f32 %v4734_v39, 0.0  ;;  %v6626_v30 = vld [vmem:[#allocation13] ss:$0 sm:$0xff] }
 0x3df   : > { %v3768_v50 = vmax.f32 %v4735_v0, 0.0 }
 0x3e0   : > { %v3769_v36 = vmax.f32 %v4736_v1, 0.0 }
 0x3e1   : > { %v3792_v45 = vpack.c.bf16 %v3768_v50, %v3766_v43 }
 0x3e2   : > { %v3793_v2 = vpack.c.bf16 %v3769_v36, %v3767_v24 }
 0x3e4   : > { %3993 = vmatprep.mubr.bf16.mxu1 %v3793_v2 }
 0x3e5   : > { %3994 = vmatmul.mubr.bf16.gmra.mrb[60].mxu1 %v3792_v45 }
 0x3e6   : > { %4001 = vmatprep.mubr.bf16.mxu1 %v6576_v46 }
 0x3ed   : > { %4002 = vmatmul.mubr.bf16.gmra.mrb[64].mxu1 %v6573_v48 }
 0x3ee   : > { %4009 = vmatprep.mubr.bf16.mxu1 %v6584_v7 }
 0x3f5   : > { %4010 = vmatmul.mubr.bf16.gmra.mrb[68].mxu1 %v6581_v62 }
 0x3f6   : > { %4017 = vmatprep.mubr.bf16.mxu1 %v6592_v44 }
 0x3fd   : > { %4018 = vmatmul.mubr.bf16.gmra.mrb[72].mxu1 %v6589_v27 }
 0x3fe   : > { %4025 = vmatprep.mubr.bf16.mxu1 %v6600_v38 }
 0x405   : > { %4026 = vmatmul.mubr.bf16.gmra.mrb[76].mxu1 %v6597_v52 }
 0x4a0   : > { %v4577_v34 = vpop.f32.mrb[48].mxu1 }
 0x4a1   : > { %v4578_v47 = vpop.f32.mrb[49].mxu1 }
 0x4a2   : > { %v4579_v46 = vadd.f32 %v4578_v47, %v4577_v34  ;;  %v4580_v49 = vpop.f32.mrb[50].mxu1 }
 0x4a3   : > { %v4581_v48 = vpop.f32.mrb[51].mxu1 }
 0x4a4   : > { %v3972_v7 = vadd.f32 %v4579_v46, %v6626_v30  ;;  %v4582_v3 = vadd.f32 %v4581_v48, %v4580_v49 }
 0x4a6   : > { %4034 = vst [vmem:[%s6629_s10] sm:$0xff] %v3972_v7  ;;  %v3975_v62 = vadd.f32 %v4582_v3, %v6626_v30 }
 0x4a8   : > { %4035 = vst [vmem:[%s6629_s10 + $0x8] sm:$0xff] %v3975_v62  ;;  %v4583_v27 = vpop.f32.mrb[52].mxu1 }
 0x4a9   : > { %v4584_v44 = vpop.f32.mrb[53].mxu1 }
 0x4aa   : > { %v4585_v52 = vadd.f32 %v4584_v44, %v4583_v27  ;;  %v4586_v38 = vpop.f32.mrb[54].mxu1 }
 0x4ab   : > { %v4587_v60 = vpop.f32.mrb[55].mxu1 }
 0x4ac   : > { %v3980_v53 = vadd.f32 %v4585_v52, %v6626_v30  ;;  %v4588_v55 = vadd.f32 %v4587_v60, %v4586_v38 }
 0x4ae   : > { %4036 = vst [vmem:[%s6629_s10 + $0x10] sm:$0xff] %v3980_v53  ;;  %v3983_v11 = vadd.f32 %v4588_v55, %v6626_v30 }
 0x4b0   : > { %4037 = vst [vmem:[%s6629_s10 + $0x18] sm:$0xff] %v3983_v11  ;;  %v4589_v61 = vpop.f32.mrb[56].mxu1 }
 0x4b1   : > { %v4590_v18 = vpop.f32.mrb[57].mxu1 }
 0x4b2   : > { %v4591_v14 = vadd.f32 %v4590_v18, %v4589_v61  ;;  %v4592_v19 = vpop.f32.mrb[58].mxu1 }
 0x4b3   : > { %v4593_v22 = vpop.f32.mrb[59].mxu1 }
 0x4b4   : > { %v3988_v15 = vadd.f32 %v4591_v14, %v6626_v30  ;;  %v4594_v51 = vadd.f32 %v4593_v22, %v4592_v19 }
 0x4b6   : > { %4038 = vst [vmem:[%s6629_s10 + $0x20] sm:$0xff] %v3988_v15  ;;  %v3991_v4 = vadd.f32 %v4594_v51, %v6626_v30 }
 0x4b8   : > { %4039 = vst [vmem:[%s6629_s10 + $0x28] sm:$0xff] %v3991_v4  ;;  %v4595_v5 = vpop.f32.mrb[60].mxu1 }
 0x4b9   : > { %v4596_v6 = vpop.f32.mrb[61].mxu1 }
 0x4ba   : > { %v4597_v8 = vadd.f32 %v4596_v6, %v4595_v5  ;;  %v4598_v9 = vpop.f32.mrb[62].mxu1 }
 0x4bb   : > { %v4599_v10 = vpop.f32.mrb[63].mxu1 }
 0x4bc   : > { %v3996_v20 = vadd.f32 %v4597_v8, %v6626_v30  ;;  %v4600_v21 = vadd.f32 %v4599_v10, %v4598_v9 }
 0x4be   : > { %4040 = vst [vmem:[%s6629_s10 + $0x30] sm:$0xff] %v3996_v20  ;;  %v3999_v17 = vadd.f32 %v4600_v21, %v6626_v30 }
 0x4c0   : > { %4041 = vst [vmem:[%s6629_s10 + $0x38] sm:$0xff] %v3999_v17  ;;  %v4601_v23 = vpop.f32.mrb[64].mxu1 }
 0x4c1   : > { %v4602_v25 = vpop.f32.mrb[65].mxu1 }
 0x4c2   : > { %v4603_v26 = vadd.f32 %v4602_v25, %v4601_v23  ;;  %v4604_v32 = vpop.f32.mrb[66].mxu1 }
 0x4c3   : > { %v4605_v37 = vpop.f32.mrb[67].mxu1 }
 0x4c4   : > { %v4004_v28 = vadd.f32 %v4603_v26, %v6626_v30  ;;  %v4606_v29 = vadd.f32 %v4605_v37, %v4604_v32 }
 0x4c6   : > { %4042 = vst [vmem:[%s6629_s10 + $0x40] sm:$0xff] %v4004_v28  ;;  %v4007_v56 = vadd.f32 %v4606_v29, %v6626_v30 }
 0x4c8   : > { %4043 = vst [vmem:[%s6629_s10 + $0x48] sm:$0xff] %v4007_v56  ;;  %v4607_v63 = vpop.f32.mrb[68].mxu1 }
 0x4c9   : > { %v4608_v54 = vpop.f32.mrb[69].mxu1 }
 0x4ca   : > { %v4609_v42 = vadd.f32 %v4608_v54, %v4607_v63  ;;  %v4610_v58 = vpop.f32.mrb[70].mxu1 }
 0x4cb   : > { %v4611_v33 = vpop.f32.mrb[71].mxu1 }
 0x4cc   : > { %v4012_v57 = vadd.f32 %v4609_v42, %v6626_v30  ;;  %v4612_v35 = vadd.f32 %v4611_v33, %v4610_v58 }
 0x4ce   : > { %4044 = vst [vmem:[%s6629_s10 + $0x50] sm:$0xff] %v4012_v57  ;;  %v4015_v31 = vadd.f32 %v4612_v35, %v6626_v30 }
 0x4d0   : > { %4045 = vst [vmem:[%s6629_s10 + $0x58] sm:$0xff] %v4015_v31  ;;  %v4613_v13 = vpop.f32.mrb[72].mxu1 }
 0x4d1   : > { %v4614_v59 = vpop.f32.mrb[73].mxu1 }
 0x4d2   : > { %v4615_v12 = vadd.f32 %v4614_v59, %v4613_v13  ;;  %v4616_v16 = vpop.f32.mrb[74].mxu1 }
 0x4d3   : > { %v4617_v39 = vpop.f32.mrb[75].mxu1 }
 0x4d4   : > { %v4020_v40 = vadd.f32 %v4615_v12, %v6626_v30  ;;  %v4618_v0 = vadd.f32 %v4617_v39, %v4616_v16 }
 0x4d6   : > { %4046 = vst [vmem:[%s6629_s10 + $0x60] sm:$0xff] %v4020_v40  ;;  %v4023_v41 = vadd.f32 %v4618_v0, %v6626_v30 }
 0x4d8   : > { %4047 = vst [vmem:[%s6629_s10 + $0x68] sm:$0xff] %v4023_v41  ;;  %v4619_v1 = vpop.f32.mrb[76].mxu1 }
 0x4d9   : > { %v4620_v43 = vpop.f32.mrb[77].mxu1 }
 0x4da   : > { %v4621_v50 = vadd.f32 %v4620_v43, %v4619_v1  ;;  %v4622_v24 = vpop.f32.mrb[78].mxu1 }
 0x4db   : > { %v4623_v36 = vpop.f32.mrb[79].mxu1 }
 0x4dc   : > { %v4028_v45 = vadd.f32 %v4621_v50, %v6626_v30  ;;  %v4624_v2 = vadd.f32 %v4623_v36, %v4622_v24 }
 0x4de   : > { %4048 = vst [vmem:[%s6629_s10 + $0x70] sm:$0xff] %v4028_v45  ;;  %v4031_v34 = vadd.f32 %v4624_v2, %v6626_v30 }
 0x4e0   : > { %4049 = vst [vmem:[%s6629_s10 + $0x78] sm:$0xff] %v4031_v34 }
 0x4e1   : > { %5800 = shalt.err (!%p5797_p7)
}
 0x4e2   : > { %s5801_s15 = scalar_lea.hbm %s6664_s9, 2048  ;;  %s5805_s8 = scalar_lea.hbm %s6719_s7, 6144 }
 0x4e3   : > { %p5802_p6 = scmp.ne.s32.totalorder %s6664_s9, %s5801_s15  ;;  %p5806_p3 = scmp.lt.u32.totalorder %s6664_s9, %s6719_s7 }
 0x4e4   : > { %p5807_p0 = scmp.lt.u32.totalorder %s5805_s8, %s5801_s15  ;;  %p5809_p5 = scmp.lt.u32.totalorder %s5801_s15, %s6664_s9 }
 0x4e5   : > { %p5803_p8 = pnand %p5802_p6, %p6741_p4 }
 0x4e6   : > { %p5808_p2 = por %p5807_p0, %p5806_p3 }
 0x4e7   : > { %p5804_p9 = pneg %p5803_p8 }
 0x4e8   : > { %p5810_p10 = por %p5809_p5, %p5808_p2 }
 0x4ea   : > { %p5811_p1 = pnand %p5810_p10, %p5804_p9 }
 0x4ec   : > { %5814 = shalt.err (!%p5811_p1)
}
 0x4ed   : > { %s5882_s18 = smov 128   ;;  %s5883_s19 = smov 8  }
 0x4ee   : > { %5003 = dma.vmem_to_hbm [thread:$0]  (%p6741_p4), %s6666_s16, 2048, %s6664_s9, %s4051_s30, %s5882_s18, %s5882_s18, %s5883_s19  }
 0x4ef PF: > { %p5045_p11 = scmp.ge.s32.totalorder %s5865_s27, 2  ;;  %s4079_s17 = sand.u32 1, %s5853_s24  }
 0x4f0   : > { %p6742_p12 = scmp.ne.s32.totalorder %s6732_s23, 0  ;;  %s4080_s28 = scalar_lea.sflag [#allocation4], %s4079_s17 }
 0x4f2   : > { %p5029_p13 = pnand %p5045_p11, %p6742_p12 }
 0x4f4   : > { %5848 = dma.done.wait (!%p5029_p13), %s4080_s28, 2048  }
 0x4f5   : > { %5850 = vsyncadd (!%p5029_p13), %s4080_s28, 4294965248  ;;  %p23_p7 = scmp.ge.s32.totalorder %s6097_s11, 5   ;;  %s6743_s24 = smov %s5857_s25 }
 0x4f6   : > { %s6744_s25 = smov %s5861_s26  ;;  %s6745_s26 = smov %s6108_s21 }
 0x4f7   : > { %s6746_s27 = smov %s6097_s11  ;;  %25 = sbr.rel (!%p23_p7) target bundleno = 10 (0xa), region = 117 }
 0x4fe   :  { %4085 = vsyncpa [#allocation3], 1 }
 0x4ff   :  { %4087 = vsyncpa [#allocation3 + $0x1], 1 }
 0x500   :  { %4088 = vsyncpa [#allocation6], 1 }
 0x501   :  { %4089 = vsyncpa [#allocation9], 1 }
 0x502   :  { %4090 = vsyncpa [#allocation12], 1 }
 0x503   :  { %4091 = vsyncpa [#allocation4], 1 }
 0x504   :  { %4093 = vsyncpa [#allocation4 + $0x1], 1 }

// kernel: tpu_custom_call.1
= control target key start
LH: loop header
LB: loop body
LE: loop exit
PB: predicated region body
PF: predicated region fallthrough
CT: control target
= control target key end

     0   :  { %s6712_s0 = inlined_call_operand.hbm [shape: f32[384,1024], index: 0, kind: input, shape index: {}]   ;;  %s6713_s1 = inlined_call_operand.hbm [shape: bf16[1024,512], index: 1, kind: input, shape index: {}]   ;;  %s6714_s2 = inlined_call_operand.hbm [shape: f32[1,512], index: 2, kind: input, shape index: {}]   ;;  %s6715_s3 = inlined_call_operand.hbm [shape: bf16[512,256], index: 3, kind: input, shape index: {}]   ;;  %s6716_s4 = inlined_call_operand.hbm [shape: f32[1,256], index: 4, kind: input, shape index: {}]   ;;  %s6717_s5 = inlined_call_operand.hbm [shape: bf16[256,128], index: 5, kind: input, shape index: {}]   ;;  %s6718_s6 = inlined_call_operand.hbm [shape: f32[1,128], index: 6, kind: input, shape index: {}]   ;;  %s6719_s7 = inlined_call_operand.hbm [shape: f32[384,128], index: 7, kind: output, shape index: {}]  }
   0x1   :  { %6723 = sst [smem:[#allocation20_spill]] %s6713_s1 }
   0x2   :  { %12 = vsyncpa [#allocation3], 0 }
   0x3   :  { %14 = vsyncpa [#allocation3 + $0x1], 0 }
   0x4   :  { %15 = vsyncpa [#allocation6], 0 }
   0x5   :  { %16 = vsyncpa [#allocation9], 0 }
   0x6   :  { %17 = vsyncpa [#allocation12], 0 }
   0x7   :  { %18 = vsyncpa [#allocation4], 0 }
   0x8   :  { %20 = vsyncpa [#allocation4 + $0x1], 0  ;;  %s5924_s24 = smov 0   ;;  %s5926_s25 = smov 0  }
   0x9   :  { %s5928_s26 = smov 0   ;;  %s5930_s27 = smov 0  }
   0xa LB: > { %s5867_s28 = smov [#allocation5]   ;;  %s5945_s30 = sadd.s32 4294967295, %s5865_s27   ;;  %s5865_s27 = sphi %s5930_s27, %s6746_s27   ;;  %s5861_s26 = sphi %s5928_s26, %s6745_s26   ;;  %s5857_s25 = sphi %s5926_s25, %s6744_s25   ;;  %s5853_s24 = sphi %s5924_s24, %s6743_s24  }
   0xb   : > { %s221_s29 = sshll.u32 %s5867_s28, 4  ;;  %p4195_p0 = scmp.ge.s32.totalorder %s5865_s27, 1  ;;  %s5950_s29 = int_to_ptr.vmem [resolvable:$true] %s221_s29 }
   0xc   : > { %p6720_p1 = scmp.eq.s32.totalorder %s5945_s30, 0  ;;  %p209_p2 = scmp.lt.s32.totalorder %s5865_s27, 4 }
   0xd   : > { %s5868_s9 = smov [#allocation8]   ;;  %s5869_s12 = smov [#allocation11]  }
   0xe   : > { %p5952_p3 = pnand %p4195_p0, %p209_p2  ;;  %s245_s10 = sshll.u32 %s5868_s9, 4  ;;  %s5964_s10 = int_to_ptr.vmem [resolvable:$true] %s245_s10 }
   0xf   : > { %s5966_s13 = sshll.u32 %s5869_s12, 4  ;;  %s6726_s1 = sld [smem:[#allocation20_spill]]  ;;  %s270_s13 = int_to_ptr.vmem [resolvable:$true] %s5966_s13 }
  0x10   : > { %s6724_s8 = scalar_select %p5952_p3, 1, 0 }
  0x11   : > { %p5005_p4 = pneg %p5952_p3 }
  0x13   : > { %p5960_p5 = pnand %p5005_p4, %p6720_p1 }
  0x15   : > { %s5589_s16 = scalar_lea.hbm %s6726_s1, 32768  ;;  %p5976_p7 = pneg %p5960_p5 }
  0x16   : > { %p5590_p6 = scmp.ne.s32.totalorder %s6726_s1, %s5589_s16  ;;  %p5596_p10 = scmp.lt.u32.totalorder %s5589_s16, %s6726_s1 }
  0x18   : > { %p5592_p8 = pnand %p5976_p7, %p5590_p6 }
  0x1a   : > { %p5593_p9 = pneg %p5592_p8 }
  0x1c   : > { %p5598_p11 = pnand %p5596_p10, %p5593_p9 }
  0x1e   : > { %5601 = shalt.err (!%p5598_p11)
}
  0x1f   : > { %s5602_s22 = scalar_lea.vmem %s5950_s29, 32768  ;;  %p5610_p2 = scmp.lt.s32.totalorder %s5950_s29, %s5950_s29 }
  0x20   : > { %p5603_p12 = scmp.ne.s32.totalorder %s5950_s29, %s5602_s22  ;;  %p5611_p4 = scmp.lt.s32.totalorder %s5602_s22, %s5602_s22 }
  0x22   : > { %p5605_p13 = pnand %p5603_p12, %p5976_p7  ;;  %p5612_p6 = por %p5611_p4, %p5610_p2 }
  0x24   : > { %p5606_p0 = pneg %p5605_p13 }
  0x26   : > { %p5613_p8 = pnand %p5612_p6, %p5606_p0 }
  0x28   : > { %5616 = shalt.err (!%p5613_p8)
}
  0x29   : > { %s5870_s23 = smov 256   ;;  %s5871_s28 = smov 16  }
  0x2a   : > { %5008 = dma.hbm_to_vmem [thread:$0]  (!%p5960_p5), %s6726_s1, 32768, %s5950_s29, [#allocation6], %s5870_s23, %s5870_s23, %s5871_s28  }
  0x2b   : > { %s5617_s16 = scalar_lea.hbm %s6715_s3, 8192 }
  0x2c   : > { %p5618_p9 = scmp.ne.s32.totalorder %s6715_s3, %s5617_s16  ;;  %p5624_p12 = scmp.lt.u32.totalorder %s5617_s16, %s6715_s3 }
  0x2e   : > { %p5620_p10 = pnand %p5618_p9, %p5976_p7 }
  0x30   : > { %p5621_p11 = pneg %p5620_p10 }
  0x32   : > { %p5626_p13 = pnand %p5624_p12, %p5621_p11 }
  0x34   : > { %5629 = shalt.err (!%p5626_p13)
}
  0x35   : > { %s5630_s29 = scalar_lea.vmem %s5964_s10, 8192  ;;  %p5638_p6 = scmp.lt.s32.totalorder %s5964_s10, %s5964_s10 }
  0x36   : > { %p5631_p0 = scmp.ne.s32.totalorder %s5964_s10, %s5630_s29  ;;  %p5639_p8 = scmp.lt.s32.totalorder %s5630_s29, %s5630_s29 }
  0x38   : > { %p5633_p2 = pnand %p5631_p0, %p5976_p7  ;;  %p5640_p9 = por %p5639_p8, %p5638_p6 }
  0x3a   : > { %p5634_p4 = pneg %p5633_p2 }
  0x3c   : > { %p5641_p10 = pnand %p5640_p9, %p5634_p4 }
  0x3e   : > { %5644 = shalt.err (!%p5641_p10)
}
  0x3f   : > { %s5872_s22 = smov 128   ;;  %s5873_s23 = smov 8  }
  0x40   : > { %5014 = dma.hbm_to_vmem [thread:$0]  (!%p5960_p5), %s6715_s3, 8192, %s5964_s10, [#allocation9], %s5872_s22, %s5872_s22, %s5873_s23  }
  0x41   : > { %s5645_s15 = scalar_lea.hbm %s6717_s5, 2048 }
  0x42   : > { %p5646_p11 = scmp.ne.s32.totalorder %s6717_s5, %s5645_s15  ;;  %p5652_p0 = scmp.lt.u32.totalorder %s5645_s15, %s6717_s5 }
  0x44   : > { %p5648_p12 = pnand %p5646_p11, %p5976_p7 }
  0x46   : > { %p5649_p13 = pneg %p5648_p12 }
  0x48   : > { %p5654_p2 = pnand %p5652_p0, %p5649_p13 }
  0x4a   : > { %5657 = shalt.err (!%p5654_p2)
}
  0x4b   : > { %s5658_s21 = scalar_lea.vmem %s270_s13, 2048  ;;  %p5666_p9 = scmp.lt.s32.totalorder %s270_s13, %s270_s13 }
  0x4c   : > { %p5659_p4 = scmp.ne.s32.totalorder %s270_s13, %s5658_s21  ;;  %p5667_p10 = scmp.lt.s32.totalorder %s5658_s21, %s5658_s21 }
  0x4e   : > { %p5661_p6 = pnand %p5659_p4, %p5976_p7  ;;  %p5668_p1 = por %p5667_p10, %p5666_p9 }
  0x50   : > { %p5662_p8 = pneg %p5661_p6 }
  0x52   : > { %p5669_p3 = pnand %p5668_p1, %p5662_p8 }
  0x54   : > { %5672 = shalt.err (!%p5669_p3)
}
  0x55   : > { %s5874_s10 = smov 64   ;;  %s5875_s29 = smov 4  }
  0x56   : > { %5020 = dma.hbm_to_vmem [thread:$0]  (!%p5960_p5), %s6717_s5, 2048, %s270_s13, [#allocation12], %s5874_s10, %s5874_s10, %s5875_s29  }
  0x57   : > { %s5876_s28 = smov [#allocation7]   ;;  %s5877_s12 = smov [#allocation10]  }
  0x58   : > { %s235_s9 = sshll.u32 %s5876_s28, 4  ;;  %s259_s14 = sshll.u32 %s5877_s12, 4  ;;  %s236_s9 = int_to_ptr.vmem [resolvable:$true] %s235_s9  ;;  %s260_s14 = int_to_ptr.vmem [resolvable:$true] %s259_s14 }
  0x59   : > { %s5673_s17 = scalar_lea.hbm %s6714_s2, 64 }
  0x5a   : > { %p5674_p1 = scmp.ne.s32.totalorder %s6714_s2, %s5673_s17  ;;  %p5680_p12 = scmp.lt.u32.totalorder %s5673_s17, %s6714_s2 }
  0x5c   : > { %p5676_p3 = pnand %p5674_p1, %p5976_p7 }
  0x5e   : > { %p5677_p11 = pneg %p5676_p3 }
  0x60   : > { %p5682_p13 = pnand %p5680_p12, %p5677_p11 }
  0x62   : > { %5685 = shalt.err (!%p5682_p13)
}
  0x63   : > { %s5686_s13 = scalar_lea.vmem %s236_s9, 64  ;;  %p5694_p6 = scmp.lt.s32.totalorder %s236_s9, %s236_s9 }
  0x64   : > { %p5687_p0 = scmp.ne.s32.totalorder %s236_s9, %s5686_s13  ;;  %p5695_p8 = scmp.lt.s32.totalorder %s5686_s13, %s5686_s13 }
  0x66   : > { %p5689_p2 = pnand %p5687_p0, %p5976_p7  ;;  %p5696_p9 = por %p5695_p8, %p5694_p6 }
  0x68   : > { %p5690_p4 = pneg %p5689_p2 }
  0x6a   : > { %p5697_p10 = pnand %p5696_p9, %p5690_p4 }
  0x6c   : > { %5700 = shalt.err (!%p5697_p10)
}
  0x6d   : > { %5011 = dma.hbm_to_vmem [thread:$0]  (!%p5960_p5), %s6714_s2, 64, %s236_s9, [#allocation6]  }
  0x6e   : > { %s5701_s28 = scalar_lea.hbm %s6716_s4, 32 }
  0x6f   : > { %p5702_p1 = scmp.ne.s32.totalorder %s6716_s4, %s5701_s28  ;;  %p5708_p12 = scmp.lt.u32.totalorder %s5701_s28, %s6716_s4 }
  0x71   : > { %p5704_p3 = pnand %p5702_p1, %p5976_p7 }
  0x73   : > { %p5705_p11 = pneg %p5704_p3 }
  0x75   : > { %p5710_p13 = pnand %p5708_p12, %p5705_p11 }
  0x77   : > { %5713 = shalt.err (!%p5710_p13)
}
  0x78   : > { %s5714_s18 = scalar_lea.vmem %s260_s14, 32  ;;  %p5722_p6 = scmp.lt.s32.totalorder %s260_s14, %s260_s14 }
  0x79   : > { %p5715_p0 = scmp.ne.s32.totalorder %s260_s14, %s5714_s18  ;;  %p5723_p8 = scmp.lt.s32.totalorder %s5714_s18, %s5714_s18 }
  0x7b   : > { %p5717_p2 = pnand %p5715_p0, %p5976_p7  ;;  %p5724_p9 = por %p5723_p8, %p5722_p6 }
  0x7d   : > { %p5718_p4 = pneg %p5717_p2 }
  0x7f   : > { %p5725_p10 = pnand %p5724_p9, %p5718_p4 }
  0x81   : > { %5728 = shalt.err (!%p5725_p10)
}
  0x82   : > { %5017 = dma.hbm_to_vmem [thread:$0]  (!%p5960_p5), %s6716_s4, 32, %s260_s14, [#allocation9]  }
  0x83   : > { %s5878_s21 = smov [#allocation13]   ;;  %s5729_s1 = scalar_lea.hbm %s6718_s6, 16 }
  0x84   : > { %s283_s13 = sshll.u32 %s5878_s21, 4  ;;  %p5730_p1 = scmp.ne.s32.totalorder %s6718_s6, %s5729_s1  ;;  %s284_s13 = int_to_ptr.vmem [resolvable:$true] %s283_s13 }
  0x85   : > { %p5736_p12 = scmp.lt.u32.totalorder %s5729_s1, %s6718_s6 }
  0x86   : > { %p5732_p3 = pnand %p5730_p1, %p5976_p7 }
  0x88   : > { %p5733_p11 = pneg %p5732_p3 }
  0x8a   : > { %p5738_p13 = pnand %p5736_p12, %p5733_p11 }
  0x8c   : > { %5741 = shalt.err (!%p5738_p13)
}
  0x8d   : > { %s5742_s14 = scalar_lea.vmem %s284_s13, 16  ;;  %s5749_s16 = scalar_lea.vmem %s284_s13, 32 }
  0x8e   : > { %p5743_p0 = scmp.ne.s32.totalorder %s284_s13, %s5742_s14  ;;  %p5750_p6 = scmp.lt.s32.totalorder %s284_s13, %s284_s13 }
  0x8f   : > { %p5751_p8 = scmp.lt.s32.totalorder %s5749_s16, %s5742_s14 }
  0x90   : > { %p5745_p2 = pnand %p5743_p0, %p5976_p7 }
  0x91   : > { %p5752_p9 = por %p5751_p8, %p5750_p6 }
  0x92   : > { %p5746_p4 = pneg %p5745_p2 }
  0x94   : > { %p5753_p10 = pnand %p5752_p9, %p5746_p4 }
  0x96   : > { %5756 = shalt.err (!%p5753_p10)
}
  0x97   : > { %5023 = dma.hbm_to_vmem [thread:$0]  (!%p5960_p5), %s6718_s6, 16, %s284_s13, [#allocation12]  }
  0x98   : > { %s4194_s19 = sadd.s32 4294967294, %s5865_s27   ;;  %s6097_s11 = sadd.s32 1, %s5865_s27  }
  0x99   : > { %s30_s9 = ssub.s32 %s5865_s27, %s6097_s11  ;;  %s33_s20 = sadd.s32 1, %s5861_s26 }
  0x9a   : > { %p31_p7 = scmp.eq.s32.totalorder %s30_s9, 0  ;;  %p40_p1 = scmp.ne.s32.totalorder %s5861_s26, %s5857_s25 }
  0x9b   : > { %p41_p3 = scmp.eq.s32.totalorder %s5865_s27, 0  ;;  %p46_p11 = scmp.ne.s32.totalorder %s5857_s25, %s5853_s24 }
  0x9c   : > { %s6108_s21 = scalar_select %p31_p7, %s5861_s26, %s33_s20  }
  0x9d   : > { %p6110_p12 = por %p41_p3, %p40_p1  ;;  %p6729_p13 = scmp.eq.s32.totalorder %s5945_s30, 0 }
  0x9e   : > { %p196_p0 = scmp.eq.s32.totalorder %s5945_s30, 2  ;;  %p202_p2 = scmp.eq.s32.totalorder %s4194_s19, 2 }
  0x9f   : > { %p6116_p5 = por %p6729_p13, %p46_p11  ;;  %p5038_p4 = scmp.lt.s32.totalorder %s5865_s27, 3 }
  0xa0   : > { %s294_s22 = sand.u32 1, %s5861_s26   ;;  %p6123_p6 = por %p196_p0, %p40_p1 }
  0xa1   : > { %p6127_p8 = por %p202_p2, %p46_p11  ;;  %s4203_s28 = sshll.u32 %s294_s22, 10 }
  0xa2   : > { %s6731_s1 = scalar_select %p6123_p6, 1, 0 }
  0xa3   : > { %s6732_s23 = scalar_select %p6127_p8, 1, 0 }
  0xa4   : > { %s4559_s12 = sshll.u32 %s5865_s27, 14  ;;  %s298_s17 = scalar_lea.vmem [#allocation2], %s4203_s28 }
  0xa5   : > { %s6135_s16 = scalar_lea.hbm %s6712_s0, %s4559_s12  ;;  %s306_s18 = sshll.u32 %s298_s17, 4  ;;  %s6137_s18 = int_to_ptr.vmem [resolvable:$true] %s306_s18 }
  0xa6   : > { %p6141_p9 = pnand %p5038_p4, %p6110_p12  ;;  %s6145_s9 = scalar_lea.sflag [#allocation3], %s294_s22 }
  0xa7   : > { %s5757_s20 = scalar_lea.hbm %s6135_s16, 16384  ;;  %s5762_s29 = scalar_lea.hbm %s6712_s0, 49152 }
  0xa8   : > { %p5758_p10 = scmp.ne.s32.totalorder %s6135_s16, %s5757_s20  ;;  %p5759_p7 = pneg %p6141_p9 }
  0xa9   : > { %p5763_p11 = scmp.lt.u32.totalorder %s6135_s16, %s6712_s0  ;;  %p5764_p12 = scmp.lt.u32.totalorder %s5762_s29, %s5757_s20 }
  0xaa   : > { %p5760_p1 = pnand %p5759_p7, %p5758_p10  ;;  %p5766_p0 = scmp.lt.u32.totalorder %s5757_s20, %s6135_s16 }
  0xab   : > { %p5765_p13 = por %p5764_p12, %p5763_p11 }
  0xac   : > { %p5761_p3 = pneg %p5760_p1 }
  0xad   : > { %p5767_p2 = por %p5766_p0, %p5765_p13 }
  0xaf   : > { %p5768_p4 = pnand %p5767_p2, %p5761_p3 }
  0xb1   : > { %5771 = shalt.err (!%p5768_p4)
}
  0xb2   : > { %s5772_s22 = scalar_lea.vmem %s6137_s18, 16384  ;;  %s5879_s17 = smov [#allocation2]  }
  0xb3   : > { %p5773_p10 = scmp.ne.s32.totalorder %s6137_s18, %s5772_s22  ;;  %s5777_s28 = sshll.u32 %s5879_s17, 4  ;;  %s5778_s28 = int_to_ptr.vmem [resolvable:$false] %s5777_s28 }
  0xb4   : > { %s5779_s12 = scalar_lea.vmem %s5778_s28, 32768  ;;  %p5780_p6 = scmp.lt.s32.totalorder %s6137_s18, %s5778_s28 }
  0xb5   : > { %p5775_p1 = pnand %p5773_p10, %p5759_p7  ;;  %p5781_p11 = scmp.lt.s32.totalorder %s5779_s12, %s5772_s22 }
  0xb7   : > { %p5776_p8 = pneg %p5775_p1  ;;  %p5782_p12 = por %p5781_p11, %p5780_p6 }
  0xb9   : > { %p5783_p13 = pnand %p5782_p12, %p5776_p8 }
  0xbb   : > { %5786 = shalt.err (!%p5783_p13)
}
  0xbc   : > { %s5880_s20 = smov 1024   ;;  %p6734_p7 = scmp.ne.s32.totalorder %s6724_s8, 0 }
  0xbd   : > { %5027 = dma.hbm_to_vmem [thread:$0]  (!%p6141_p9), %s6135_s16, 16384, %s6137_s18, %s6145_s9, %s5880_s20, %s5880_s20, %s5874_s10  }
  0xbe   : > { %318 = sbr.rel (%p6734_p7) target bundleno = 1263 (0x4ef), region = 48  ;;  %s6177_s29 = sand.u32 (!%p6734_p7), 1, %s5857_s25  }
  0xbf   : > { %s4208_s15 = sshll.u32 (!%p6734_p7), %s6177_s29, 10  ;;  %s321_s14 = scalar_lea.sflag (!%p6734_p7), [#allocation3], %s6177_s29 }
  0xc0   : > { %s6181_s22 = scalar_lea.vmem (!%p6734_p7), [#allocation2], %s4208_s15 }
  0xc5   : > { %5832 = dma.done.wait (%p6116_p5), %s321_s14, 16384  }
  0xc6   : > { %5834 = vsyncadd (%p6116_p5), %s321_s14, 4294950912  ;;  %p6735_p6 = scmp.eq.s32.totalorder %s5945_s30, 0 }
  0xc8   : > { %5836 = dma.done.wait (%p6735_p6), [#allocation6], 32832   ;;  %p6736_p8 = pmov %p6735_p6 }
  0xc9   : > { %p6737_p9 = pmov %p6735_p6 }
  0xca   : > { %5838 = vsyncadd (%p6736_p8), [#allocation6], 4294934464 }
  0xcb   : > { %5840 = dma.done.wait (%p6737_p9), [#allocation9], 8224   ;;  %p6738_p3 = pmov %p6735_p6 }
  0xcd   : > { %5842 = vsyncadd (%p6738_p3), [#allocation9], 4294959072  ;;  %p6739_p0 = pmov %p6738_p3 }
  0xcf   : > { %5844 = dma.done.wait (%p6739_p0), [#allocation12], 2064   ;;  %p6740_p2 = pmov %p6739_p0 }
  0xd0   : > { %v5093_v0 = vld [vmem:[#allocation5 + $0x4] ss:$16 sps:$4 sm:$0xff]   ;;  %v5095_v1 = vld [vmem:[#allocation5 + $0xc] ss:$16 sps:$4 sm:$0xff]   ;;  %v5097_v2 = vld [vmem:[#allocation5] ss:$16 sps:$4 sm:$0xff]  }
  0xd1   : > { %5846 = vsyncadd (%p6740_p2), [#allocation12], 4294965232  ;;  %2132 = vmatprep.subr.bf16.mxu0 %v5093_v0  ;;  %v5098_v3 = vld [vmem:[#allocation5 + $0x8] ss:$16 sps:$4 sm:$0xff]   ;;  %2584 = vmatprep.subr.bf16.mxu1 %v5095_v1  ;;  %v5099_v4 = vld [vmem:[#allocation5 + $0x24] ss:$16 sps:$4 sm:$0xff]  }
  0xd2   : > { %2133 = vmatpush1.bf16.msra.mxu0 %v5097_v2  ;;  %2585 = vmatpush1.bf16.msra.mxu1 %v5098_v3  ;;  %v5101_v5 = vld [vmem:[#allocation5 + $0x2c] ss:$16 sps:$4 sm:$0xff]   ;;  %v5103_v6 = vld [vmem:[#allocation5 + $0x20] ss:$16 sps:$4 sm:$0xff]   ;;  %v5104_v7 = vld [vmem:[#allocation5 + $0x28] ss:$16 sps:$4 sm:$0xff]  }
  0xd3   : > { %2134 = vmatprep.subr.bf16.mxu0 %v5099_v4  ;;  %2586 = vmatprep.subr.bf16.mxu1 %v5101_v5  ;;  %v5105_v8 = vld [vmem:[#allocation5 + $0x44] ss:$16 sps:$4 sm:$0xff]   ;;  %v5107_v9 = vld [vmem:[#allocation5 + $0x4c] ss:$16 sps:$4 sm:$0xff]   ;;  %v5109_v10 = vld [vmem:[#allocation5 + $0x40] ss:$16 sps:$4 sm:$0xff]  }
  0xd4   : > { %v5110_v11 = vld [vmem:[#allocation5 + $0x48] ss:$16 sps:$4 sm:$0xff]   ;;  %v5111_v12 = vld [vmem:[#allocation5 + $0x64] ss:$16 sps:$4 sm:$0xff]   ;;  %v5113_v13 = vld [vmem:[#allocation5 + $0x6c] ss:$16 sps:$4 sm:$0xff]  }
  0xd5   : > { %v5115_v14 = vld [vmem:[#allocation5 + $0x60] ss:$16 sps:$4 sm:$0xff]   ;;  %v5116_v15 = vld [vmem:[#allocation5 + $0x68] ss:$16 sps:$4 sm:$0xff]   ;;  %v5117_v16 = vld [vmem:[#allocation5 + $0x84] ss:$16 sps:$4 sm:$0xff]  }
  0xd6   : > { %2135 = vmatpush1.bf16.msra.mxu0 %v5103_v6  ;;  %2587 = vmatpush1.bf16.msra.mxu1 %v5104_v7  ;;  %v5119_v17 = vld [vmem:[#allocation5 + $0x8c] ss:$16 sps:$4 sm:$0xff]   ;;  %v5121_v18 = vld [vmem:[#allocation5 + $0x80] ss:$16 sps:$4 sm:$0xff]   ;;  %v5122_v19 = vld [vmem:[#allocation5 + $0x88] ss:$16 sps:$4 sm:$0xff]  }
  0xd7   : > { %2136 = vmatprep.subr.bf16.mxu0 %v5105_v8  ;;  %2588 = vmatprep.subr.bf16.mxu1 %v5107_v9  ;;  %v5123_v20 = vld [vmem:[#allocation5 + $0xa4] ss:$16 sps:$4 sm:$0xff]   ;;  %v5125_v21 = vld [vmem:[#allocation5 + $0xac] ss:$16 sps:$4 sm:$0xff]   ;;  %v5127_v22 = vld [vmem:[#allocation5 + $0xa0] ss:$16 sps:$4 sm:$0xff]  }
  0xd8   : > { %v5128_v23 = vld [vmem:[#allocation5 + $0xa8] ss:$16 sps:$4 sm:$0xff]   ;;  %v5129_v24 = vld [vmem:[#allocation5 + $0xc4] ss:$16 sps:$4 sm:$0xff]   ;;  %v5131_v25 = vld [vmem:[#allocation5 + $0xcc] ss:$16 sps:$4 sm:$0xff]  }
  0xd9   : > { %v5133_v26 = vld [vmem:[#allocation5 + $0xc0] ss:$16 sps:$4 sm:$0xff]   ;;  %v5134_v27 = vld [vmem:[#allocation5 + $0xc8] ss:$16 sps:$4 sm:$0xff]   ;;  %v5135_v28 = vld [vmem:[#allocation5 + $0xe4] ss:$16 sps:$4 sm:$0xff]  }
  0xda   : > { %2137 = vmatpush1.bf16.msra.mxu0 %v5109_v10  ;;  %2589 = vmatpush1.bf16.msra.mxu1 %v5110_v11  ;;  %v5137_v29 = vld [vmem:[#allocation5 + $0xec] ss:$16 sps:$4 sm:$0xff]   ;;  %v5139_v30 = vld [vmem:[#allocation5 + $0xe0] ss:$16 sps:$4 sm:$0xff]   ;;  %v5140_v31 = vld [vmem:[#allocation5 + $0xe8] ss:$16 sps:$4 sm:$0xff]  }
  0xdb   : > { %2138 = vmatprep.subr.bf16.mxu0 %v5111_v12  ;;  %2590 = vmatprep.subr.bf16.mxu1 %v5113_v13  ;;  %v5141_v32 = vld [vmem:[#allocation5 + $0x104] ss:$16 sps:$4 sm:$0xff]   ;;  %v5143_v33 = vld [vmem:[#allocation5 + $0x10c] ss:$16 sps:$4 sm:$0xff]   ;;  %v5145_v34 = vld [vmem:[#allocation5 + $0x100] ss:$16 sps:$4 sm:$0xff]  }
  0xdc   : > { %v5146_v35 = vld [vmem:[#allocation5 + $0x108] ss:$16 sps:$4 sm:$0xff]   ;;  %v5147_v36 = vld [vmem:[#allocation5 + $0x124] ss:$16 sps:$4 sm:$0xff]   ;;  %v5149_v37 = vld [vmem:[#allocation5 + $0x12c] ss:$16 sps:$4 sm:$0xff]  }
  0xdd   : > { %v5151_v38 = vld [vmem:[#allocation5 + $0x120] ss:$16 sps:$4 sm:$0xff]   ;;  %v5152_v39 = vld [vmem:[#allocation5 + $0x128] ss:$16 sps:$4 sm:$0xff]   ;;  %v5153_v40 = vld [vmem:[#allocation5 + $0x144] ss:$16 sps:$4 sm:$0xff]  }
  0xde   : > { %2139 = vmatpush1.bf16.msra.mxu0 %v5115_v14  ;;  %2591 = vmatpush1.bf16.msra.mxu1 %v5116_v15  ;;  %v5155_v41 = vld [vmem:[#allocation5 + $0x14c] ss:$16 sps:$4 sm:$0xff]   ;;  %v5157_v42 = vld [vmem:[#allocation5 + $0x140] ss:$16 sps:$4 sm:$0xff]   ;;  %v5158_v43 = vld [vmem:[#allocation5 + $0x148] ss:$16 sps:$4 sm:$0xff]  }
  0xdf   : > { %2140 = vmatprep.subr.bf16.mxu0 %v5117_v16  ;;  %2592 = vmatprep.subr.bf16.mxu1 %v5119_v17  ;;  %v5159_v44 = vld [vmem:[#allocation5 + $0x164] ss:$16 sps:$4 sm:$0xff]   ;;  %v5161_v45 = vld [vmem:[#allocation5 + $0x16c] ss:$16 sps:$4 sm:$0xff]   ;;  %v5163_v47 = vld [vmem:[#allocation5 + $0x160] ss:$16 sps:$4 sm:$0xff]  }
  0xe0   : > { %v383_v46 = vld [vmem:[%s6181_s22 + $0x8] sm:$0xff]  ;;  %v5165_v50 = vld [vmem:[#allocation5 + $0x184] ss:$16 sps:$4 sm:$0xff]   ;;  %v5169_v53 = vld [vmem:[#allocation5 + $0x180] ss:$16 sps:$4 sm:$0xff]   ;;  %s4215_s8 = sshll.u32 %s6177_s29, 7 }
  0xe1   : > { %v5164_v48 = vld [vmem:[#allocation5 + $0x168] ss:$16 sps:$4 sm:$0xff]   ;;  %v5167_v52 = vld [vmem:[#allocation5 + $0x18c] ss:$16 sps:$4 sm:$0xff]   ;;  %v5171_v55 = vld [vmem:[#allocation5 + $0x1a4] ss:$16 sps:$4 sm:$0xff]  }
  0xe2   : > { %2141 = vmatpush1.bf16.msra.mxu0 %v5121_v18  ;;  %2593 = vmatpush1.bf16.msra.mxu1 %v5122_v19  ;;  %v391_v49 = vld [vmem:[%s6181_s22 + $0x48] sm:$0xff]  ;;  %v5175_v57 = vld [vmem:[#allocation5 + $0x1a0] ss:$16 sps:$4 sm:$0xff]   ;;  %v5177_v59 = vld [vmem:[#allocation5 + $0x1c4] ss:$16 sps:$4 sm:$0xff]   ;;  %s6629_s10 = scalar_lea.vmem [#allocation14], %s4215_s8 }
  0xe3   : > { %2142 = vmatprep.subr.bf16.mxu0 %v5123_v20  ;;  %2594 = vmatprep.subr.bf16.mxu1 %v5125_v21  ;;  %v511_v51 = vpack.c.bf16 %v391_v49, %v383_v46  ;;  %v5170_v54 = vld [vmem:[#allocation5 + $0x188] ss:$16 sps:$4 sm:$0xff]   ;;  %v5173_v56 = vld [vmem:[#allocation5 + $0x1ac] ss:$16 sps:$4 sm:$0xff]   ;;  %v5181_v61 = vld [vmem:[#allocation5 + $0x1c0] ss:$16 sps:$4 sm:$0xff]  }
  0xe4   : > { %v5176_v58 = vld [vmem:[#allocation5 + $0x1a8] ss:$16 sps:$4 sm:$0xff]   ;;  %v5179_v60 = vld [vmem:[#allocation5 + $0x1cc] ss:$16 sps:$4 sm:$0xff]   ;;  %v5183_v63 = vld [vmem:[#allocation5 + $0x1e4] ss:$16 sps:$4 sm:$0xff]  }
  0xe5   : > { %2164 = vmatprep.mubr.bf16.mxu0 %v511_v51  ;;  %2616 = vmatprep.mubr.bf16.mxu1 %v511_v51  ;;  %v5182_v62 = vld [vmem:[#allocation5 + $0x1c8] ss:$16 sps:$4 sm:$0xff]   ;;  %v5185_v0 = vld [vmem:[#allocation5 + $0x1ec] ss:$16 sps:$4 sm:$0xff]   ;;  %v5187_v1 = vld [vmem:[#allocation5 + $0x1e0] ss:$16 sps:$4 sm:$0xff]  }
  0xe6   : > { %2143 = vmatpush1.bf16.msra.mxu0 %v5127_v22  ;;  %2595 = vmatpush1.bf16.msra.mxu1 %v5128_v23  ;;  %v5188_v2 = vld [vmem:[#allocation5 + $0x1e8] ss:$16 sps:$4 sm:$0xff]   ;;  %v382_v3 = vld [vmem:[%s6181_s22] sm:$0xff]  ;;  %v5194_v6 = vld [vmem:[#allocation5 + $0x20c] ss:$16 sps:$4 sm:$0xff]   ;;  %s4560_s13 = sshll.u32 %s5945_s30, 11 }
  0xe7   : > { %2144 = vmatprep.subr.bf16.mxu0 %v5129_v24  ;;  %2596 = vmatprep.subr.bf16.mxu1 %v5131_v25  ;;  %v390_v4 = vld [vmem:[%s6181_s22 + $0x40] sm:$0xff]  ;;  %v5192_v9 = vld [vmem:[#allocation5 + $0x208] ss:$16 sps:$4 sm:$0xff]   ;;  %v5200_v13 = vld [vmem:[#allocation5 + $0x22c] ss:$16 sps:$4 sm:$0xff]   ;;  %s4064_s16 = sshll.u32 %s6629_s10, 4  ;;  %s6664_s9 = scalar_lea.hbm %s6719_s7, %s4560_s13  ;;  %s6666_s16 = int_to_ptr.vmem [resolvable:$true] %s4064_s16 }
  0xe8   : > { %v5191_v5 = vld [vmem:[#allocation5 + $0x204] ss:$16 sps:$4 sm:$0xff]   ;;  %v5189_v7 = vld [vmem:[#allocation5 + $0x200] ss:$16 sps:$4 sm:$0xff]   ;;  %v510_v8 = vpack.c.bf16 %v390_v4, %v382_v3  ;;  %v399_v10 = vld [vmem:[%s6181_s22 + $0x88] sm:$0xff]  ;;  %s4051_s30 = scalar_lea.sflag [#allocation4], %s6177_s29 }
  0xe9   : > { %v407_v11 = vld [vmem:[%s6181_s22 + $0xc8] sm:$0xff]  ;;  %v5197_v12 = vld [vmem:[#allocation5 + $0x224] ss:$16 sps:$4 sm:$0xff]   ;;  %v5195_v14 = vld [vmem:[#allocation5 + $0x220] ss:$16 sps:$4 sm:$0xff]   ;;  %s5787_s17 = scalar_lea.vmem %s6666_s16, 2048 }
  0xea   : > { %2145 = vmatpush1.bf16.msra.mxu0 %v5133_v26  ;;  %2597 = vmatpush1.bf16.msra.mxu1 %v5134_v27  ;;  %v519_v15 = vpack.c.bf16 %v407_v11, %v399_v10  ;;  %v5198_v16 = vld [vmem:[#allocation5 + $0x228] ss:$16 sps:$4 sm:$0xff]   ;;  %v398_v17 = vld [vmem:[%s6181_s22 + $0x80] sm:$0xff]  ;;  %v5206_v20 = vld [vmem:[#allocation5 + $0x24c] ss:$16 sps:$4 sm:$0xff]   ;;  %p5788_p5 = scmp.ne.s32.totalorder %s6666_s16, %s5787_s17  ;;  %p6741_p4 = scmp.ne.s32.totalorder %s6731_s1, 0 }
  0xeb   : > { %2146 = vmatprep.subr.bf16.mxu0 %v5135_v28  ;;  %2598 = vmatprep.subr.bf16.mxu1 %v5137_v29  ;;  %v406_v18 = vld [vmem:[%s6181_s22 + $0xc0] sm:$0xff]  ;;  %v5204_v22 = vld [vmem:[#allocation5 + $0x248] ss:$16 sps:$4 sm:$0xff]   ;;  %v5212_v27 = vld [vmem:[#allocation5 + $0x26c] ss:$16 sps:$4 sm:$0xff]   ;;  %s5881_s28 = smov [#allocation14]  }
  0xec   : > { %v5203_v19 = vld [vmem:[#allocation5 + $0x244] ss:$16 sps:$4 sm:$0xff]   ;;  %v5201_v21 = vld [vmem:[#allocation5 + $0x240] ss:$16 sps:$4 sm:$0xff]   ;;  %v518_v23 = vpack.c.bf16 %v406_v18, %v398_v17  ;;  %v415_v24 = vld [vmem:[%s6181_s22 + $0x108] sm:$0xff]  ;;  %p5789_p10 = pnand %p5788_p5, %p6741_p4  ;;  %s5791_s12 = sshll.u32 %s5881_s28, 4  ;;  %s5792_s12 = int_to_ptr.vmem [resolvable:$false] %s5791_s12 }
  0xed   : > { %v423_v25 = vld [vmem:[%s6181_s22 + $0x148] sm:$0xff]  ;;  %v5209_v26 = vld [vmem:[#allocation5 + $0x264] ss:$16 sps:$4 sm:$0xff]   ;;  %v5207_v29 = vld [vmem:[#allocation5 + $0x260] ss:$16 sps:$4 sm:$0xff]   ;;  %s5793_s20 = scalar_lea.vmem %s5792_s12, 4096  ;;  %p5794_p11 = scmp.lt.s32.totalorder %s6666_s16, %s5792_s12 }
  0xee   : > { %2147 = vmatpush1.bf16.msra.mxu0 %v5139_v30  ;;  %2599 = vmatpush1.bf16.msra.mxu1 %v5140_v31  ;;  %v527_v28 = vpack.c.bf16 %v423_v25, %v415_v24  ;;  %v5210_v30 = vld [vmem:[#allocation5 + $0x268] ss:$16 sps:$4 sm:$0xff]   ;;  %v414_v31 = vld [vmem:[%s6181_s22 + $0x100] sm:$0xff]  ;;  %p5790_p1 = pneg %p5789_p10  ;;  %p5795_p12 = scmp.lt.s32.totalorder %s5793_s20, %s5787_s17 }
  0xef   : > { %2148 = vmatprep.subr.bf16.mxu0 %v5141_v32  ;;  %2600 = vmatprep.subr.bf16.mxu1 %v5143_v33  ;;  %v422_v32 = vld [vmem:[%s6181_s22 + $0x140] sm:$0xff]  ;;  %v447_v51 = vld [vmem:[%s6181_s22 + $0x208] sm:$0xff] }
  0xf0   : > { %v5215_v33 = vld [vmem:[#allocation5 + $0x284] ss:$16 sps:$4 sm:$0xff]   ;;  %v5225_v49 = vld [vmem:[#allocation5 + $0x2c0] ss:$16 sps:$4 sm:$0xff]   ;;  %v5240_v3 = vld [vmem:[#allocation5 + $0x308] ss:$16 sps:$4 sm:$0xff]   ;;  %p5796_p13 = por %p5795_p12, %p5794_p11 }
  0xf1   : > { %v438_v46 = vld [vmem:[%s6181_s22 + $0x1c0] sm:$0xff]  ;;  %v487_v17 = vld [vmem:[%s6181_s22 + $0x348] sm:$0xff] }
  0xf2   : > { %2149 = vmatpush1.bf16.msra.mxu0 %v5145_v34  ;;  %2601 = vmatpush1.bf16.msra.mxu1 %v5146_v35  ;;  %v5218_v34 = vld [vmem:[#allocation5 + $0x28c] ss:$16 sps:$4 sm:$0xff]   ;;  %v5213_v35 = vld [vmem:[#allocation5 + $0x280] ss:$16 sps:$4 sm:$0xff]   ;;  %v5245_v4 = vld [vmem:[#allocation5 + $0x324] ss:$16 sps:$4 sm:$0xff]   ;;  %p5797_p7 = pnand %p5796_p13, %p5790_p1 }
  0xf3   : > { %2150 = vmatprep.subr.bf16.mxu0 %v5147_v36  ;;  %2602 = vmatprep.subr.bf16.mxu1 %v5149_v37  ;;  %v5216_v36 = vld [vmem:[#allocation5 + $0x288] ss:$16 sps:$4 sm:$0xff]   ;;  %v526_v37 = vpack.c.bf16 %v422_v32, %v414_v31  ;;  %v470_v10 = vld [vmem:[%s6181_s22 + $0x2c0] sm:$0xff] }
  0xf4   : > { %v5251_v11 = vld [vmem:[#allocation5 + $0x344] ss:$16 sps:$4 sm:$0xff]   ;;  %v503_v31 = vld [vmem:[%s6181_s22 + $0x3c8] sm:$0xff] }
  0xf5   : > { %v5257_v18 = vld [vmem:[#allocation5 + $0x364] ss:$16 sps:$4 sm:$0xff]  }
  0xf6   : > { %2151 = vmatpush1.bf16.msra.mxu0 %v5151_v38  ;;  %2603 = vmatpush1.bf16.msra.mxu1 %v5152_v39  ;;  %v431_v38 = vld [vmem:[%s6181_s22 + $0x188] sm:$0xff]  ;;  %v486_v24 = vld [vmem:[%s6181_s22 + $0x340] sm:$0xff] }
  0xf7   : > { %2152 = vmatprep.subr.bf16.mxu0 %v5153_v40  ;;  %2604 = vmatprep.subr.bf16.mxu1 %v5155_v41  ;;  %v439_v39 = vld [vmem:[%s6181_s22 + $0x1c8] sm:$0xff]  ;;  %v5221_v40 = vld [vmem:[#allocation5 + $0x2a4] ss:$16 sps:$4 sm:$0xff]  }
  0xf8   : > { %v5224_v41 = vld [vmem:[#allocation5 + $0x2ac] ss:$16 sps:$4 sm:$0xff]   ;;  %v5263_v25 = vld [vmem:[#allocation5 + $0x384] ss:$16 sps:$4 sm:$0xff]  }
  0xf9   : > { %v5269_v32 = vld [vmem:[#allocation5 + $0x3a4] ss:$16 sps:$4 sm:$0xff]  }
  0xfa   : > { %2153 = vmatpush1.bf16.msra.mxu0 %v5157_v42  ;;  %2605 = vmatpush1.bf16.msra.mxu1 %v5158_v43  ;;  %v5219_v42 = vld [vmem:[#allocation5 + $0x2a0] ss:$16 sps:$4 sm:$0xff]   ;;  %v535_v43 = vpack.c.bf16 %v439_v39, %v431_v38  ;;  %v5275_v39 = vld [vmem:[#allocation5 + $0x3c4] ss:$16 sps:$4 sm:$0xff]  }
  0xfb   : > { %2154 = vmatprep.subr.bf16.mxu0 %v5159_v44  ;;  %2606 = vmatprep.subr.bf16.mxu1 %v5161_v45  ;;  %v5222_v44 = vld [vmem:[#allocation5 + $0x2a8] ss:$16 sps:$4 sm:$0xff]   ;;  %v430_v45 = vld [vmem:[%s6181_s22 + $0x180] sm:$0xff] }
  0xfc   : > { %v502_v38 = vld [vmem:[%s6181_s22 + $0x3c0] sm:$0xff] }
  0xfe   : > { %2155 = vmatpush1.bf16.msra.mxu0 %v5163_v47  ;;  %2607 = vmatpush1.bf16.msra.mxu1 %v5164_v48  ;;  %v5227_v47 = vld [vmem:[#allocation5 + $0x2c4] ss:$16 sps:$4 sm:$0xff]   ;;  %v5230_v48 = vld [vmem:[#allocation5 + $0x2cc] ss:$16 sps:$4 sm:$0xff]  }
  0xff   : > { %2156 = vmatprep.subr.bf16.mxu0 %v5165_v50  ;;  %2608 = vmatprep.subr.bf16.mxu1 %v5167_v52  ;;  %v534_v50 = vpack.c.bf16 %v438_v46, %v430_v45  ;;  %v455_v52 = vld [vmem:[%s6181_s22 + $0x248] sm:$0xff]  ;;  %v393_v45 = vld [vmem:[%s6181_s22 + $0x58] sm:$0xff]  ;;  %v5281_v46 = vld [vmem:[#allocation5 + $0x3e4] ss:$16 sps:$4 sm:$0xff]  }
 0x102   : > { %2157 = vmatpush1.bf16.msra.mxu0 %v5169_v53  ;;  %2609 = vmatpush1.bf16.msra.mxu1 %v5170_v54  ;;  %v5228_v53 = vld [vmem:[#allocation5 + $0x2c8] ss:$16 sps:$4 sm:$0xff]   ;;  %v5233_v54 = vld [vmem:[#allocation5 + $0x2e4] ss:$16 sps:$4 sm:$0xff]  }
 0x103   : > { %2158 = vmatprep.subr.bf16.mxu0 %v5171_v55  ;;  %2610 = vmatprep.subr.bf16.mxu1 %v5173_v56  ;;  %v5236_v55 = vld [vmem:[#allocation5 + $0x2ec] ss:$16 sps:$4 sm:$0xff]   ;;  %v5231_v56 = vld [vmem:[#allocation5 + $0x2e0] ss:$16 sps:$4 sm:$0xff]  }
 0x106   : > { %2159 = vmatpush1.bf16.msra.mxu0 %v5175_v57  ;;  %2611 = vmatpush1.bf16.msra.mxu1 %v5176_v58  ;;  %v5234_v57 = vld [vmem:[#allocation5 + $0x2e8] ss:$16 sps:$4 sm:$0xff]   ;;  %v543_v58 = vpack.c.bf16 %v455_v52, %v447_v51  ;;  %v384_v51 = vld [vmem:[%s6181_s22 + $0x10] sm:$0xff] }
 0x107   : > { %2160 = vmatprep.subr.bf16.mxu0 %v5177_v59  ;;  %2612 = vmatprep.subr.bf16.mxu1 %v5179_v60  ;;  %v446_v59 = vld [vmem:[%s6181_s22 + $0x200] sm:$0xff]  ;;  %v392_v52 = vld [vmem:[%s6181_s22 + $0x50] sm:$0xff] }
 0x108   : > { %v454_v60 = vld [vmem:[%s6181_s22 + $0x240] sm:$0xff] }
 0x10a   : > { %2161 = vmatpush1.bf16.msra.mxu0 %v5181_v61  ;;  %2613 = vmatpush1.bf16.msra.mxu1 %v5182_v62  ;;  %v5239_v61 = vld [vmem:[#allocation5 + $0x304] ss:$16 sps:$4 sm:$0xff]   ;;  %v5242_v62 = vld [vmem:[#allocation5 + $0x30c] ss:$16 sps:$4 sm:$0xff]  }
 0x10b   : > { %2162 = vmatprep.subr.bf16.mxu0 %v5183_v63  ;;  %2614 = vmatprep.subr.bf16.mxu1 %v5185_v0  ;;  %v542_v63 = vpack.c.bf16 %v454_v60, %v446_v59  ;;  %v463_v0 = vld [vmem:[%s6181_s22 + $0x288] sm:$0xff]  ;;  %v5293_v60 = vld [vmem:[#allocation5 + $0x424] ss:$16 sps:$4 sm:$0xff]  }
 0x10c   : > { %v5288_v59 = vld [vmem:[#allocation5 + $0x408] ss:$16 sps:$4 sm:$0xff]  }
 0x10e   : > { %2163 = vmatpush1.bf16.msra.mxu0 %v5187_v1  ;;  %2615 = vmatpush1.bf16.msra.mxu1 %v5188_v2  ;;  %v471_v1 = vld [vmem:[%s6181_s22 + $0x2c8] sm:$0xff]  ;;  %v5237_v2 = vld [vmem:[#allocation5 + $0x300] ss:$16 sps:$4 sm:$0xff]  }
 0x10f   : > { %2245 = vmatprep.subr.bf16.mxu0 %v5191_v5  ;;  %2697 = vmatprep.subr.bf16.mxu1 %v5194_v6  ;;  %v5248_v5 = vld [vmem:[#allocation5 + $0x32c] ss:$16 sps:$4 sm:$0xff]   ;;  %v5243_v6 = vld [vmem:[#allocation5 + $0x320] ss:$16 sps:$4 sm:$0xff]  }
 0x111   : > { %2165 = vmatmul.mubr.bf16.vlgmr.msra.gmra.mrb[0].mxu0 %v510_v8  ;;  %2617 = vmatmul.mubr.bf16.vlgmr.msra.gmra.mrb[0].mxu1 %v510_v8  ;;  %v551_v8 = vpack.c.bf16 %v471_v1, %v463_v0  ;;  %v400_v1 = vld [vmem:[%s6181_s22 + $0x90] sm:$0xff] }
 0x112   : > { %2246 = vmatpush1.bf16.msra.mxu0 %v5189_v7  ;;  %2698 = vmatpush1.bf16.msra.mxu1 %v5192_v9  ;;  %v5246_v7 = vld [vmem:[#allocation5 + $0x328] ss:$16 sps:$4 sm:$0xff]   ;;  %v462_v9 = vld [vmem:[%s6181_s22 + $0x280] sm:$0xff] }
 0x113   : > { %2247 = vmatprep.subr.bf16.mxu0 %v5197_v12  ;;  %2699 = vmatprep.subr.bf16.mxu1 %v5200_v13  ;;  %v5254_v12 = vld [vmem:[#allocation5 + $0x34c] ss:$16 sps:$4 sm:$0xff]   ;;  %v5249_v13 = vld [vmem:[#allocation5 + $0x340] ss:$16 sps:$4 sm:$0xff]  }
 0x114   : > { %2174 = vmatprep.mubr.bf16.mxu0 %v519_v15  ;;  %2626 = vmatprep.mubr.bf16.mxu1 %v519_v15  ;;  %v5252_v15 = vld [vmem:[#allocation5 + $0x348] ss:$16 sps:$4 sm:$0xff]  }
 0x116   : > { %2248 = vmatpush1.bf16.msra.mxu0 %v5195_v14  ;;  %2700 = vmatpush1.bf16.msra.mxu1 %v5198_v16  ;;  %v550_v14 = vpack.c.bf16 %v470_v10, %v462_v9  ;;  %v479_v16 = vld [vmem:[%s6181_s22 + $0x308] sm:$0xff]  ;;  %v5305_v10 = vld [vmem:[#allocation5 + $0x464] ss:$16 sps:$4 sm:$0xff]  }
 0x117   : > { %2249 = vmatprep.subr.bf16.mxu0 %v5203_v19  ;;  %2701 = vmatprep.subr.bf16.mxu1 %v5206_v20  ;;  %v5260_v19 = vld [vmem:[#allocation5 + $0x36c] ss:$16 sps:$4 sm:$0xff]   ;;  %v5255_v20 = vld [vmem:[#allocation5 + $0x360] ss:$16 sps:$4 sm:$0xff]   ;;  %v5300_v9 = vld [vmem:[#allocation5 + $0x448] ss:$16 sps:$4 sm:$0xff]  }
 0x119   : > { %2175 = vmatmul.mubr.bf16.gmra.mrb[4].mxu0 %v518_v23  ;;  %2627 = vmatmul.mubr.bf16.gmra.mrb[4].mxu1 %v518_v23  ;;  %v478_v23 = vld [vmem:[%s6181_s22 + $0x300] sm:$0xff] }
 0x11a   : > { %2250 = vmatpush1.bf16.msra.mxu0 %v5201_v21  ;;  %2702 = vmatpush1.bf16.msra.mxu1 %v5204_v22  ;;  %v559_v21 = vpack.c.bf16 %v487_v17, %v479_v16  ;;  %v5258_v22 = vld [vmem:[#allocation5 + $0x368] ss:$16 sps:$4 sm:$0xff]   ;;  %v424_v16 = vld [vmem:[%s6181_s22 + $0x150] sm:$0xff] }
 0x11b   : > { %2251 = vmatprep.subr.bf16.mxu0 %v5209_v26  ;;  %2703 = vmatprep.subr.bf16.mxu1 %v5212_v27  ;;  %v5266_v26 = vld [vmem:[#allocation5 + $0x38c] ss:$16 sps:$4 sm:$0xff]   ;;  %v5261_v27 = vld [vmem:[#allocation5 + $0x380] ss:$16 sps:$4 sm:$0xff]   ;;  %v5311_v17 = vld [vmem:[#allocation5 + $0x484] ss:$16 sps:$4 sm:$0xff]  }
 0x11c   : > { %2184 = vmatprep.mubr.bf16.mxu0 %v527_v28  ;;  %2636 = vmatprep.mubr.bf16.mxu1 %v527_v28  ;;  %v5264_v28 = vld [vmem:[#allocation5 + $0x388] ss:$16 sps:$4 sm:$0xff]  }
 0x11e   : > { %2252 = vmatpush1.bf16.msra.mxu0 %v5207_v29  ;;  %2704 = vmatpush1.bf16.msra.mxu1 %v5210_v30  ;;  %v558_v29 = vpack.c.bf16 %v486_v24, %v478_v23  ;;  %v495_v30 = vld [vmem:[%s6181_s22 + $0x388] sm:$0xff]  ;;  %v441_v23 = vld [vmem:[%s6181_s22 + $0x1d8] sm:$0xff]  ;;  %v5317_v24 = vld [vmem:[#allocation5 + $0x4a4] ss:$16 sps:$4 sm:$0xff]  }
 0x11f   : > { %2253 = vmatprep.subr.bf16.mxu0 %v5215_v33  ;;  %2705 = vmatprep.subr.bf16.mxu1 %v5218_v34  ;;  %v5272_v33 = vld [vmem:[#allocation5 + $0x3ac] ss:$16 sps:$4 sm:$0xff]   ;;  %v567_v34 = vpack.c.bf16 %v503_v31, %v495_v30  ;;  %v440_v30 = vld [vmem:[%s6181_s22 + $0x1d0] sm:$0xff] }
 0x120   : > { %v5323_v31 = vld [vmem:[#allocation5 + $0x4c4] ss:$16 sps:$4 sm:$0xff]  }
 0x121   : > { %2185 = vmatmul.mubr.bf16.gmra.mrb[8].mxu0 %v526_v37  ;;  %2637 = vmatmul.mubr.bf16.gmra.mrb[8].mxu1 %v526_v37  ;;  %v494_v37 = vld [vmem:[%s6181_s22 + $0x380] sm:$0xff] }
 0x122   : > { %2254 = vmatpush1.bf16.msra.mxu0 %v5213_v35  ;;  %2706 = vmatpush1.bf16.msra.mxu1 %v5216_v36  ;;  %v5267_v35 = vld [vmem:[#allocation5 + $0x3a0] ss:$16 sps:$4 sm:$0xff]   ;;  %v5270_v36 = vld [vmem:[#allocation5 + $0x3a8] ss:$16 sps:$4 sm:$0xff]  }
 0x123   : > { %2255 = vmatprep.subr.bf16.mxu0 %v5221_v40  ;;  %2707 = vmatprep.subr.bf16.mxu1 %v5224_v41  ;;  %v5278_v40 = vld [vmem:[#allocation5 + $0x3cc] ss:$16 sps:$4 sm:$0xff]   ;;  %v5273_v41 = vld [vmem:[#allocation5 + $0x3c0] ss:$16 sps:$4 sm:$0xff]  }
 0x124   : > { %2194 = vmatprep.mubr.bf16.mxu0 %v535_v43  ;;  %2646 = vmatprep.mubr.bf16.mxu1 %v535_v43  ;;  %v566_v43 = vpack.c.bf16 %v502_v38, %v494_v37  ;;  %v457_v37 = vld [vmem:[%s6181_s22 + $0x258] sm:$0xff]  ;;  %v5329_v38 = vld [vmem:[#allocation5 + $0x4e4] ss:$16 sps:$4 sm:$0xff]  }
 0x126   : > { %2256 = vmatpush1.bf16.msra.mxu0 %v5219_v42  ;;  %2708 = vmatpush1.bf16.msra.mxu1 %v5222_v44  ;;  %v5276_v42 = vld [vmem:[#allocation5 + $0x3c8] ss:$16 sps:$4 sm:$0xff]  }
 0x127   : > { %2257 = vmatprep.subr.bf16.mxu0 %v5227_v47  ;;  %2709 = vmatprep.subr.bf16.mxu1 %v5230_v48  ;;  %v385_v44 = vld [vmem:[%s6181_s22 + $0x18] sm:$0xff]  ;;  %v5279_v48 = vld [vmem:[#allocation5 + $0x3e0] ss:$16 sps:$4 sm:$0xff]  }
 0x128   : > { %v5284_v47 = vld [vmem:[#allocation5 + $0x3ec] ss:$16 sps:$4 sm:$0xff]  }
 0x129   : > { %2195 = vmatmul.mubr.bf16.gmra.mrb[12].mxu0 %v534_v50  ;;  %2647 = vmatmul.mubr.bf16.gmra.mrb[12].mxu1 %v534_v50  ;;  %v5282_v50 = vld [vmem:[#allocation5 + $0x3e8] ss:$16 sps:$4 sm:$0xff]  }
 0x12a   : > { %2258 = vmatpush1.bf16.msra.mxu0 %v5225_v49  ;;  %2710 = vmatpush1.bf16.msra.mxu1 %v5228_v53  ;;  %v513_v49 = vpack.c.bf16 %v393_v45, %v385_v44  ;;  %v5287_v53 = vld [vmem:[#allocation5 + $0x404] ss:$16 sps:$4 sm:$0xff]  }
 0x12b   : > { %2259 = vmatprep.subr.bf16.mxu0 %v5233_v54  ;;  %2711 = vmatprep.subr.bf16.mxu1 %v5236_v55  ;;  %v5290_v54 = vld [vmem:[#allocation5 + $0x40c] ss:$16 sps:$4 sm:$0xff]   ;;  %v5285_v55 = vld [vmem:[#allocation5 + $0x400] ss:$16 sps:$4 sm:$0xff]   ;;  %v5335_v45 = vld [vmem:[#allocation5 + $0x504] ss:$16 sps:$4 sm:$0xff]  }
 0x12c   : > { %2204 = vmatprep.mubr.bf16.mxu0 %v543_v58  ;;  %2656 = vmatprep.mubr.bf16.mxu1 %v543_v58  ;;  %v409_v58 = vld [vmem:[%s6181_s22 + $0xd8] sm:$0xff]  ;;  %v456_v44 = vld [vmem:[%s6181_s22 + $0x250] sm:$0xff] }
 0x12e   : > { %2260 = vmatpush1.bf16.msra.mxu0 %v5231_v56  ;;  %2712 = vmatpush1.bf16.msra.mxu1 %v5234_v57  ;;  %v512_v56 = vpack.c.bf16 %v392_v52, %v384_v51  ;;  %v401_v57 = vld [vmem:[%s6181_s22 + $0x98] sm:$0xff]  ;;  %v5341_v52 = vld [vmem:[#allocation5 + $0x524] ss:$16 sps:$4 sm:$0xff]  }
 0x12f   : > { %2261 = vmatprep.subr.bf16.mxu0 %v5239_v61  ;;  %2713 = vmatprep.subr.bf16.mxu1 %v5242_v62  ;;  %v5296_v61 = vld [vmem:[#allocation5 + $0x42c] ss:$16 sps:$4 sm:$0xff]   ;;  %v5291_v62 = vld [vmem:[#allocation5 + $0x420] ss:$16 sps:$4 sm:$0xff]   ;;  %v521_v0 = vpack.c.bf16 %v409_v58, %v401_v57 }
 0x130   : > { %v473_v51 = vld [vmem:[%s6181_s22 + $0x2d8] sm:$0xff]  ;;  %v464_v57 = vld [vmem:[%s6181_s22 + $0x290] sm:$0xff] }
 0x131   : > { %2205 = vmatmul.mubr.bf16.gmra.mrb[16].mxu0 %v542_v63  ;;  %2657 = vmatmul.mubr.bf16.gmra.mrb[16].mxu1 %v542_v63  ;;  %v5294_v63 = vld [vmem:[#allocation5 + $0x428] ss:$16 sps:$4 sm:$0xff]   ;;  %v472_v58 = vld [vmem:[%s6181_s22 + $0x2d0] sm:$0xff] }
 0x132   : > { %2262 = vmatpush1.bf16.msra.mxu0 %v5237_v2  ;;  %2714 = vmatpush1.bf16.msra.mxu1 %v5240_v3  ;;  %v408_v2 = vld [vmem:[%s6181_s22 + $0xd0] sm:$0xff] }
 0x133   : > { %2263 = vmatprep.subr.bf16.mxu0 %v5245_v4  ;;  %2715 = vmatprep.subr.bf16.mxu1 %v5248_v5  ;;  %v5299_v3 = vld [vmem:[#allocation5 + $0x444] ss:$16 sps:$4 sm:$0xff]   ;;  %v5302_v4 = vld [vmem:[#allocation5 + $0x44c] ss:$16 sps:$4 sm:$0xff]   ;;  %v520_v5 = vpack.c.bf16 %v408_v2, %v400_v1  ;;  %v5348_v1 = vld [vmem:[#allocation5 + $0x548] ss:$16 sps:$4 sm:$0xff]  }
 0x134   : > { %2214 = vmatprep.mubr.bf16.mxu0 %v551_v8  ;;  %2666 = vmatprep.mubr.bf16.mxu1 %v551_v8  ;;  %v5297_v8 = vld [vmem:[#allocation5 + $0x440] ss:$16 sps:$4 sm:$0xff]   ;;  %v5353_v2 = vld [vmem:[#allocation5 + $0x564] ss:$16 sps:$4 sm:$0xff]  }
 0x136   : > { %2264 = vmatpush1.bf16.msra.mxu0 %v5243_v6  ;;  %2716 = vmatpush1.bf16.msra.mxu1 %v5246_v7  ;;  %v417_v6 = vld [vmem:[%s6181_s22 + $0x118] sm:$0xff] }
 0x137   : > { %2265 = vmatprep.subr.bf16.mxu0 %v5251_v11  ;;  %2717 = vmatprep.subr.bf16.mxu1 %v5254_v12  ;;  %v425_v7 = vld [vmem:[%s6181_s22 + $0x158] sm:$0xff]  ;;  %v5303_v12 = vld [vmem:[#allocation5 + $0x460] ss:$16 sps:$4 sm:$0xff]  }
 0x138   : > { %v5308_v11 = vld [vmem:[#allocation5 + $0x46c] ss:$16 sps:$4 sm:$0xff]  }
 0x139   : > { %2215 = vmatmul.mubr.bf16.gmra.mrb[20].mxu0 %v550_v14  ;;  %2667 = vmatmul.mubr.bf16.gmra.mrb[20].mxu1 %v550_v14  ;;  %v529_v14 = vpack.c.bf16 %v425_v7, %v417_v6  ;;  %v480_v7 = vld [vmem:[%s6181_s22 + $0x310] sm:$0xff] }
 0x13a   : > { %2266 = vmatpush1.bf16.msra.mxu0 %v5249_v13  ;;  %2718 = vmatpush1.bf16.msra.mxu1 %v5252_v15  ;;  %v5306_v13 = vld [vmem:[#allocation5 + $0x468] ss:$16 sps:$4 sm:$0xff]   ;;  %v416_v15 = vld [vmem:[%s6181_s22 + $0x110] sm:$0xff] }
 0x13b   : > { %2267 = vmatprep.subr.bf16.mxu0 %v5257_v18  ;;  %2719 = vmatprep.subr.bf16.mxu1 %v5260_v19  ;;  %v5314_v18 = vld [vmem:[#allocation5 + $0x48c] ss:$16 sps:$4 sm:$0xff]   ;;  %v5309_v19 = vld [vmem:[#allocation5 + $0x480] ss:$16 sps:$4 sm:$0xff]  }
 0x13c   : > { %2224 = vmatprep.mubr.bf16.mxu0 %v559_v21  ;;  %2676 = vmatprep.mubr.bf16.mxu1 %v559_v21  ;;  %v5312_v21 = vld [vmem:[#allocation5 + $0x488] ss:$16 sps:$4 sm:$0xff]  }
 0x13e   : > { %2268 = vmatpush1.bf16.msra.mxu0 %v5255_v20  ;;  %2720 = vmatpush1.bf16.msra.mxu1 %v5258_v22  ;;  %v528_v20 = vpack.c.bf16 %v424_v16, %v416_v15  ;;  %v433_v22 = vld [vmem:[%s6181_s22 + $0x198] sm:$0xff]  ;;  %v5365_v16 = vld [vmem:[#allocation5 + $0x5a4] ss:$16 sps:$4 sm:$0xff]  }
 0x13f   : > { %2269 = vmatprep.subr.bf16.mxu0 %v5263_v25  ;;  %2721 = vmatprep.subr.bf16.mxu1 %v5266_v26  ;;  %v5320_v25 = vld [vmem:[#allocation5 + $0x4ac] ss:$16 sps:$4 sm:$0xff]   ;;  %v5315_v26 = vld [vmem:[#allocation5 + $0x4a0] ss:$16 sps:$4 sm:$0xff]   ;;  %v5360_v15 = vld [vmem:[#allocation5 + $0x588] ss:$16 sps:$4 sm:$0xff]  }
 0x141   : > { %2225 = vmatmul.mubr.bf16.gmra.mrb[24].mxu0 %v558_v29  ;;  %2677 = vmatmul.mubr.bf16.gmra.mrb[24].mxu1 %v558_v29  ;;  %v432_v29 = vld [vmem:[%s6181_s22 + $0x190] sm:$0xff] }
 0x142   : > { %2270 = vmatpush1.bf16.msra.mxu0 %v5261_v27  ;;  %2722 = vmatpush1.bf16.msra.mxu1 %v5264_v28  ;;  %v537_v27 = vpack.c.bf16 %v441_v23, %v433_v22  ;;  %v5318_v28 = vld [vmem:[#allocation5 + $0x4a8] ss:$16 sps:$4 sm:$0xff]   ;;  %v504_v22 = vld [vmem:[%s6181_s22 + $0x3d0] sm:$0xff] }
 0x143   : > { %2271 = vmatprep.subr.bf16.mxu0 %v5269_v32  ;;  %2723 = vmatprep.subr.bf16.mxu1 %v5272_v33  ;;  %v5326_v32 = vld [vmem:[#allocation5 + $0x4cc] ss:$16 sps:$4 sm:$0xff]   ;;  %v5321_v33 = vld [vmem:[#allocation5 + $0x4c0] ss:$16 sps:$4 sm:$0xff]   ;;  %v5371_v23 = vld [vmem:[#allocation5 + $0x5c4] ss:$16 sps:$4 sm:$0xff]  }
 0x144   : > { %2234 = vmatprep.mubr.bf16.mxu0 %v567_v34  ;;  %2686 = vmatprep.mubr.bf16.mxu1 %v567_v34  ;;  %v5324_v34 = vld [vmem:[#allocation5 + $0x4c8] ss:$16 sps:$4 sm:$0xff]  }
 0x146   : > { %2272 = vmatpush1.bf16.msra.mxu0 %v5267_v35  ;;  %2724 = vmatpush1.bf16.msra.mxu1 %v5270_v36  ;;  %v536_v35 = vpack.c.bf16 %v440_v30, %v432_v29  ;;  %v449_v36 = vld [vmem:[%s6181_s22 + $0x218] sm:$0xff]  ;;  %v395_v29 = vld [vmem:[%s6181_s22 + $0x68] sm:$0xff]  ;;  %v5377_v30 = vld [vmem:[#allocation5 + $0x5e4] ss:$16 sps:$4 sm:$0xff]  }
 0x147   : > { %2273 = vmatprep.subr.bf16.mxu0 %v5275_v39  ;;  %2725 = vmatprep.subr.bf16.mxu1 %v5278_v40  ;;  %v5332_v39 = vld [vmem:[#allocation5 + $0x4ec] ss:$16 sps:$4 sm:$0xff]   ;;  %v545_v40 = vpack.c.bf16 %v457_v37, %v449_v36  ;;  %v394_v36 = vld [vmem:[%s6181_s22 + $0x60] sm:$0xff] }
 0x148   : > { %v5383_v37 = vld [vmem:[#allocation5 + $0x604] ss:$16 sps:$4 sm:$0xff]  }
 0x149   : > { %2235 = vmatmul.mubr.bf16.gmra.mrb[28].mxu0 %v566_v43  ;;  %2687 = vmatmul.mubr.bf16.gmra.mrb[28].mxu1 %v566_v43  ;;  %v448_v43 = vld [vmem:[%s6181_s22 + $0x210] sm:$0xff] }
 0x14a   : > { %2274 = vmatpush1.bf16.msra.mxu0 %v5273_v41  ;;  %2726 = vmatpush1.bf16.msra.mxu1 %v5276_v42  ;;  %v5327_v41 = vld [vmem:[#allocation5 + $0x4e0] ss:$16 sps:$4 sm:$0xff]   ;;  %v5330_v42 = vld [vmem:[#allocation5 + $0x4e8] ss:$16 sps:$4 sm:$0xff]  }
 0x14b   : > { %2275 = vmatprep.subr.bf16.mxu0 %v5281_v46  ;;  %2727 = vmatprep.subr.bf16.mxu1 %v5284_v47  ;;  %v5338_v46 = vld [vmem:[#allocation5 + $0x50c] ss:$16 sps:$4 sm:$0xff]   ;;  %v5333_v47 = vld [vmem:[#allocation5 + $0x500] ss:$16 sps:$4 sm:$0xff]  }
 0x14c   : > { %2277 = vmatprep.mubr.bf16.mxu0 %v513_v49  ;;  %2729 = vmatprep.mubr.bf16.mxu1 %v513_v49  ;;  %v544_v49 = vpack.c.bf16 %v456_v44, %v448_v43  ;;  %v411_v43 = vld [vmem:[%s6181_s22 + $0xe8] sm:$0xff]  ;;  %v5389_v44 = vld [vmem:[#allocation5 + $0x624] ss:$16 sps:$4 sm:$0xff]  }
 0x14e   : > { %2276 = vmatpush1.bf16.msra.mxu0 %v5279_v48  ;;  %2728 = vmatpush1.bf16.msra.mxu1 %v5282_v50  ;;  %v5336_v48 = vld [vmem:[#allocation5 + $0x508] ss:$16 sps:$4 sm:$0xff]  }
 0x14f   : > { %2358 = vmatprep.subr.bf16.mxu0 %v5287_v53  ;;  %2810 = vmatprep.subr.bf16.mxu1 %v5290_v54  ;;  %v465_v50 = vld [vmem:[%s6181_s22 + $0x298] sm:$0xff]  ;;  %v5339_v54 = vld [vmem:[#allocation5 + $0x520] ss:$16 sps:$4 sm:$0xff]  }
 0x150   : > { %v5344_v53 = vld [vmem:[#allocation5 + $0x52c] ss:$16 sps:$4 sm:$0xff]  }
 0x151   : > { %2278 = vmatmul.mubr.bf16.vlgmr.msra.gmra.mrb[0].mxu0 %v512_v56  ;;  %2730 = vmatmul.mubr.bf16.vlgmr.msra.gmra.mrb[0].mxu1 %v512_v56  ;;  %v5342_v56 = vld [vmem:[#allocation5 + $0x528] ss:$16 sps:$4 sm:$0xff]  }
 0x152   : > { %2359 = vmatpush1.bf16.msra.mxu0 %v5285_v55  ;;  %2811 = vmatpush1.bf16.msra.mxu1 %v5288_v59  ;;  %v553_v55 = vpack.c.bf16 %v473_v51, %v465_v50  ;;  %v5347_v59 = vld [vmem:[#allocation5 + $0x544] ss:$16 sps:$4 sm:$0xff]  }
 0x153   : > { %2360 = vmatprep.subr.bf16.mxu0 %v5293_v60  ;;  %2812 = vmatprep.subr.bf16.mxu1 %v5296_v61  ;;  %v5350_v60 = vld [vmem:[#allocation5 + $0x54c] ss:$16 sps:$4 sm:$0xff]   ;;  %v5345_v61 = vld [vmem:[#allocation5 + $0x540] ss:$16 sps:$4 sm:$0xff]   ;;  %v5395_v51 = vld [vmem:[#allocation5 + $0x644] ss:$16 sps:$4 sm:$0xff]  }
 0x154   : > { %2287 = vmatprep.mubr.bf16.mxu0 %v521_v0  ;;  %2739 = vmatprep.mubr.bf16.mxu1 %v521_v0  ;;  %v489_v0 = vld [vmem:[%s6181_s22 + $0x358] sm:$0xff]  ;;  %v410_v50 = vld [vmem:[%s6181_s22 + $0xe0] sm:$0xff] }
 0x156   : > { %2361 = vmatpush1.bf16.msra.mxu0 %v5291_v62  ;;  %2813 = vmatpush1.bf16.msra.mxu1 %v5294_v63  ;;  %v552_v62 = vpack.c.bf16 %v472_v58, %v464_v57  ;;  %v481_v63 = vld [vmem:[%s6181_s22 + $0x318] sm:$0xff]  ;;  %v427_v57 = vld [vmem:[%s6181_s22 + $0x168] sm:$0xff]  ;;  %v5401_v58 = vld [vmem:[#allocation5 + $0x664] ss:$16 sps:$4 sm:$0xff]  }
 0x157   : > { %2362 = vmatprep.subr.bf16.mxu0 %v5299_v3  ;;  %2814 = vmatprep.subr.bf16.mxu1 %v5302_v4  ;;  %v5356_v3 = vld [vmem:[#allocation5 + $0x56c] ss:$16 sps:$4 sm:$0xff]   ;;  %v5351_v4 = vld [vmem:[#allocation5 + $0x560] ss:$16 sps:$4 sm:$0xff]   ;;  %v561_v6 = vpack.c.bf16 %v489_v0, %v481_v63 }
 0x158   : > { %v418_v63 = vld [vmem:[%s6181_s22 + $0x120] sm:$0xff] }
 0x159   : > { %2288 = vmatmul.mubr.bf16.gmra.mrb[4].mxu0 %v520_v5  ;;  %2740 = vmatmul.mubr.bf16.gmra.mrb[4].mxu1 %v520_v5  ;;  %v5354_v5 = vld [vmem:[#allocation5 + $0x568] ss:$16 sps:$4 sm:$0xff]   ;;  %v426_v0 = vld [vmem:[%s6181_s22 + $0x160] sm:$0xff] }
 0x15a   : > { %2363 = vmatpush1.bf16.msra.mxu0 %v5297_v8  ;;  %2815 = vmatpush1.bf16.msra.mxu1 %v5300_v9  ;;  %v488_v8 = vld [vmem:[%s6181_s22 + $0x350] sm:$0xff] }
 0x15b   : > { %2364 = vmatprep.subr.bf16.mxu0 %v5305_v10  ;;  %2816 = vmatprep.subr.bf16.mxu1 %v5308_v11  ;;  %v5359_v9 = vld [vmem:[#allocation5 + $0x584] ss:$16 sps:$4 sm:$0xff]   ;;  %v5362_v10 = vld [vmem:[#allocation5 + $0x58c] ss:$16 sps:$4 sm:$0xff]   ;;  %v560_v11 = vpack.c.bf16 %v488_v8, %v480_v7  ;;  %v5408_v7 = vld [vmem:[#allocation5 + $0x688] ss:$16 sps:$4 sm:$0xff]  }
 0x15c   : > { %2297 = vmatprep.mubr.bf16.mxu0 %v529_v14  ;;  %2749 = vmatprep.mubr.bf16.mxu1 %v529_v14  ;;  %v5357_v14 = vld [vmem:[#allocation5 + $0x580] ss:$16 sps:$4 sm:$0xff]   ;;  %v5413_v8 = vld [vmem:[#allocation5 + $0x6a4] ss:$16 sps:$4 sm:$0xff]  }
 0x15e   : > { %2365 = vmatpush1.bf16.msra.mxu0 %v5303_v12  ;;  %2817 = vmatpush1.bf16.msra.mxu1 %v5306_v13  ;;  %v497_v12 = vld [vmem:[%s6181_s22 + $0x398] sm:$0xff] }
 0x15f   : > { %2366 = vmatprep.subr.bf16.mxu0 %v5311_v17  ;;  %2818 = vmatprep.subr.bf16.mxu1 %v5314_v18  ;;  %v505_v13 = vld [vmem:[%s6181_s22 + $0x3d8] sm:$0xff]  ;;  %v5363_v18 = vld [vmem:[#allocation5 + $0x5a0] ss:$16 sps:$4 sm:$0xff]  }
 0x160   : > { %v5368_v17 = vld [vmem:[#allocation5 + $0x5ac] ss:$16 sps:$4 sm:$0xff]  }
 0x161   : > { %2298 = vmatmul.mubr.bf16.gmra.mrb[8].mxu0 %v528_v20  ;;  %2750 = vmatmul.mubr.bf16.gmra.mrb[8].mxu1 %v528_v20  ;;  %v569_v20 = vpack.c.bf16 %v505_v13, %v497_v12  ;;  %v5414_v12 = vld [vmem:[#allocation5 + $0x6a8] ss:$16 sps:$4 sm:$0xff]   ;;  %v434_v13 = vld [vmem:[%s6181_s22 + $0x1a0] sm:$0xff] }
 0x162   : > { %2367 = vmatpush1.bf16.msra.mxu0 %v5309_v19  ;;  %2819 = vmatpush1.bf16.msra.mxu1 %v5312_v21  ;;  %v5366_v19 = vld [vmem:[#allocation5 + $0x5a8] ss:$16 sps:$4 sm:$0xff]   ;;  %v496_v21 = vld [vmem:[%s6181_s22 + $0x390] sm:$0xff] }
 0x163   : > { %2368 = vmatprep.subr.bf16.mxu0 %v5317_v24  ;;  %2820 = vmatprep.subr.bf16.mxu1 %v5320_v25  ;;  %v5374_v24 = vld [vmem:[#allocation5 + $0x5cc] ss:$16 sps:$4 sm:$0xff]   ;;  %v5369_v25 = vld [vmem:[#allocation5 + $0x5c0] ss:$16 sps:$4 sm:$0xff]  }
 0x164   : > { %2307 = vmatprep.mubr.bf16.mxu0 %v537_v27  ;;  %2759 = vmatprep.mubr.bf16.mxu1 %v537_v27  ;;  %v5372_v27 = vld [vmem:[#allocation5 + $0x5c8] ss:$16 sps:$4 sm:$0xff]  }
 0x166   : > { %2369 = vmatpush1.bf16.msra.mxu0 %v5315_v26  ;;  %2821 = vmatpush1.bf16.msra.mxu1 %v5318_v28  ;;  %v568_v26 = vpack.c.bf16 %v504_v22, %v496_v21  ;;  %v387_v28 = vld [vmem:[%s6181_s22 + $0x28] sm:$0xff]  ;;  %v5425_v22 = vld [vmem:[#allocation5 + $0x6e4] ss:$16 sps:$4 sm:$0xff]  }
 0x167   : > { %2370 = vmatprep.subr.bf16.mxu0 %v5323_v31  ;;  %2822 = vmatprep.subr.bf16.mxu1 %v5326_v32  ;;  %v5380_v31 = vld [vmem:[#allocation5 + $0x5ec] ss:$16 sps:$4 sm:$0xff]   ;;  %v5375_v32 = vld [vmem:[#allocation5 + $0x5e0] ss:$16 sps:$4 sm:$0xff]  }
 0x168   : > { %v459_v21 = vld [vmem:[%s6181_s22 + $0x268] sm:$0xff] }
 0x169   : > { %2308 = vmatmul.mubr.bf16.gmra.mrb[12].mxu0 %v536_v35  ;;  %2760 = vmatmul.mubr.bf16.gmra.mrb[12].mxu1 %v536_v35  ;;  %v386_v35 = vld [vmem:[%s6181_s22 + $0x20] sm:$0xff] }
 0x16a   : > { %2371 = vmatpush1.bf16.msra.mxu0 %v5321_v33  ;;  %2823 = vmatpush1.bf16.msra.mxu1 %v5324_v34  ;;  %v515_v33 = vpack.c.bf16 %v395_v29, %v387_v28  ;;  %v5378_v34 = vld [vmem:[#allocation5 + $0x5e8] ss:$16 sps:$4 sm:$0xff]   ;;  %v458_v28 = vld [vmem:[%s6181_s22 + $0x260] sm:$0xff] }
 0x16b   : > { %2372 = vmatprep.subr.bf16.mxu0 %v5329_v38  ;;  %2824 = vmatprep.subr.bf16.mxu1 %v5332_v39  ;;  %v5386_v38 = vld [vmem:[#allocation5 + $0x60c] ss:$16 sps:$4 sm:$0xff]   ;;  %v5381_v39 = vld [vmem:[#allocation5 + $0x600] ss:$16 sps:$4 sm:$0xff]   ;;  %v5431_v29 = vld [vmem:[#allocation5 + $0x704] ss:$16 sps:$4 sm:$0xff]  }
 0x16c   : > { %2317 = vmatprep.mubr.bf16.mxu0 %v545_v40  ;;  %2769 = vmatprep.mubr.bf16.mxu1 %v545_v40  ;;  %v5384_v40 = vld [vmem:[#allocation5 + $0x608] ss:$16 sps:$4 sm:$0xff]  }
 0x16e   : > { %2373 = vmatpush1.bf16.msra.mxu0 %v5327_v41  ;;  %2825 = vmatpush1.bf16.msra.mxu1 %v5330_v42  ;;  %v514_v41 = vpack.c.bf16 %v394_v36, %v386_v35  ;;  %v403_v42 = vld [vmem:[%s6181_s22 + $0xa8] sm:$0xff]  ;;  %v5437_v36 = vld [vmem:[#allocation5 + $0x724] ss:$16 sps:$4 sm:$0xff]  }
 0x16f   : > { %2374 = vmatprep.subr.bf16.mxu0 %v5335_v45  ;;  %2826 = vmatprep.subr.bf16.mxu1 %v5338_v46  ;;  %v5392_v45 = vld [vmem:[#allocation5 + $0x62c] ss:$16 sps:$4 sm:$0xff]   ;;  %v523_v46 = vpack.c.bf16 %v411_v43, %v403_v42  ;;  %v474_v42 = vld [vmem:[%s6181_s22 + $0x2e0] sm:$0xff] }
 0x170   : > { %v475_v35 = vld [vmem:[%s6181_s22 + $0x2e8] sm:$0xff]  ;;  %v5443_v43 = vld [vmem:[#allocation5 + $0x744] ss:$16 sps:$4 sm:$0xff]  }
 0x171   : > { %2318 = vmatmul.mubr.bf16.gmra.mrb[16].mxu0 %v544_v49  ;;  %2770 = vmatmul.mubr.bf16.gmra.mrb[16].mxu1 %v544_v49  ;;  %v402_v49 = vld [vmem:[%s6181_s22 + $0xa0] sm:$0xff] }
 0x172   : > { %2375 = vmatpush1.bf16.msra.mxu0 %v5333_v47  ;;  %2827 = vmatpush1.bf16.msra.mxu1 %v5336_v48  ;;  %v5387_v47 = vld [vmem:[#allocation5 + $0x620] ss:$16 sps:$4 sm:$0xff]   ;;  %v5390_v48 = vld [vmem:[#allocation5 + $0x628] ss:$16 sps:$4 sm:$0xff]  }
 0x173   : > { %2376 = vmatprep.subr.bf16.mxu0 %v5341_v52  ;;  %2828 = vmatprep.subr.bf16.mxu1 %v5344_v53  ;;  %v5398_v52 = vld [vmem:[#allocation5 + $0x64c] ss:$16 sps:$4 sm:$0xff]   ;;  %v5393_v53 = vld [vmem:[#allocation5 + $0x640] ss:$16 sps:$4 sm:$0xff]  }
 0x174   : > { %2327 = vmatprep.mubr.bf16.mxu0 %v553_v55  ;;  %2779 = vmatprep.mubr.bf16.mxu1 %v553_v55  ;;  %v522_v55 = vpack.c.bf16 %v410_v50, %v402_v49  ;;  %v491_v49 = vld [vmem:[%s6181_s22 + $0x368] sm:$0xff]  ;;  %v5449_v50 = vld [vmem:[#allocation5 + $0x764] ss:$16 sps:$4 sm:$0xff]  }
 0x176   : > { %2377 = vmatpush1.bf16.msra.mxu0 %v5339_v54  ;;  %2829 = vmatpush1.bf16.msra.mxu1 %v5342_v56  ;;  %v5396_v54 = vld [vmem:[#allocation5 + $0x648] ss:$16 sps:$4 sm:$0xff]  }
 0x177   : > { %2378 = vmatprep.subr.bf16.mxu0 %v5347_v59  ;;  %2830 = vmatprep.subr.bf16.mxu1 %v5350_v60  ;;  %v419_v56 = vld [vmem:[%s6181_s22 + $0x128] sm:$0xff] }
 0x178   : > { %v5404_v59 = vld [vmem:[#allocation5 + $0x66c] ss:$16 sps:$4 sm:$0xff]   ;;  %v531_v60 = vpack.c.bf16 %v427_v57, %v419_v56  ;;  %v490_v56 = vld [vmem:[%s6181_s22 + $0x360] sm:$0xff] }
 0x179   : > { %2328 = vmatmul.mubr.bf16.gmra.mrb[20].mxu0 %v552_v62  ;;  %2780 = vmatmul.mubr.bf16.gmra.mrb[20].mxu1 %v552_v62  ;;  %v5402_v62 = vld [vmem:[#allocation5 + $0x668] ss:$16 sps:$4 sm:$0xff]   ;;  %v5455_v57 = vld [vmem:[#allocation5 + $0x784] ss:$16 sps:$4 sm:$0xff]  }
 0x17a   : > { %2379 = vmatpush1.bf16.msra.mxu0 %v5345_v61  ;;  %2831 = vmatpush1.bf16.msra.mxu1 %v5348_v1  ;;  %v5399_v61 = vld [vmem:[#allocation5 + $0x660] ss:$16 sps:$4 sm:$0xff]   ;;  %v5407_v1 = vld [vmem:[#allocation5 + $0x684] ss:$16 sps:$4 sm:$0xff]  }
 0x17b   : > { %2380 = vmatprep.subr.bf16.mxu0 %v5353_v2  ;;  %2832 = vmatprep.subr.bf16.mxu1 %v5356_v3  ;;  %v5410_v2 = vld [vmem:[#allocation5 + $0x68c] ss:$16 sps:$4 sm:$0xff]   ;;  %v530_v3 = vpack.c.bf16 %v426_v0, %v418_v63 }
 0x17c   : > { %2337 = vmatprep.mubr.bf16.mxu0 %v561_v6  ;;  %2789 = vmatprep.mubr.bf16.mxu1 %v561_v6  ;;  %v5405_v6 = vld [vmem:[#allocation5 + $0x680] ss:$16 sps:$4 sm:$0xff]   ;;  %v499_v63 = vld [vmem:[%s6181_s22 + $0x3a8] sm:$0xff] }
 0x17d   : > { %v507_v0 = vld [vmem:[%s6181_s22 + $0x3e8] sm:$0xff] }
 0x17e   : > { %2381 = vmatpush1.bf16.msra.mxu0 %v5351_v4  ;;  %2833 = vmatpush1.bf16.msra.mxu1 %v5354_v5  ;;  %v435_v4 = vld [vmem:[%s6181_s22 + $0x1a8] sm:$0xff] }
 0x17f   : > { %2382 = vmatprep.subr.bf16.mxu0 %v5359_v9  ;;  %2834 = vmatprep.subr.bf16.mxu1 %v5362_v10  ;;  %v443_v5 = vld [vmem:[%s6181_s22 + $0x1e8] sm:$0xff] }
 0x180   : > { %v5416_v9 = vld [vmem:[#allocation5 + $0x6ac] ss:$16 sps:$4 sm:$0xff]   ;;  %v539_v10 = vpack.c.bf16 %v443_v5, %v435_v4  ;;  %v571_v4 = vpack.c.bf16 %v507_v0, %v499_v63  ;;  %v498_v5 = vld [vmem:[%s6181_s22 + $0x3a0] sm:$0xff] }
 0x181   : > { %2338 = vmatmul.mubr.bf16.gmra.mrb[24].mxu0 %v560_v11  ;;  %2790 = vmatmul.mubr.bf16.gmra.mrb[24].mxu1 %v560_v11  ;;  %v5411_v11 = vld [vmem:[#allocation5 + $0x6a0] ss:$16 sps:$4 sm:$0xff]   ;;  %v5492_v63 = vld [vmem:[#allocation8 + $0x50] ss:$8 sps:$4 sm:$0xff]  }
 0x182   : > { %2383 = vmatpush1.bf16.msra.mxu0 %v5357_v14  ;;  %2835 = vmatpush1.bf16.msra.mxu1 %v5360_v15  ;;  %v442_v14 = vld [vmem:[%s6181_s22 + $0x1e0] sm:$0xff]  ;;  %v6345_v0 = vld [vmem:[#allocation8 + $0x150] ss:$8 sps:$4 sm:$0xff]  }
 0x183   : > { %2384 = vmatprep.subr.bf16.mxu0 %v5365_v16  ;;  %2836 = vmatprep.subr.bf16.mxu1 %v5368_v17  ;;  %v5419_v15 = vld [vmem:[#allocation5 + $0x6c4] ss:$16 sps:$4 sm:$0xff]   ;;  %v5422_v16 = vld [vmem:[#allocation5 + $0x6cc] ss:$16 sps:$4 sm:$0xff]   ;;  %v5417_v17 = vld [vmem:[#allocation5 + $0x6c0] ss:$16 sps:$4 sm:$0xff]  }
 0x184   : > { %2347 = vmatprep.mubr.bf16.mxu0 %v569_v20  ;;  %2799 = vmatprep.mubr.bf16.mxu1 %v569_v20  ;;  %v451_v20 = vld [vmem:[%s6181_s22 + $0x228] sm:$0xff] }
 0x186   : > { %2385 = vmatpush1.bf16.msra.mxu0 %v5363_v18  ;;  %2837 = vmatpush1.bf16.msra.mxu1 %v5366_v19  ;;  %v5420_v18 = vld [vmem:[#allocation5 + $0x6c8] ss:$16 sps:$4 sm:$0xff]   ;;  %v538_v19 = vpack.c.bf16 %v442_v14, %v434_v13  ;;  %v5473_v14 = vld [vmem:[#allocation5 + $0x7e4] ss:$16 sps:$4 sm:$0xff]  }
 0x187   : > { %2386 = vmatprep.subr.bf16.mxu0 %v5371_v23  ;;  %2838 = vmatprep.subr.bf16.mxu1 %v5374_v24  ;;  %v5428_v23 = vld [vmem:[#allocation5 + $0x6ec] ss:$16 sps:$4 sm:$0xff]   ;;  %v5423_v24 = vld [vmem:[#allocation5 + $0x6e0] ss:$16 sps:$4 sm:$0xff]  }
 0x189   : > { %2348 = vmatmul.mubr.bf16.gmra.mrb[28].mxu0 %v568_v26  ;;  %2800 = vmatmul.mubr.bf16.gmra.mrb[28].mxu1 %v568_v26  ;;  %v547_v26 = vpack.c.bf16 %v459_v21, %v451_v20  ;;  %v396_v20 = vld [vmem:[%s6181_s22 + $0x70] sm:$0xff]  ;;  %v405_v21 = vld [vmem:[%s6181_s22 + $0xb8] sm:$0xff] }
 0x18a   : > { %2387 = vmatpush1.bf16.msra.mxu0 %v5369_v25  ;;  %2839 = vmatpush1.bf16.msra.mxu1 %v5372_v27  ;;  %v5426_v25 = vld [vmem:[#allocation5 + $0x6e8] ss:$16 sps:$4 sm:$0xff]   ;;  %v450_v27 = vld [vmem:[%s6181_s22 + $0x220] sm:$0xff] }
 0x18b   : > { %2388 = vmatprep.subr.bf16.mxu0 %v5377_v30  ;;  %2840 = vmatprep.subr.bf16.mxu1 %v5380_v31  ;;  %v5434_v30 = vld [vmem:[#allocation5 + $0x70c] ss:$16 sps:$4 sm:$0xff]   ;;  %v5429_v31 = vld [vmem:[#allocation5 + $0x700] ss:$16 sps:$4 sm:$0xff]  }
 0x18c   : > { %2390 = vmatprep.mubr.bf16.mxu0 %v515_v33  ;;  %2842 = vmatprep.mubr.bf16.mxu1 %v515_v33  ;;  %v546_v33 = vpack.c.bf16 %v458_v28, %v450_v27  ;;  %v6303_v27 = vld [vmem:[#allocation8 + $0x100] ss:$8 sps:$4 sm:$0xff]  }
 0x18e   : > { %2389 = vmatpush1.bf16.msra.mxu0 %v5375_v32  ;;  %2841 = vmatpush1.bf16.msra.mxu1 %v5378_v34  ;;  %v5432_v32 = vld [vmem:[#allocation5 + $0x708] ss:$16 sps:$4 sm:$0xff]  }
 0x18f   : > { %2471 = vmatprep.subr.bf16.mxu0 %v5383_v37  ;;  %2923 = vmatprep.subr.bf16.mxu1 %v5386_v38  ;;  %v467_v34 = vld [vmem:[%s6181_s22 + $0x2a8] sm:$0xff]  ;;  %v5435_v38 = vld [vmem:[#allocation5 + $0x720] ss:$16 sps:$4 sm:$0xff]  }
 0x190   : > { %v5440_v37 = vld [vmem:[#allocation5 + $0x72c] ss:$16 sps:$4 sm:$0xff]  }
 0x191   : > { %2391 = vmatmul.mubr.bf16.vlgmr.msra.gmra.mrb[0].mxu0 %v514_v41  ;;  %2843 = vmatmul.mubr.bf16.vlgmr.msra.gmra.mrb[0].mxu1 %v514_v41  ;;  %v466_v41 = vld [vmem:[%s6181_s22 + $0x2a0] sm:$0xff] }
 0x192   : > { %2472 = vmatpush1.bf16.msra.mxu0 %v5381_v39  ;;  %2924 = vmatpush1.bf16.msra.mxu1 %v5384_v40  ;;  %v5438_v39 = vld [vmem:[#allocation5 + $0x728] ss:$16 sps:$4 sm:$0xff]   ;;  %v555_v40 = vpack.c.bf16 %v475_v35, %v467_v34  ;;  %v5480_v35 = vld [vmem:[#allocation8 + $0x10] ss:$8 sps:$4 sm:$0xff]  }
 0x193   : > { %2473 = vmatprep.subr.bf16.mxu0 %v5389_v44  ;;  %2925 = vmatprep.subr.bf16.mxu1 %v5392_v45  ;;  %v5446_v44 = vld [vmem:[#allocation5 + $0x74c] ss:$16 sps:$4 sm:$0xff]   ;;  %v5441_v45 = vld [vmem:[#allocation5 + $0x740] ss:$16 sps:$4 sm:$0xff]  }
 0x194   : > { %2400 = vmatprep.mubr.bf16.mxu0 %v523_v46  ;;  %2852 = vmatprep.mubr.bf16.mxu1 %v523_v46  ;;  %v5444_v46 = vld [vmem:[#allocation5 + $0x748] ss:$16 sps:$4 sm:$0xff]  }
 0x195   : > { %v429_v34 = vld [vmem:[%s6181_s22 + $0x178] sm:$0xff] }
 0x196   : > { %2474 = vmatpush1.bf16.msra.mxu0 %v5387_v47  ;;  %2926 = vmatpush1.bf16.msra.mxu1 %v5390_v48  ;;  %v554_v47 = vpack.c.bf16 %v474_v42, %v466_v41  ;;  %v483_v48 = vld [vmem:[%s6181_s22 + $0x328] sm:$0xff] }
 0x197   : > { %2475 = vmatprep.subr.bf16.mxu0 %v5395_v51  ;;  %2927 = vmatprep.subr.bf16.mxu1 %v5398_v52  ;;  %v5452_v51 = vld [vmem:[#allocation5 + $0x76c] ss:$16 sps:$4 sm:$0xff]   ;;  %v5447_v52 = vld [vmem:[#allocation5 + $0x760] ss:$16 sps:$4 sm:$0xff]  }
 0x198   : > { %v5483_v41 = vld [vmem:[#allocation8 + $0x20] ss:$8 sps:$4 sm:$0xff]  }
 0x199   : > { %2401 = vmatmul.mubr.bf16.gmra.mrb[4].mxu0 %v522_v55  ;;  %2853 = vmatmul.mubr.bf16.gmra.mrb[4].mxu1 %v522_v55  ;;  %v482_v55 = vld [vmem:[%s6181_s22 + $0x320] sm:$0xff] }
 0x19a   : > { %2476 = vmatpush1.bf16.msra.mxu0 %v5393_v53  ;;  %2928 = vmatpush1.bf16.msra.mxu1 %v5396_v54  ;;  %v5450_v53 = vld [vmem:[#allocation5 + $0x768] ss:$16 sps:$4 sm:$0xff]   ;;  %v563_v54 = vpack.c.bf16 %v491_v49, %v483_v48  ;;  %v6319_v42 = vld [vmem:[#allocation8 + $0x120] ss:$8 sps:$4 sm:$0xff]   ;;  %v5486_v49 = vld [vmem:[#allocation8 + $0x30] ss:$8 sps:$4 sm:$0xff]  }
 0x19b   : > { %2477 = vmatprep.subr.bf16.mxu0 %v5401_v58  ;;  %2929 = vmatprep.subr.bf16.mxu1 %v5404_v59  ;;  %v5458_v58 = vld [vmem:[#allocation5 + $0x78c] ss:$16 sps:$4 sm:$0xff]   ;;  %v5453_v59 = vld [vmem:[#allocation5 + $0x780] ss:$16 sps:$4 sm:$0xff]  }
 0x19c   : > { %2410 = vmatprep.mubr.bf16.mxu0 %v531_v60  ;;  %2862 = vmatprep.mubr.bf16.mxu1 %v531_v60  ;;  %v5456_v60 = vld [vmem:[#allocation5 + $0x788] ss:$16 sps:$4 sm:$0xff]  }
 0x19d   : > { %v445_v48 = vld [vmem:[%s6181_s22 + $0x1f8] sm:$0xff] }
 0x19e   : > { %2478 = vmatpush1.bf16.msra.mxu0 %v5399_v61  ;;  %2930 = vmatpush1.bf16.msra.mxu1 %v5402_v62  ;;  %v562_v61 = vpack.c.bf16 %v490_v56, %v482_v55  ;;  %v5461_v62 = vld [vmem:[#allocation5 + $0x7a4] ss:$16 sps:$4 sm:$0xff]  }
 0x19f   : > { %2479 = vmatprep.subr.bf16.mxu0 %v5407_v1  ;;  %2931 = vmatprep.subr.bf16.mxu1 %v5410_v2  ;;  %v5464_v1 = vld [vmem:[#allocation5 + $0x7ac] ss:$16 sps:$4 sm:$0xff]   ;;  %v5459_v2 = vld [vmem:[#allocation5 + $0x7a0] ss:$16 sps:$4 sm:$0xff]  }
 0x1a0   : > { %v5489_v55 = vld [vmem:[#allocation8 + $0x40] ss:$8 sps:$4 sm:$0xff]  }
 0x1a1   : > { %2411 = vmatmul.mubr.bf16.gmra.mrb[8].mxu0 %v530_v3  ;;  %2863 = vmatmul.mubr.bf16.gmra.mrb[8].mxu1 %v530_v3  ;;  %v5462_v3 = vld [vmem:[#allocation5 + $0x7a8] ss:$16 sps:$4 sm:$0xff]   ;;  %v6335_v56 = vld [vmem:[#allocation8 + $0x140] ss:$8 sps:$4 sm:$0xff]  }
 0x1a2   : > { %2480 = vmatpush1.bf16.msra.mxu0 %v5405_v6  ;;  %2932 = vmatpush1.bf16.msra.mxu1 %v5408_v7  ;;  %v506_v6 = vld [vmem:[%s6181_s22 + $0x3e0] sm:$0xff] }
 0x1a3   : > { %2481 = vmatprep.subr.bf16.mxu0 %v5413_v8  ;;  %2933 = vmatprep.subr.bf16.mxu1 %v5416_v9  ;;  %v5467_v7 = vld [vmem:[#allocation5 + $0x7c4] ss:$16 sps:$4 sm:$0xff]   ;;  %v5470_v8 = vld [vmem:[#allocation5 + $0x7cc] ss:$16 sps:$4 sm:$0xff]   ;;  %v570_v13 = vpack.c.bf16 %v506_v6, %v498_v5  ;;  %v5500_v5 = vld [vmem:[#allocation8 + $0x74] ss:$8 sps:$4 sm:$0xff]  }
 0x1a4   : > { %2420 = vmatprep.mubr.bf16.mxu0 %v539_v10  ;;  %2872 = vmatprep.mubr.bf16.mxu1 %v539_v10  ;;  %v389_v9 = vld [vmem:[%s6181_s22 + $0x38] sm:$0xff]  ;;  %v452_v6 = vld [vmem:[%s6181_s22 + $0x230] sm:$0xff] }
 0x1a5   : > { %v397_v10 = vld [vmem:[%s6181_s22 + $0x78] sm:$0xff] }
 0x1a6   : > { %2482 = vmatpush1.bf16.msra.mxu0 %v5411_v11  ;;  %2934 = vmatpush1.bf16.msra.mxu1 %v5414_v12  ;;  %v5465_v11 = vld [vmem:[#allocation5 + $0x7c0] ss:$16 sps:$4 sm:$0xff]   ;;  %v5468_v12 = vld [vmem:[#allocation5 + $0x7c8] ss:$16 sps:$4 sm:$0xff]  }
 0x1a7   : > { %2483 = vmatprep.subr.bf16.mxu0 %v5419_v15  ;;  %2935 = vmatprep.subr.bf16.mxu1 %v5422_v16  ;;  %v5476_v15 = vld [vmem:[#allocation5 + $0x7ec] ss:$16 sps:$4 sm:$0xff]   ;;  %v5471_v16 = vld [vmem:[#allocation5 + $0x7e0] ss:$16 sps:$4 sm:$0xff]  }
 0x1a9   : > { %2421 = vmatmul.mubr.bf16.gmra.mrb[12].mxu0 %v538_v19  ;;  %2873 = vmatmul.mubr.bf16.gmra.mrb[12].mxu1 %v538_v19  ;;  %v388_v19 = vld [vmem:[%s6181_s22 + $0x30] sm:$0xff] }
 0x1aa   : > { %2484 = vmatpush1.bf16.msra.mxu0 %v5417_v17  ;;  %2936 = vmatpush1.bf16.msra.mxu1 %v5420_v18  ;;  %v5474_v17 = vld [vmem:[#allocation5 + $0x7e8] ss:$16 sps:$4 sm:$0xff]   ;;  %v517_v18 = vpack.c.bf16 %v397_v10, %v389_v9  ;;  %v5498_v10 = vld [vmem:[#allocation8 + $0x70] ss:$8 sps:$4 sm:$0xff]  }
 0x1ab   : > { %2485 = vmatprep.subr.bf16.mxu0 %v5425_v22  ;;  %2937 = vmatprep.subr.bf16.mxu1 %v5428_v23  ;;  %v413_v22 = vld [vmem:[%s6181_s22 + $0xf8] sm:$0xff]  ;;  %v5479_v23 = vld [vmem:[#allocation8 + $0x4] ss:$8 sps:$4 sm:$0xff]  }
 0x1ac   : > { %2430 = vmatprep.mubr.bf16.mxu0 %v547_v26  ;;  %2882 = vmatprep.mubr.bf16.mxu1 %v547_v26  ;;  %v5477_v26 = vld [vmem:[#allocation8] ss:$8 sps:$4 sm:$0xff]   ;;  %v525_v28 = vpack.c.bf16 %v413_v22, %v405_v21  ;;  %v477_v9 = vld [vmem:[%s6181_s22 + $0x2f8] sm:$0xff]  ;;  %v5515_v21 = vld [vmem:[#allocation8 + $0xa4] ss:$8 sps:$4 sm:$0xff]  }
 0x1ae   : > { %2486 = vmatpush1.bf16.msra.mxu0 %v5423_v24  ;;  %2938 = vmatpush1.bf16.msra.mxu1 %v5426_v25  ;;  %v6301_v24 = vld [vmem:[#allocation8 + $0x104] ss:$8 sps:$4 sm:$0xff]   ;;  %v516_v25 = vpack.c.bf16 %v396_v20, %v388_v19  ;;  %v493_v19 = vld [vmem:[%s6181_s22 + $0x378] sm:$0xff] }
 0x1af   : > { %2487 = vmatprep.subr.bf16.mxu0 %v5431_v29  ;;  %2939 = vmatprep.subr.bf16.mxu1 %v5434_v30  ;;  %v5482_v29 = vld [vmem:[#allocation8 + $0x14] ss:$8 sps:$4 sm:$0xff]   ;;  %v5507_v20 = vld [vmem:[#allocation8 + $0x90] ss:$8 sps:$4 sm:$0xff]  }
 0x1b0   : > { %v6305_v30 = vld [vmem:[#allocation8 + $0x114] ss:$8 sps:$4 sm:$0xff]  }
 0x1b1   : > { %2431 = vmatmul.mubr.bf16.gmra.mrb[16].mxu0 %v546_v33  ;;  %2883 = vmatmul.mubr.bf16.gmra.mrb[16].mxu1 %v546_v33  ;;  %v421_v33 = vld [vmem:[%s6181_s22 + $0x138] sm:$0xff] }
 0x1b2   : > { %2488 = vmatpush1.bf16.msra.mxu0 %v5429_v31  ;;  %2940 = vmatpush1.bf16.msra.mxu1 %v5432_v32  ;;  %v404_v31 = vld [vmem:[%s6181_s22 + $0xb0] sm:$0xff] }
 0x1b3   : > { %2489 = vmatprep.subr.bf16.mxu0 %v5437_v36  ;;  %2941 = vmatprep.subr.bf16.mxu1 %v5440_v37  ;;  %v412_v32 = vld [vmem:[%s6181_s22 + $0xf0] sm:$0xff] }
 0x1b4   : > { %2440 = vmatprep.mubr.bf16.mxu0 %v555_v40  ;;  %2892 = vmatprep.mubr.bf16.mxu1 %v555_v40  ;;  %v6313_v36 = vld [vmem:[#allocation8 + $0x110] ss:$8 sps:$4 sm:$0xff]   ;;  %v5485_v37 = vld [vmem:[#allocation8 + $0x24] ss:$8 sps:$4 sm:$0xff]   ;;  %v533_v40 = vpack.c.bf16 %v429_v34, %v421_v33 }
 0x1b5   : > { %v5519_v33 = vld [vmem:[#allocation8 + $0xb0] ss:$8 sps:$4 sm:$0xff]   ;;  %v5527_v34 = vld [vmem:[#allocation8 + $0xc4] ss:$8 sps:$4 sm:$0xff]  }
 0x1b6   : > { %2490 = vmatpush1.bf16.msra.mxu0 %v5435_v38  ;;  %2942 = vmatpush1.bf16.msra.mxu1 %v5438_v39  ;;  %v6316_v38 = vld [vmem:[#allocation8 + $0x124] ss:$8 sps:$4 sm:$0xff]   ;;  %v524_v39 = vpack.c.bf16 %v412_v32, %v404_v31  ;;  %v501_v31 = vld [vmem:[%s6181_s22 + $0x3b8] sm:$0xff] }
 0x1b7   : > { %2491 = vmatprep.subr.bf16.mxu0 %v5443_v43  ;;  %2943 = vmatprep.subr.bf16.mxu1 %v5446_v44  ;;  %v5488_v43 = vld [vmem:[#allocation8 + $0x34] ss:$8 sps:$4 sm:$0xff]  }
 0x1b8   : > { %v6322_v44 = vld [vmem:[#allocation8 + $0x134] ss:$8 sps:$4 sm:$0xff]  }
 0x1b9   : > { %2441 = vmatmul.mubr.bf16.gmra.mrb[20].mxu0 %v554_v47  ;;  %2893 = vmatmul.mubr.bf16.gmra.mrb[20].mxu1 %v554_v47  ;;  %v437_v47 = vld [vmem:[%s6181_s22 + $0x1b8] sm:$0xff] }
 0x1ba   : > { %2492 = vmatpush1.bf16.msra.mxu0 %v5441_v45  ;;  %2944 = vmatpush1.bf16.msra.mxu1 %v5444_v46  ;;  %v420_v45 = vld [vmem:[%s6181_s22 + $0x130] sm:$0xff]  ;;  %v509_v32 = vld [vmem:[%s6181_s22 + $0x3f8] sm:$0xff] }
 0x1bb   : > { %2493 = vmatprep.subr.bf16.mxu0 %v5449_v50  ;;  %2945 = vmatprep.subr.bf16.mxu1 %v5452_v51  ;;  %v428_v46 = vld [vmem:[%s6181_s22 + $0x170] sm:$0xff] }
 0x1bc   : > { %2450 = vmatprep.mubr.bf16.mxu0 %v563_v54  ;;  %2902 = vmatprep.mubr.bf16.mxu1 %v563_v54  ;;  %v6329_v50 = vld [vmem:[#allocation8 + $0x130] ss:$8 sps:$4 sm:$0xff]   ;;  %v5491_v51 = vld [vmem:[#allocation8 + $0x44] ss:$8 sps:$4 sm:$0xff]   ;;  %v541_v54 = vpack.c.bf16 %v445_v48, %v437_v47 }
 0x1bd   : > { %v5539_v47 = vld [vmem:[#allocation8 + $0xe4] ss:$8 sps:$4 sm:$0xff]  }
 0x1be   : > { %2494 = vmatpush1.bf16.msra.mxu0 %v5447_v52  ;;  %2946 = vmatpush1.bf16.msra.mxu1 %v5450_v53  ;;  %v6332_v52 = vld [vmem:[#allocation8 + $0x144] ss:$8 sps:$4 sm:$0xff]   ;;  %v532_v53 = vpack.c.bf16 %v428_v46, %v420_v45  ;;  %v5531_v45 = vld [vmem:[#allocation8 + $0xd0] ss:$8 sps:$4 sm:$0xff]  }
 0x1bf   : > { %2495 = vmatprep.subr.bf16.mxu0 %v5455_v57  ;;  %2947 = vmatprep.subr.bf16.mxu1 %v5458_v58  ;;  %v5494_v57 = vld [vmem:[#allocation8 + $0x54] ss:$8 sps:$4 sm:$0xff]   ;;  %v6363_v48 = vld [vmem:[#allocation8 + $0x164] ss:$8 sps:$4 sm:$0xff]  }
 0x1c0   : > { %v6338_v58 = vld [vmem:[#allocation8 + $0x154] ss:$8 sps:$4 sm:$0xff]  }
 0x1c1   : > { %2451 = vmatmul.mubr.bf16.gmra.mrb[24].mxu0 %v562_v61  ;;  %2903 = vmatmul.mubr.bf16.gmra.mrb[24].mxu1 %v562_v61  ;;  %v453_v61 = vld [vmem:[%s6181_s22 + $0x238] sm:$0xff] }
 0x1c2   : > { %2496 = vmatpush1.bf16.msra.mxu0 %v5453_v59  ;;  %2948 = vmatpush1.bf16.msra.mxu1 %v5456_v60  ;;  %v436_v59 = vld [vmem:[%s6181_s22 + $0x1b0] sm:$0xff] }
 0x1c3   : > { %2497 = vmatprep.subr.bf16.mxu0 %v5461_v62  ;;  %2949 = vmatprep.subr.bf16.mxu1 %v5464_v1  ;;  %v444_v60 = vld [vmem:[%s6181_s22 + $0x1f0] sm:$0xff]  ;;  %v461_v62 = vld [vmem:[%s6181_s22 + $0x278] sm:$0xff] }
 0x1c4   : > { %2460 = vmatprep.mubr.bf16.mxu0 %v571_v4  ;;  %2912 = vmatprep.mubr.bf16.mxu1 %v571_v4  ;;  %v5497_v1 = vld [vmem:[#allocation8 + $0x64] ss:$8 sps:$4 sm:$0xff]   ;;  %v5495_v4 = vld [vmem:[#allocation8 + $0x60] ss:$8 sps:$4 sm:$0xff]  }
 0x1c6   : > { %2498 = vmatpush1.bf16.msra.mxu0 %v5459_v2  ;;  %2950 = vmatpush1.bf16.msra.mxu1 %v5462_v3  ;;  %v540_v2 = vpack.c.bf16 %v444_v60, %v436_v59  ;;  %v549_v3 = vpack.c.bf16 %v461_v62, %v453_v61  ;;  %v6376_v59 = vld [vmem:[#allocation8 + $0x184] ss:$8 sps:$4 sm:$0xff]   ;;  %v6378_v60 = vld [vmem:[#allocation8 + $0x180] ss:$8 sps:$4 sm:$0xff]   ;;  %v6382_v61 = vld [vmem:[#allocation8 + $0x194] ss:$8 sps:$4 sm:$0xff]  }
 0x1c7   : > { %2499 = vmatprep.subr.bf16.mxu0 %v5467_v7  ;;  %2951 = vmatprep.subr.bf16.mxu1 %v5470_v8  ;;  %v460_v7 = vld [vmem:[%s6181_s22 + $0x270] sm:$0xff]  ;;  %v469_v8 = vld [vmem:[%s6181_s22 + $0x2b8] sm:$0xff] }
 0x1c8   : > { %v6384_v62 = vld [vmem:[#allocation8 + $0x190] ss:$8 sps:$4 sm:$0xff]  }
 0x1c9   : > { %2461 = vmatmul.mubr.bf16.gmra.mrb[28].mxu0 %v570_v13  ;;  %2913 = vmatmul.mubr.bf16.gmra.mrb[28].mxu1 %v570_v13  ;;  %v557_v13 = vpack.c.bf16 %v477_v9, %v469_v8  ;;  %v6414_v8 = vld [vmem:[#allocation8 + $0x1e0] ss:$8 sps:$4 sm:$0xff]   ;;  %v6418_v9 = vld [vmem:[#allocation8 + $0x1f4] ss:$8 sps:$4 sm:$0xff]  }
 0x1ca   : > { %2500 = vmatpush1.bf16.msra.mxu0 %v5465_v11  ;;  %2952 = vmatpush1.bf16.msra.mxu1 %v5468_v12  ;;  %v5503_v11 = vld [vmem:[#allocation8 + $0x84] ss:$8 sps:$4 sm:$0xff]   ;;  %v548_v12 = vpack.c.bf16 %v460_v7, %v452_v6  ;;  %v6408_v6 = vld [vmem:[#allocation8 + $0x1d0] ss:$8 sps:$4 sm:$0xff]  }
 0x1cb   : > { %2501 = vmatprep.subr.bf16.mxu0 %v5473_v14  ;;  %2953 = vmatprep.subr.bf16.mxu1 %v5476_v15  ;;  %v5501_v14 = vld [vmem:[#allocation8 + $0x80] ss:$8 sps:$4 sm:$0xff]   ;;  %v5509_v15 = vld [vmem:[#allocation8 + $0x94] ss:$8 sps:$4 sm:$0xff]   ;;  %v6412_v7 = vld [vmem:[#allocation8 + $0x1e4] ss:$8 sps:$4 sm:$0xff]  }
 0x1cc   : > { %2503 = vmatprep.mubr.bf16.mxu0 %v517_v18  ;;  %2955 = vmatprep.mubr.bf16.mxu1 %v517_v18  ;;  %v485_v18 = vld [vmem:[%s6181_s22 + $0x338] sm:$0xff] }
 0x1ce   : > { %2502 = vmatpush1.bf16.msra.mxu0 %v5471_v16  ;;  %2954 = vmatpush1.bf16.msra.mxu1 %v5474_v17  ;;  %v468_v16 = vld [vmem:[%s6181_s22 + $0x2b0] sm:$0xff] }
 0x1cf   : > { %3528 = vmatprep.subr.bf16.mxu0 %v5479_v23  ;;  %4625 = vmatprep.subr.bf16.mxu1 %v6301_v24  ;;  %v476_v17 = vld [vmem:[%s6181_s22 + $0x2f0] sm:$0xff]  ;;  %v565_v23 = vpack.c.bf16 %v493_v19, %v485_v18 }
 0x1d0   : > { %v556_v22 = vpack.c.bf16 %v476_v17, %v468_v16 }
 0x1d1   : > { %2504 = vmatmul.mubr.bf16.vlgmr.msra.gmra.mrb[0].mxu0 %v516_v25  ;;  %2956 = vmatmul.mubr.bf16.vlgmr.msra.gmra.mrb[0].mxu1 %v516_v25  ;;  %v5513_v25 = vld [vmem:[#allocation8 + $0xa0] ss:$8 sps:$4 sm:$0xff]  }
 0x1d2   : > { %2513 = vmatprep.mubr.bf16.mxu0 %v525_v28  ;;  %2965 = vmatprep.mubr.bf16.mxu1 %v525_v28  ;;  %v484_v28 = vld [vmem:[%s6181_s22 + $0x330] sm:$0xff] }
 0x1d3   : > { %3529 = vmatpush1.bf16.msra.mxu0 %v5477_v26  ;;  %4641 = vmatpush1.bf16.msra.mxu1 %v6303_v27  ;;  %v5521_v26 = vld [vmem:[#allocation8 + $0xb4] ss:$8 sps:$4 sm:$0xff]  }
 0x1d4   : > { %3530 = vmatprep.subr.bf16.mxu0 %v5482_v29  ;;  %4626 = vmatprep.subr.bf16.mxu1 %v6305_v30  ;;  %v492_v29 = vld [vmem:[%s6181_s22 + $0x370] sm:$0xff] }
 0x1d7   : > { %3531 = vmatpush1.bf16.msra.mxu0 %v5480_v35  ;;  %4642 = vmatpush1.bf16.msra.mxu1 %v6313_v36  ;;  %v564_v35 = vpack.c.bf16 %v492_v29, %v484_v28 }
 0x1d8   : > { %3532 = vmatprep.subr.bf16.mxu0 %v5485_v37  ;;  %4627 = vmatprep.subr.bf16.mxu1 %v6316_v38  ;;  %v573_v37 = vpack.c.bf16 %v509_v32, %v501_v31 }
 0x1d9   : > { %2514 = vmatmul.mubr.bf16.gmra.mrb[4].mxu0 %v524_v39  ;;  %2966 = vmatmul.mubr.bf16.gmra.mrb[4].mxu1 %v524_v39  ;;  %v5525_v39 = vld [vmem:[#allocation8 + $0xc0] ss:$8 sps:$4 sm:$0xff]  }
 0x1da   : > { %2523 = vmatprep.mubr.bf16.mxu0 %v533_v40  ;;  %2975 = vmatprep.mubr.bf16.mxu1 %v533_v40  ;;  %v5533_v40 = vld [vmem:[#allocation8 + $0xd4] ss:$8 sps:$4 sm:$0xff]  }
 0x1db   : > { %3533 = vmatpush1.bf16.msra.mxu0 %v5483_v41  ;;  %4643 = vmatpush1.bf16.msra.mxu1 %v6319_v42  ;;  %v500_v41 = vld [vmem:[%s6181_s22 + $0x3b0] sm:$0xff] }
 0x1dc   : > { %3534 = vmatprep.subr.bf16.mxu0 %v5488_v43  ;;  %4628 = vmatprep.subr.bf16.mxu1 %v6322_v44  ;;  %v508_v43 = vld [vmem:[%s6181_s22 + $0x3f0] sm:$0xff] }
 0x1dd   : > { %v572_v46 = vpack.c.bf16 %v508_v43, %v500_v41 }
 0x1df   : > { %3535 = vmatpush1.bf16.msra.mxu0 %v5486_v49  ;;  %4644 = vmatpush1.bf16.msra.mxu1 %v6329_v50  ;;  %v5537_v49 = vld [vmem:[#allocation8 + $0xe0] ss:$8 sps:$4 sm:$0xff]  }
 0x1e0   : > { %3536 = vmatprep.subr.bf16.mxu0 %v5491_v51  ;;  %4629 = vmatprep.subr.bf16.mxu1 %v6332_v52  ;;  %v6365_v51 = vld [vmem:[#allocation8 + $0x160] ss:$8 sps:$4 sm:$0xff]  }
 0x1e1   : > { %2524 = vmatmul.mubr.bf16.gmra.mrb[8].mxu0 %v532_v53  ;;  %2976 = vmatmul.mubr.bf16.gmra.mrb[8].mxu1 %v532_v53  ;;  %v5545_v53 = vld [vmem:[#allocation8 + $0xf4] ss:$8 sps:$4 sm:$0xff]  }
 0x1e2   : > { %2533 = vmatprep.mubr.bf16.mxu0 %v541_v54  ;;  %2985 = vmatprep.mubr.bf16.mxu1 %v541_v54  ;;  %v6369_v54 = vld [vmem:[#allocation8 + $0x174] ss:$8 sps:$4 sm:$0xff]  }
 0x1e3   : > { %3537 = vmatpush1.bf16.msra.mxu0 %v5489_v55  ;;  %4645 = vmatpush1.bf16.msra.mxu1 %v6335_v56  ;;  %v5543_v55 = vld [vmem:[#allocation8 + $0xf0] ss:$8 sps:$4 sm:$0xff]  }
 0x1e4   : > { %3538 = vmatprep.subr.bf16.mxu0 %v5494_v57  ;;  %4630 = vmatprep.subr.bf16.mxu1 %v6338_v58  ;;  %v6371_v57 = vld [vmem:[#allocation8 + $0x170] ss:$8 sps:$4 sm:$0xff]  }
 0x1e7   : > { %3539 = vmatpush1.bf16.msra.mxu0 %v5492_v63  ;;  %4646 = vmatpush1.bf16.msra.mxu1 %v6345_v0  ;;  %v6388_v63 = vld [vmem:[#allocation8 + $0x1a4] ss:$8 sps:$4 sm:$0xff]  }
 0x1e8   : > { %3540 = vmatprep.subr.bf16.mxu0 %v5497_v1  ;;  %4631 = vmatprep.subr.bf16.mxu1 %v6363_v48  ;;  %v6390_v1 = vld [vmem:[#allocation8 + $0x1a0] ss:$8 sps:$4 sm:$0xff]  }
 0x1e9   : > { %2534 = vmatmul.mubr.bf16.gmra.mrb[12].mxu0 %v540_v2  ;;  %2986 = vmatmul.mubr.bf16.gmra.mrb[12].mxu1 %v540_v2  ;;  %v6396_v2 = vld [vmem:[#allocation8 + $0x1b0] ss:$8 sps:$4 sm:$0xff]  }
 0x1ea   : > { %2543 = vmatprep.mubr.bf16.mxu0 %v549_v3  ;;  %2995 = vmatprep.mubr.bf16.mxu1 %v549_v3  ;;  %v6400_v3 = vld [vmem:[#allocation8 + $0x1c4] ss:$8 sps:$4 sm:$0xff]  }
 0x1eb   : > { %3541 = vmatpush1.bf16.msra.mxu0 %v5495_v4  ;;  %4647 = vmatpush1.bf16.msra.mxu1 %v6365_v51  ;;  %v6402_v4 = vld [vmem:[#allocation8 + $0x1c0] ss:$8 sps:$4 sm:$0xff]  }
 0x1ec   : > { %3542 = vmatprep.subr.bf16.mxu0 %v5500_v5  ;;  %4632 = vmatprep.subr.bf16.mxu1 %v6369_v54  ;;  %v6406_v5 = vld [vmem:[#allocation8 + $0x1d4] ss:$8 sps:$4 sm:$0xff]  }
 0x1ef   : > { %3543 = vmatpush1.bf16.msra.mxu0 %v5498_v10  ;;  %4648 = vmatpush1.bf16.msra.mxu1 %v6371_v57  ;;  %v6420_v10 = vld [vmem:[#allocation8 + $0x1f0] ss:$8 sps:$4 sm:$0xff]  }
 0x1f0   : > { %3544 = vmatprep.subr.bf16.mxu0 %v5503_v11  ;;  %4633 = vmatprep.subr.bf16.mxu1 %v6376_v59  ;;  %v832_v11 = vlaneseq }
 0x1f1   : > { %2544 = vmatmul.mubr.bf16.gmra.mrb[16].mxu0 %v548_v12  ;;  %2996 = vmatmul.mubr.bf16.gmra.mrb[16].mxu1 %v548_v12 }
 0x1f2   : > { %2553 = vmatprep.mubr.bf16.mxu0 %v557_v13  ;;  %3005 = vmatprep.mubr.bf16.mxu1 %v557_v13  ;;  %v6424_v12 = vshrl.u32 %v832_v11, 7 }
 0x1f3   : > { %3545 = vmatpush1.bf16.msra.mxu0 %v5501_v14  ;;  %4649 = vmatpush1.bf16.msra.mxu1 %v6378_v60 }
 0x1f4   : > { %3546 = vmatprep.subr.bf16.mxu0 %v5509_v15  ;;  %4634 = vmatprep.subr.bf16.mxu1 %v6382_v61  ;;  %v834_v13 = vsub.s32 0, %v6424_v12  ;;  %v842_v14 = vsub.s32 2, %v6424_v12  ;;  %v830_v15 = vld [vmem:[#allocation7] sm:$0xf]  ;;  %v838_v16 = vsub.s32 1, %v6424_v12  ;;  %v846_v17 = vsub.s32 3, %v6424_v12 }
 0x1f6   : > { %v6432_v18 = vrot.slane %v830_v15, %v834_v13  ;;  %v6434_v19 = vrot.slane %v830_v15, %v842_v14 }
 0x1f7   : > { %3547 = vmatpush1.bf16.msra.mxu0 %v5507_v20  ;;  %4650 = vmatpush1.bf16.msra.mxu1 %v6384_v62  ;;  %v6438_v20 = vrot.slane %v830_v15, %v838_v16 }
 0x1f8   : > { %3548 = vmatprep.subr.bf16.mxu0 %v5515_v21  ;;  %4635 = vmatprep.subr.bf16.mxu1 %v6388_v63  ;;  %v6440_v21 = vrot.slane %v830_v15, %v846_v17 }
 0x1f9   : > { %2554 = vmatmul.mubr.bf16.gmra.mrb[20].mxu0 %v556_v22  ;;  %3006 = vmatmul.mubr.bf16.gmra.mrb[20].mxu1 %v556_v22 }
 0x1fa   : > { %2563 = vmatprep.mubr.bf16.mxu0 %v565_v23  ;;  %3015 = vmatprep.mubr.bf16.mxu1 %v565_v23 }
 0x1fb   : > { %3549 = vmatpush1.bf16.msra.mxu0 %v5513_v25  ;;  %4651 = vmatpush1.bf16.msra.mxu1 %v6390_v1 }
 0x1fc   : > { %3550 = vmatprep.subr.bf16.mxu0 %v5521_v26 }
 0x1ff   : > { %3551 = vmatpush1.bf16.msra.mxu0 %v5519_v33 }
 0x200   : > { %3552 = vmatprep.subr.bf16.mxu0 %v5527_v34 }
 0x201   : > { %2564 = vmatmul.mubr.bf16.gmra.mrb[24].mxu0 %v564_v35  ;;  %3016 = vmatmul.mubr.bf16.gmra.mrb[24].mxu1 %v564_v35 }
 0x202   : > { %2573 = vmatprep.mubr.bf16.mxu0 %v573_v37  ;;  %3025 = vmatprep.mubr.bf16.mxu1 %v573_v37 }
 0x203   : > { %3553 = vmatpush1.bf16.msra.mxu0 %v5525_v39 }
 0x204   : > { %3554 = vmatprep.subr.bf16.mxu0 %v5533_v40 }
 0x207   : > { %3555 = vmatpush1.bf16.msra.mxu0 %v5531_v45 }
 0x208   : > { %3556 = vmatprep.subr.bf16.mxu0 %v5539_v47 }
 0x209   : > { %2574 = vmatmul.mubr.bf16.gmra.mrb[28].mxu0 %v572_v46  ;;  %3026 = vmatmul.mubr.bf16.gmra.mrb[28].mxu1 %v572_v46 }
 0x20b   : > { %3557 = vmatpush1.bf16.msra.mxu0 %v5537_v49 }
 0x20c   : > { %3558 = vmatprep.subr.bf16.mxu0 %v5545_v53 }
 0x20f   : > { %3559 = vmatpush1.bf16.msra.mxu0 %v5543_v55 }
 0x210   : > { %3641 = vmatprep.subr.bf16.mxu0 %v6301_v24  ;;  %v6394_v24 = vld [vmem:[#allocation8 + $0x1b4] ss:$8 sps:$4 sm:$0xff]  }
 0x211   : > { %4636 = vmatprep.subr.bf16.mxu1 %v6394_v24 }
 0x212   : > { %4652 = vmatpush1.bf16.msra.mxu1 %v6396_v2 }
 0x213   : > { %4637 = vmatprep.subr.bf16.mxu1 %v6400_v3 }
 0x216   : > { %4653 = vmatpush1.bf16.msra.mxu1 %v6402_v4 }
 0x217   : > { %4638 = vmatprep.subr.bf16.mxu1 %v6406_v5 }
 0x21a   : > { %4654 = vmatpush1.bf16.msra.mxu1 %v6408_v6 }
 0x21b   : > { %4639 = vmatprep.subr.bf16.mxu1 %v6412_v7 }
 0x21e   : > { %4655 = vmatpush1.bf16.msra.mxu1 %v6414_v8 }
 0x21f   : > { %4640 = vmatprep.subr.bf16.mxu1 %v6418_v9 }
 0x222   : > { %4656 = vmatpush1.bf16.msra.mxu1 %v6420_v10 }
 0x2a4   : > { %v2505_v22 = vpop.f32.mrb[0].mxu0  ;;  %v2957_v23 = vpop.f32.mrb[0].mxu1 }
 0x2a5   : > { %v4657_v25 = vadd.f32 %v2505_v22, %v6432_v18  ;;  %v4689_v26 = vadd.f32 %v2957_v23, %v6434_v19  ;;  %v2507_v28 = vpop.f32.mrb[1].mxu0  ;;  %v2959_v29 = vpop.f32.mrb[1].mxu1 }
 0x2a6   : > { %v4658_v31 = vadd.f32 %v2507_v28, %v6438_v20  ;;  %v4690_v32 = vadd.f32 %v2959_v29, %v6440_v21  ;;  %v2509_v33 = vpop.f32.mrb[2].mxu0  ;;  %v2961_v34 = vpop.f32.mrb[2].mxu1 }
 0x2a7   : > { %v4659_v35 = vadd.f32 %v2509_v33, %v6432_v18  ;;  %v4691_v37 = vadd.f32 %v2961_v34, %v6434_v19  ;;  %v2511_v39 = vpop.f32.mrb[3].mxu0  ;;  %v2963_v40 = vpop.f32.mrb[3].mxu1  ;;  %v3036_v45 = vmax.f32 %v4657_v25, 0.0  ;;  %v3038_v46 = vmax.f32 %v4689_v26, 0.0 }
 0x2a8   : > { %v4660_v41 = vadd.f32 %v2511_v39, %v6438_v20  ;;  %v4692_v43 = vadd.f32 %v2963_v40, %v6440_v21  ;;  %v3037_v53 = vmax.f32 %v4658_v31, 0.0  ;;  %v3039_v55 = vmax.f32 %v4690_v32, 0.0 }
 0x2a9   : > { %v3040_v47 = vmax.f32 %v4659_v35, 0.0  ;;  %v3042_v49 = vmax.f32 %v4691_v37, 0.0 }
 0x2aa   : > { %v3041_v11 = vmax.f32 %v4660_v41, 0.0  ;;  %v3043_v14 = vmax.f32 %v4692_v43, 0.0 }
 0x2ab   : > { %v3100_v15 = vpack.c.bf16 %v3040_v47, %v3036_v45  ;;  %v6450_v17 = vpack.c.bf16 %v3042_v49, %v3038_v46 }
 0x2ac   : > { %v3101_v22 = vpack.c.bf16 %v3041_v11, %v3037_v53  ;;  %v6452_v23 = vpack.c.bf16 %v3043_v14, %v3039_v55  ;;  %v2515_v28 = vpop.f32.mrb[4].mxu0  ;;  %v2967_v29 = vpop.f32.mrb[4].mxu1 }
 0x2ad   : > { %v4661_v33 = vadd.f32 %v2515_v28, %v6432_v18  ;;  %v4693_v34 = vadd.f32 %v2967_v29, %v6434_v19  ;;  %v2517_v25 = vpop.f32.mrb[5].mxu0  ;;  %v2969_v26 = vpop.f32.mrb[5].mxu1 }
 0x2ae   : > { %v4662_v35 = vadd.f32 %v2517_v25, %v6438_v20  ;;  %v4694_v31 = vadd.f32 %v2969_v26, %v6440_v21  ;;  %v2519_v32 = vpop.f32.mrb[6].mxu0  ;;  %v2971_v37 = vpop.f32.mrb[6].mxu1  ;;  %3560 = vmatprep.mubr.bf16.mxu0 %v3101_v22 }
 0x2af   : > { %v4663_v39 = vadd.f32 %v2519_v32, %v6432_v18  ;;  %v4695_v40 = vadd.f32 %v2971_v37, %v6434_v19  ;;  %v2521_v41 = vpop.f32.mrb[7].mxu0  ;;  %v2973_v43 = vpop.f32.mrb[7].mxu1  ;;  %3561 = vmatmul.mubr.bf16.vlgmr.msra.gmra.mrb[32].mxu0 %v3100_v15  ;;  %v3044_v47 = vmax.f32 %v4661_v33, 0.0  ;;  %v3046_v49 = vmax.f32 %v4693_v34, 0.0 }
 0x2b0   : > { %v4664_v45 = vadd.f32 %v2521_v41, %v6438_v20  ;;  %v4696_v46 = vadd.f32 %v2973_v43, %v6440_v21  ;;  %3642 = vmatpush1.bf16.msra.mxu0 %v6303_v27  ;;  %v3045_v11 = vmax.f32 %v4662_v35, 0.0  ;;  %v3047_v14 = vmax.f32 %v4694_v31, 0.0 }
 0x2b1   : > { %v3048_v53 = vmax.f32 %v4663_v39, 0.0  ;;  %v3050_v55 = vmax.f32 %v4695_v40, 0.0  ;;  %3643 = vmatprep.subr.bf16.mxu0 %v6305_v30 }
 0x2b2   : > { %v3049_v22 = vmax.f32 %v4664_v45, 0.0  ;;  %v3051_v28 = vmax.f32 %v4696_v46, 0.0 }
 0x2b3   : > { %v3104_v29 = vpack.c.bf16 %v3048_v53, %v3044_v47  ;;  %v6464_v25 = vpack.c.bf16 %v3050_v55, %v3046_v49 }
 0x2b4   : > { %v3105_v15 = vpack.c.bf16 %v3049_v22, %v3045_v11  ;;  %v6466_v26 = vpack.c.bf16 %v3051_v28, %v3047_v14  ;;  %v2525_v32 = vpop.f32.mrb[8].mxu0  ;;  %v2977_v37 = vpop.f32.mrb[8].mxu1  ;;  %3644 = vmatpush1.bf16.msra.mxu0 %v6313_v36 }
 0x2b5   : > { %v4665_v27 = vadd.f32 %v2525_v32, %v6432_v18  ;;  %v4697_v33 = vadd.f32 %v2977_v37, %v6434_v19  ;;  %v2527_v34 = vpop.f32.mrb[9].mxu0  ;;  %v2979_v30 = vpop.f32.mrb[9].mxu1  ;;  %3645 = vmatprep.subr.bf16.mxu0 %v6316_v38 }
 0x2b6   : > { %v4666_v35 = vadd.f32 %v2527_v34, %v6438_v20  ;;  %v4698_v31 = vadd.f32 %v2979_v30, %v6440_v21  ;;  %v2529_v39 = vpop.f32.mrb[10].mxu0  ;;  %v2981_v40 = vpop.f32.mrb[10].mxu1  ;;  %3570 = vmatprep.mubr.bf16.mxu0 %v3105_v15 }
 0x2b7   : > { %v4667_v41 = vadd.f32 %v2529_v39, %v6432_v18  ;;  %v4699_v43 = vadd.f32 %v2981_v40, %v6434_v19  ;;  %v2531_v36 = vpop.f32.mrb[11].mxu0  ;;  %v2983_v45 = vpop.f32.mrb[11].mxu1  ;;  %3571 = vmatmul.mubr.bf16.gmra.mrb[36].mxu0 %v3104_v29  ;;  %v3052_v38 = vmax.f32 %v4665_v27, 0.0  ;;  %v3054_v49 = vmax.f32 %v4697_v33, 0.0 }
 0x2b8   : > { %v4668_v46 = vadd.f32 %v2531_v36, %v6438_v20  ;;  %v4700_v47 = vadd.f32 %v2983_v45, %v6440_v21  ;;  %3646 = vmatpush1.bf16.msra.mxu0 %v6319_v42  ;;  %v3053_v11 = vmax.f32 %v4666_v35, 0.0  ;;  %v3055_v14 = vmax.f32 %v4698_v31, 0.0 }
 0x2b9   : > { %v3056_v53 = vmax.f32 %v4667_v41, 0.0  ;;  %v3058_v55 = vmax.f32 %v4699_v43, 0.0  ;;  %3647 = vmatprep.subr.bf16.mxu0 %v6322_v44 }
 0x2ba   : > { %v3057_v22 = vmax.f32 %v4668_v46, 0.0  ;;  %v3059_v28 = vmax.f32 %v4700_v47, 0.0 }
 0x2bb   : > { %v3108_v15 = vpack.c.bf16 %v3056_v53, %v3052_v38  ;;  %v6480_v32 = vpack.c.bf16 %v3058_v55, %v3054_v49 }
 0x2bc   : > { %v3109_v29 = vpack.c.bf16 %v3057_v22, %v3053_v11  ;;  %v6482_v37 = vpack.c.bf16 %v3059_v28, %v3055_v14  ;;  %v2535_v34 = vpop.f32.mrb[12].mxu0  ;;  %v2987_v30 = vpop.f32.mrb[12].mxu1  ;;  %3648 = vmatpush1.bf16.msra.mxu0 %v6329_v50 }
 0x2bd   : > { %v4669_v42 = vadd.f32 %v2535_v34, %v6432_v18  ;;  %v4701_v27 = vadd.f32 %v2987_v30, %v6434_v19  ;;  %v2537_v33 = vpop.f32.mrb[13].mxu0  ;;  %v2989_v44 = vpop.f32.mrb[13].mxu1  ;;  %3649 = vmatprep.subr.bf16.mxu0 %v6332_v52 }
 0x2be   : > { %v4670_v35 = vadd.f32 %v2537_v33, %v6438_v20  ;;  %v4702_v31 = vadd.f32 %v2989_v44, %v6440_v21  ;;  %v2539_v39 = vpop.f32.mrb[14].mxu0  ;;  %v2991_v40 = vpop.f32.mrb[14].mxu1  ;;  %3580 = vmatprep.mubr.bf16.mxu0 %v3109_v29 }
 0x2bf   : > { %v4671_v41 = vadd.f32 %v2539_v39, %v6432_v18  ;;  %v4703_v43 = vadd.f32 %v2991_v40, %v6434_v19  ;;  %v2541_v50 = vpop.f32.mrb[15].mxu0  ;;  %v2993_v36 = vpop.f32.mrb[15].mxu1  ;;  %3581 = vmatmul.mubr.bf16.gmra.mrb[40].mxu0 %v3108_v15  ;;  %v3060_v52 = vmax.f32 %v4669_v42, 0.0  ;;  %v3062_v47 = vmax.f32 %v4701_v27, 0.0 }
 0x2c0   : > { %v4672_v45 = vadd.f32 %v2541_v50, %v6438_v20  ;;  %v4704_v46 = vadd.f32 %v2993_v36, %v6440_v21  ;;  %3650 = vmatpush1.bf16.msra.mxu0 %v6335_v56  ;;  %v3061_v53 = vmax.f32 %v4670_v35, 0.0  ;;  %v3063_v55 = vmax.f32 %v4702_v31, 0.0 }
 0x2c1   : > { %v3064_v38 = vmax.f32 %v4671_v41, 0.0  ;;  %v3066_v49 = vmax.f32 %v4703_v43, 0.0  ;;  %3651 = vmatprep.subr.bf16.mxu0 %v6338_v58 }
 0x2c2   : > { %v3065_v11 = vmax.f32 %v4672_v45, 0.0  ;;  %v3067_v14 = vmax.f32 %v4704_v46, 0.0 }
 0x2c3   : > { %v3112_v22 = vpack.c.bf16 %v3064_v38, %v3060_v52  ;;  %v6496_v28 = vpack.c.bf16 %v3066_v49, %v3062_v47 }
 0x2c4   : > { %v3113_v15 = vpack.c.bf16 %v3065_v11, %v3061_v53  ;;  %v6498_v29 = vpack.c.bf16 %v3067_v14, %v3063_v55  ;;  %v2545_v34 = vpop.f32.mrb[16].mxu0  ;;  %v2997_v30 = vpop.f32.mrb[16].mxu1  ;;  %3652 = vmatpush1.bf16.msra.mxu0 %v6345_v0 }
 0x2c5   : > { %v4673_v56 = vadd.f32 %v2545_v34, %v6432_v18  ;;  %v4705_v42 = vadd.f32 %v2997_v30, %v6434_v19  ;;  %v2547_v27 = vpop.f32.mrb[17].mxu0  ;;  %v2999_v58 = vpop.f32.mrb[17].mxu1  ;;  %3653 = vmatprep.subr.bf16.mxu0 %v6363_v48 }
 0x2c6   : > { %v4674_v33 = vadd.f32 %v2547_v27, %v6438_v20  ;;  %v4706_v44 = vadd.f32 %v2999_v58, %v6440_v21  ;;  %v2549_v35 = vpop.f32.mrb[18].mxu0  ;;  %v3001_v31 = vpop.f32.mrb[18].mxu1  ;;  %3590 = vmatprep.mubr.bf16.mxu0 %v3113_v15 }
 0x2c7   : > { %v4675_v39 = vadd.f32 %v2549_v35, %v6432_v18  ;;  %v4707_v40 = vadd.f32 %v3001_v31, %v6434_v19  ;;  %v2551_v0 = vpop.f32.mrb[19].mxu0  ;;  %v3003_v41 = vpop.f32.mrb[19].mxu1  ;;  %3591 = vmatmul.mubr.bf16.gmra.mrb[44].mxu0 %v3112_v22  ;;  %v3068_v48 = vmax.f32 %v4673_v56, 0.0  ;;  %v3070_v36 = vmax.f32 %v4705_v42, 0.0 }
 0x2c8   : > { %v4676_v43 = vadd.f32 %v2551_v0, %v6438_v20  ;;  %v4708_v50 = vadd.f32 %v3003_v41, %v6440_v21  ;;  %3654 = vmatpush1.bf16.msra.mxu0 %v6365_v51  ;;  %v3069_v52 = vmax.f32 %v4674_v33, 0.0  ;;  %v3071_v47 = vmax.f32 %v4706_v44, 0.0 }
 0x2c9   : > { %v3072_v45 = vmax.f32 %v4675_v39, 0.0  ;;  %v3074_v46 = vmax.f32 %v4707_v40, 0.0  ;;  %3655 = vmatprep.subr.bf16.mxu0 %v6369_v54 }
 0x2ca   : > { %v3073_v38 = vmax.f32 %v4676_v43, 0.0  ;;  %v3075_v49 = vmax.f32 %v4708_v50, 0.0 }
 0x2cb   : > { %v3116_v53 = vpack.c.bf16 %v3072_v45, %v3068_v48  ;;  %v3118_v55 = vpack.c.bf16 %v3074_v46, %v3070_v36 }
 0x2cc   : > { %v3117_v11 = vpack.c.bf16 %v3073_v38, %v3069_v52  ;;  %v3119_v14 = vpack.c.bf16 %v3075_v49, %v3071_v47  ;;  %v2555_v22 = vpop.f32.mrb[20].mxu0  ;;  %v3007_v15 = vpop.f32.mrb[20].mxu1  ;;  %3656 = vmatpush1.bf16.msra.mxu0 %v6371_v57 }
 0x2cd   : > { %v4677_v51 = vadd.f32 %v2555_v22, %v6432_v18  ;;  %v4709_v34 = vadd.f32 %v3007_v15, %v6434_v19  ;;  %v2557_v30 = vpop.f32.mrb[21].mxu0  ;;  %v3009_v56 = vpop.f32.mrb[21].mxu1  ;;  %3657 = vmatprep.subr.bf16.mxu0 %v6376_v59 }
 0x2ce   : > { %v4678_v54 = vadd.f32 %v2557_v30, %v6438_v20  ;;  %v4710_v42 = vadd.f32 %v3009_v56, %v6440_v21  ;;  %v2559_v27 = vpop.f32.mrb[22].mxu0  ;;  %v3011_v58 = vpop.f32.mrb[22].mxu1  ;;  %3600 = vmatprep.mubr.bf16.mxu0 %v3117_v11  ;;  %3713 = vmatprep.mubr.bf16.mxu1 %v3119_v14 }
 0x2cf   : > { %v4679_v33 = vadd.f32 %v2559_v27, %v6432_v18  ;;  %v4711_v57 = vadd.f32 %v3011_v58, %v6434_v19  ;;  %v2561_v44 = vpop.f32.mrb[23].mxu0  ;;  %v3013_v35 = vpop.f32.mrb[23].mxu1  ;;  %3601 = vmatmul.mubr.bf16.gmra.mrb[48].mxu0 %v3116_v53  ;;  %3714 = vmatmul.mubr.bf16.vlgmr.msra.gmra.mrb[32].mxu1 %v3118_v55  ;;  %v3076_v39 = vmax.f32 %v4677_v51, 0.0  ;;  %v3078_v40 = vmax.f32 %v4709_v34, 0.0 }
 0x2d0   : > { %v4680_v31 = vadd.f32 %v2561_v44, %v6438_v20  ;;  %v4712_v59 = vadd.f32 %v3013_v35, %v6440_v21  ;;  %3658 = vmatpush1.bf16.msra.mxu0 %v6378_v60  ;;  %v3077_v43 = vmax.f32 %v4678_v54, 0.0  ;;  %v3079_v50 = vmax.f32 %v4710_v42, 0.0 }
 0x2d1   : > { %v3080_v0 = vmax.f32 %v4679_v33, 0.0  ;;  %v3082_v41 = vmax.f32 %v4711_v57, 0.0  ;;  %3659 = vmatprep.subr.bf16.mxu0 %v6382_v61 }
 0x2d2   : > { %v3081_v48 = vmax.f32 %v4680_v31, 0.0  ;;  %v3083_v36 = vmax.f32 %v4712_v59, 0.0 }
 0x2d3   : > { %v3120_v45 = vpack.c.bf16 %v3080_v0, %v3076_v39  ;;  %v3122_v46 = vpack.c.bf16 %v3082_v41, %v3078_v40 }
 0x2d4   : > { %v3121_v52 = vpack.c.bf16 %v3081_v48, %v3077_v43  ;;  %v3123_v47 = vpack.c.bf16 %v3083_v36, %v3079_v50  ;;  %v2565_v38 = vpop.f32.mrb[24].mxu0  ;;  %v3017_v49 = vpop.f32.mrb[24].mxu1  ;;  %3660 = vmatpush1.bf16.msra.mxu0 %v6384_v62 }
 0x2d5   : > { %v4681_v60 = vadd.f32 %v2565_v38, %v6432_v18  ;;  %v4713_v53 = vadd.f32 %v3017_v49, %v6434_v19  ;;  %v2567_v55 = vpop.f32.mrb[25].mxu0  ;;  %v3019_v11 = vpop.f32.mrb[25].mxu1  ;;  %3661 = vmatprep.subr.bf16.mxu0 %v6388_v63 }
 0x2d6   : > { %v4682_v61 = vadd.f32 %v2567_v55, %v6438_v20  ;;  %v4714_v14 = vadd.f32 %v3019_v11, %v6440_v21  ;;  %v2569_v22 = vpop.f32.mrb[26].mxu0  ;;  %v3021_v15 = vpop.f32.mrb[26].mxu1  ;;  %3610 = vmatprep.mubr.bf16.mxu0 %v3121_v52  ;;  %3723 = vmatprep.mubr.bf16.mxu1 %v3123_v47 }
 0x2d7   : > { %v4683_v51 = vadd.f32 %v2569_v22, %v6432_v18  ;;  %v4715_v62 = vadd.f32 %v3021_v15, %v6434_v19  ;;  %v2571_v34 = vpop.f32.mrb[27].mxu0  ;;  %v3023_v30 = vpop.f32.mrb[27].mxu1  ;;  %3611 = vmatmul.mubr.bf16.gmra.mrb[52].mxu0 %v3120_v45  ;;  %3724 = vmatmul.mubr.bf16.gmra.mrb[36].mxu1 %v3122_v46  ;;  %v3084_v54 = vmax.f32 %v4681_v60, 0.0  ;;  %v3086_v42 = vmax.f32 %v4713_v53, 0.0 }
 0x2d8   : > { %v4684_v56 = vadd.f32 %v2571_v34, %v6438_v20  ;;  %v4716_v63 = vadd.f32 %v3023_v30, %v6440_v21  ;;  %3662 = vmatpush1.bf16.msra.mxu0 %v6390_v1  ;;  %v3085_v33 = vmax.f32 %v4682_v61, 0.0  ;;  %v3087_v57 = vmax.f32 %v4714_v14, 0.0 }
 0x2d9   : > { %v3088_v27 = vmax.f32 %v4683_v51, 0.0  ;;  %v3090_v58 = vmax.f32 %v4715_v62, 0.0  ;;  %3663 = vmatprep.subr.bf16.mxu0 %v6394_v24 }
 0x2da   : > { %v3089_v44 = vmax.f32 %v4684_v56, 0.0  ;;  %v3091_v35 = vmax.f32 %v4716_v63, 0.0 }
 0x2db   : > { %v3124_v31 = vpack.c.bf16 %v3088_v27, %v3084_v54  ;;  %v3126_v59 = vpack.c.bf16 %v3090_v58, %v3086_v42 }
 0x2dc   : > { %v3125_v39 = vpack.c.bf16 %v3089_v44, %v3085_v33  ;;  %v3127_v40 = vpack.c.bf16 %v3091_v35, %v3087_v57  ;;  %v2575_v0 = vpop.f32.mrb[28].mxu0  ;;  %v3027_v41 = vpop.f32.mrb[28].mxu1  ;;  %3664 = vmatpush1.bf16.msra.mxu0 %v6396_v2 }
 0x2dd   : > { %v4685_v1 = vadd.f32 %v2575_v0, %v6432_v18  ;;  %v4717_v43 = vadd.f32 %v3027_v41, %v6434_v19  ;;  %v2577_v50 = vpop.f32.mrb[29].mxu0  ;;  %v3029_v48 = vpop.f32.mrb[29].mxu1  ;;  %3665 = vmatprep.subr.bf16.mxu0 %v6400_v3 }
 0x2de   : > { %v4686_v24 = vadd.f32 %v2577_v50, %v6438_v20  ;;  %v4718_v36 = vadd.f32 %v3029_v48, %v6440_v21  ;;  %v2579_v45 = vpop.f32.mrb[30].mxu0  ;;  %v3031_v46 = vpop.f32.mrb[30].mxu1  ;;  %3620 = vmatprep.mubr.bf16.mxu0 %v3125_v39  ;;  %3733 = vmatprep.mubr.bf16.mxu1 %v3127_v40 }
 0x2df   : > { %v4687_v52 = vadd.f32 %v2579_v45, %v6432_v18  ;;  %v4719_v2 = vadd.f32 %v3031_v46, %v6434_v19  ;;  %v2581_v47 = vpop.f32.mrb[31].mxu0  ;;  %v3033_v38 = vpop.f32.mrb[31].mxu1  ;;  %3621 = vmatmul.mubr.bf16.gmra.mrb[56].mxu0 %v3124_v31  ;;  %3734 = vmatmul.mubr.bf16.gmra.mrb[40].mxu1 %v3126_v59  ;;  %v3092_v60 = vmax.f32 %v4685_v1, 0.0  ;;  %v3094_v53 = vmax.f32 %v4717_v43, 0.0 }
 0x2e0   : > { %v4688_v49 = vadd.f32 %v2581_v47, %v6438_v20  ;;  %v4720_v3 = vadd.f32 %v3033_v38, %v6440_v21  ;;  %3666 = vmatpush1.bf16.msra.mxu0 %v6402_v4  ;;  %v3093_v61 = vmax.f32 %v4686_v24, 0.0  ;;  %v3095_v18 = vmax.f32 %v4718_v36, 0.0  ;;  %v5573_v4 = vld [vmem:[#allocation11 + $0x40] sm:$0xff]   ;;  %v5580_v20 = vld [vmem:[#allocation11 + $0x18] sm:$0xff]  }
 0x2e1   : > { %v3096_v55 = vmax.f32 %v4687_v52, 0.0  ;;  %v3098_v11 = vmax.f32 %v4719_v2, 0.0  ;;  %3667 = vmatprep.subr.bf16.mxu0 %v6406_v5  ;;  %v5574_v5 = vld [vmem:[#allocation11] sm:$0xff]   ;;  %4561 = vmatprep.subr.bf16.mxu1 %v5573_v4 }
 0x2e2   : > { %v3097_v14 = vmax.f32 %v4688_v49, 0.0  ;;  %v3099_v19 = vmax.f32 %v4720_v3, 0.0  ;;  %4562 = vmatpush3.bf16.msra.mxu1 %v5574_v5  ;;  %v5581_v21 = vld [vmem:[#allocation11 + $0x60] sm:$0xff]  }
 0x2e3   : > { %v3128_v22 = vpack.c.bf16 %v3096_v55, %v3092_v60  ;;  %v3130_v15 = vpack.c.bf16 %v3098_v11, %v3094_v53 }
 0x2e4   : > { %v3129_v51 = vpack.c.bf16 %v3097_v14, %v3093_v61  ;;  %v3131_v62 = vpack.c.bf16 %v3099_v19, %v3095_v18  ;;  %3668 = vmatpush1.bf16.msra.mxu0 %v6408_v6  ;;  %v5575_v6 = vld [vmem:[#allocation11 + $0x48] sm:$0xff]  }
 0x2e5   : > { %3669 = vmatprep.subr.bf16.mxu0 %v6412_v7  ;;  %v5576_v7 = vld [vmem:[#allocation11 + $0x8] sm:$0xff]   ;;  %4563 = vmatprep.subr.bf16.mxu1 %v5575_v6 }
 0x2e6   : > { %3630 = vmatprep.mubr.bf16.mxu0 %v3129_v51  ;;  %3743 = vmatprep.mubr.bf16.mxu1 %v3131_v62 }
 0x2e7   : > { %3631 = vmatmul.mubr.bf16.gmra.mrb[60].mxu0 %v3128_v22  ;;  %3744 = vmatmul.mubr.bf16.gmra.mrb[44].mxu1 %v3130_v15 }
 0x2e8   : > { %3670 = vmatpush1.bf16.msra.mxu0 %v6414_v8  ;;  %3673 = vmatprep.mubr.bf16.mxu0 %v6452_v23  ;;  %v5577_v8 = vld [vmem:[#allocation11 + $0x50] sm:$0xff]   ;;  %v5583_v23 = vld [vmem:[#allocation11 + $0x68] sm:$0xff]  }
 0x2e9   : > { %3671 = vmatprep.subr.bf16.mxu0 %v6418_v9  ;;  %4564 = vmatpush3.bf16.msra.mxu1 %v5576_v7  ;;  %v5578_v9 = vld [vmem:[#allocation11 + $0x10] sm:$0xff]  }
 0x2ea   : > { %4565 = vmatprep.subr.bf16.mxu1 %v5577_v8 }
 0x2ec   : > { %3672 = vmatpush1.bf16.msra.mxu0 %v6420_v10  ;;  %v5579_v10 = vld [vmem:[#allocation11 + $0x58] sm:$0xff]  }
 0x2ed   : > { %4566 = vmatpush3.bf16.msra.mxu1 %v5578_v9 }
 0x2ee   : > { %4567 = vmatprep.subr.bf16.mxu1 %v5579_v10 }
 0x2ef   : > { %3674 = vmatmul.mubr.bf16.vlgmr.msra.gmra.mrb[32].mxu0 %v6450_v17  ;;  %v5582_v17 = vld [vmem:[#allocation11 + $0x20] sm:$0xff]  }
 0x2f0   : > { %3683 = vmatprep.mubr.bf16.mxu0 %v6466_v26  ;;  %v5585_v26 = vld [vmem:[#allocation11 + $0x70] sm:$0xff]  }
 0x2f1   : > { %4568 = vmatpush3.bf16.msra.mxu1 %v5580_v20 }
 0x2f2   : > { %4569 = vmatprep.subr.bf16.mxu1 %v5581_v21 }
 0x2f5   : > { %4570 = vmatpush3.bf16.msra.mxu1 %v5582_v17 }
 0x2f6   : > { %4571 = vmatprep.subr.bf16.mxu1 %v5583_v23 }
 0x2f7   : > { %3684 = vmatmul.mubr.bf16.gmra.mrb[36].mxu0 %v6464_v25  ;;  %v5584_v25 = vld [vmem:[#allocation11 + $0x28] sm:$0xff]  }
 0x2f8   : > { %3693 = vmatprep.mubr.bf16.mxu0 %v6482_v37  ;;  %v5587_v37 = vld [vmem:[#allocation11 + $0x78] sm:$0xff]  }
 0x2f9   : > { %4572 = vmatpush3.bf16.msra.mxu1 %v5584_v25 }
 0x2fa   : > { %4573 = vmatprep.subr.bf16.mxu1 %v5585_v26 }
 0x2ff   : > { %3694 = vmatmul.mubr.bf16.gmra.mrb[40].mxu0 %v6480_v32  ;;  %v5586_v32 = vld [vmem:[#allocation11 + $0x30] sm:$0xff]  }
 0x300   : > { %3703 = vmatprep.mubr.bf16.mxu0 %v6498_v29  ;;  %4574 = vmatpush3.bf16.msra.mxu1 %v5586_v32  ;;  %v3196_v29 = vld [vmem:[#allocation10] sm:$0x3] }
 0x301   : > { %4575 = vmatprep.subr.bf16.mxu1 %v5587_v37  ;;  %v6563_v34 = vrot.slane %v3196_v29, %v834_v13  ;;  %v6567_v30 = vrot.slane %v3196_v29, %v838_v16 }
 0x307   : > { %3704 = vmatmul.mubr.bf16.gmra.mrb[44].mxu0 %v6496_v28  ;;  %v5588_v28 = vld [vmem:[#allocation11 + $0x38] sm:$0xff]  }
 0x308   : > { %4576 = vmatpush3.bf16.msra.mxu1 %v5588_v28 }
 0x3a2   : > { %v3602_v56 = vpop.f32.mrb[48].mxu0  ;;  %v3715_v63 = vpop.f32.mrb[32].mxu1 }
 0x3a3   : > { %v3603_v54 = vadd.f32 %v3602_v56, %v6563_v34  ;;  %v3604_v42 = vpop.f32.mrb[49].mxu0  ;;  %v3717_v27 = vpop.f32.mrb[33].mxu1 }
 0x3a4   : > { %v3605_v58 = vadd.f32 %v3604_v42, %v6567_v30  ;;  %v3606_v33 = vpop.f32.mrb[50].mxu0  ;;  %v3719_v57 = vpop.f32.mrb[34].mxu1 }
 0x3a5   : > { %v3716_v44 = vadd.f32 %v3715_v63, %v3603_v54  ;;  %v3607_v35 = vadd.f32 %v3606_v33, %v6563_v34  ;;  %v3608_v31 = vpop.f32.mrb[51].mxu0  ;;  %v3721_v13 = vpop.f32.mrb[35].mxu1 }
 0x3a6   : > { %v3718_v59 = vadd.f32 %v3717_v27, %v3605_v58  ;;  %v3609_v12 = vadd.f32 %v3608_v31, %v6567_v30 }
 0x3a7   : > { %v3720_v16 = vadd.f32 %v3719_v57, %v3607_v35  ;;  %v3770_v40 = vmax.f32 %v3716_v44, 0.0 }
 0x3a8   : > { %v3722_v39 = vadd.f32 %v3721_v13, %v3609_v12  ;;  %v3771_v41 = vmax.f32 %v3718_v59, 0.0 }
 0x3a9   : > { %v3772_v0 = vmax.f32 %v3720_v16, 0.0 }
 0x3aa   : > { %v3773_v1 = vmax.f32 %v3722_v39, 0.0  ;;  %v3612_v43 = vpop.f32.mrb[52].mxu0  ;;  %v3725_v50 = vpop.f32.mrb[36].mxu1 }
 0x3ab   : > { %v6573_v48 = vpack.c.bf16 %v3772_v0, %v3770_v40  ;;  %v3613_v24 = vadd.f32 %v3612_v43, %v6563_v34  ;;  %v3614_v36 = vpop.f32.mrb[53].mxu0  ;;  %v3727_v45 = vpop.f32.mrb[37].mxu1 }
 0x3ac   : > { %v6576_v46 = vpack.c.bf16 %v3773_v1, %v3771_v41  ;;  %v3615_v52 = vadd.f32 %v3614_v36, %v6567_v30  ;;  %v3616_v2 = vpop.f32.mrb[54].mxu0  ;;  %v3729_v47 = vpop.f32.mrb[38].mxu1 }
 0x3ad   : > { %v3726_v38 = vadd.f32 %v3725_v50, %v3613_v24  ;;  %v3617_v49 = vadd.f32 %v3616_v2, %v6563_v34  ;;  %v3618_v3 = vpop.f32.mrb[55].mxu0  ;;  %v3731_v60 = vpop.f32.mrb[39].mxu1 }
 0x3ae   : > { %v3728_v53 = vadd.f32 %v3727_v45, %v3615_v52  ;;  %v3619_v55 = vadd.f32 %v3618_v3, %v6567_v30 }
 0x3af   : > { %v3730_v11 = vadd.f32 %v3729_v47, %v3617_v49  ;;  %v3774_v18 = vmax.f32 %v3726_v38, 0.0 }
 0x3b0   : > { %v3732_v61 = vadd.f32 %v3731_v60, %v3619_v55  ;;  %v3775_v19 = vmax.f32 %v3728_v53, 0.0 }
 0x3b1   : > { %v3776_v14 = vmax.f32 %v3730_v11, 0.0 }
 0x3b2   : > { %v3777_v22 = vmax.f32 %v3732_v61, 0.0  ;;  %v3622_v15 = vpop.f32.mrb[56].mxu0  ;;  %v3735_v51 = vpop.f32.mrb[40].mxu1 }
 0x3b3   : > { %v6581_v62 = vpack.c.bf16 %v3776_v14, %v3774_v18  ;;  %v3623_v4 = vadd.f32 %v3622_v15, %v6563_v34  ;;  %v3624_v5 = vpop.f32.mrb[57].mxu0  ;;  %v3737_v6 = vpop.f32.mrb[41].mxu1 }
 0x3b4   : > { %v6584_v7 = vpack.c.bf16 %v3777_v22, %v3775_v19  ;;  %v3625_v8 = vadd.f32 %v3624_v5, %v6567_v30  ;;  %v3626_v9 = vpop.f32.mrb[58].mxu0  ;;  %v3739_v10 = vpop.f32.mrb[42].mxu1 }
 0x3b5   : > { %v3736_v20 = vadd.f32 %v3735_v51, %v3623_v4  ;;  %v3627_v21 = vadd.f32 %v3626_v9, %v6563_v34  ;;  %v3628_v17 = vpop.f32.mrb[59].mxu0  ;;  %v3741_v23 = vpop.f32.mrb[43].mxu1 }
 0x3b6   : > { %v3738_v25 = vadd.f32 %v3737_v6, %v3625_v8  ;;  %v3629_v26 = vadd.f32 %v3628_v17, %v6567_v30 }
 0x3b7   : > { %v3740_v32 = vadd.f32 %v3739_v10, %v3627_v21  ;;  %v3778_v28 = vmax.f32 %v3736_v20, 0.0 }
 0x3b8   : > { %v3742_v37 = vadd.f32 %v3741_v23, %v3629_v26  ;;  %v3779_v56 = vmax.f32 %v3738_v25, 0.0 }
 0x3b9   : > { %v3780_v29 = vmax.f32 %v3740_v32, 0.0 }
 0x3ba   : > { %v3781_v63 = vmax.f32 %v3742_v37, 0.0  ;;  %v3632_v54 = vpop.f32.mrb[60].mxu0  ;;  %v3745_v42 = vpop.f32.mrb[44].mxu1 }
 0x3bb   : > { %v6589_v27 = vpack.c.bf16 %v3780_v29, %v3778_v28  ;;  %v3633_v58 = vadd.f32 %v3632_v54, %v6563_v34  ;;  %v3634_v33 = vpop.f32.mrb[61].mxu0  ;;  %v3747_v57 = vpop.f32.mrb[45].mxu1 }
 0x3bc   : > { %v6592_v44 = vpack.c.bf16 %v3781_v63, %v3779_v56  ;;  %v3635_v35 = vadd.f32 %v3634_v33, %v6567_v30  ;;  %v3636_v31 = vpop.f32.mrb[62].mxu0  ;;  %v3749_v13 = vpop.f32.mrb[46].mxu1 }
 0x3bd   : > { %v3746_v59 = vadd.f32 %v3745_v42, %v3633_v58  ;;  %v3637_v12 = vadd.f32 %v3636_v31, %v6563_v34  ;;  %v3638_v16 = vpop.f32.mrb[63].mxu0  ;;  %v3751_v39 = vpop.f32.mrb[47].mxu1 }
 0x3be   : > { %v3748_v40 = vadd.f32 %v3747_v57, %v3635_v35  ;;  %v3639_v0 = vadd.f32 %v3638_v16, %v6567_v30 }
 0x3bf   : > { %v3750_v41 = vadd.f32 %v3749_v13, %v3637_v12  ;;  %v3782_v43 = vmax.f32 %v3746_v59, 0.0 }
 0x3c0   : > { %v3752_v1 = vadd.f32 %v3751_v39, %v3639_v0  ;;  %v3783_v24 = vmax.f32 %v3748_v40, 0.0 }
 0x3c1   : > { %v3784_v50 = vmax.f32 %v3750_v41, 0.0 }
 0x3c2   : > { %v3785_v36 = vmax.f32 %v3752_v1, 0.0  ;;  %v3675_v45 = vpop.f32.mrb[32].mxu0 }
 0x3c3   : > { %v6597_v52 = vpack.c.bf16 %v3784_v50, %v3782_v43  ;;  %v4721_v2 = vadd.f32 %v3675_v45, %v6563_v34  ;;  %v3677_v47 = vpop.f32.mrb[33].mxu0 }
 0x3c4   : > { %v6600_v38 = vpack.c.bf16 %v3785_v36, %v3783_v24  ;;  %v4722_v49 = vadd.f32 %v3677_v47, %v6567_v30  ;;  %v3679_v3 = vpop.f32.mrb[34].mxu0 }
 0x3c5   : > { %v4723_v60 = vadd.f32 %v3679_v3, %v6563_v34  ;;  %v3681_v53 = vpop.f32.mrb[35].mxu0  ;;  %v3754_v11 = vmax.f32 %v4721_v2, 0.0 }
 0x3c6   : > { %v4724_v55 = vadd.f32 %v3681_v53, %v6567_v30  ;;  %v3755_v18 = vmax.f32 %v4722_v49, 0.0 }
 0x3c7   : > { %v3756_v61 = vmax.f32 %v4723_v60, 0.0 }
 0x3c8   : > { %v3757_v14 = vmax.f32 %v4724_v55, 0.0 }
 0x3c9   : > { %v3786_v19 = vpack.c.bf16 %v3756_v61, %v3754_v11 }
 0x3ca   : > { %v3787_v22 = vpack.c.bf16 %v3757_v14, %v3755_v18  ;;  %v3685_v15 = vpop.f32.mrb[36].mxu0 }
 0x3cb   : > { %v4725_v51 = vadd.f32 %v3685_v15, %v6563_v34  ;;  %v3687_v4 = vpop.f32.mrb[37].mxu0 }
 0x3cc   : > { %v4726_v5 = vadd.f32 %v3687_v4, %v6567_v30  ;;  %v3689_v6 = vpop.f32.mrb[38].mxu0  ;;  %3969 = vmatprep.mubr.bf16.mxu1 %v3787_v22 }
 0x3cd   : > { %v4727_v8 = vadd.f32 %v3689_v6, %v6563_v34  ;;  %v3691_v9 = vpop.f32.mrb[39].mxu0  ;;  %3970 = vmatmul.mubr.bf16.vlgmr.msra.gmra.mrb[48].mxu1 %v3786_v19  ;;  %v3758_v20 = vmax.f32 %v4725_v51, 0.0 }
 0x3ce   : > { %v4728_v10 = vadd.f32 %v3691_v9, %v6567_v30  ;;  %v3759_v17 = vmax.f32 %v4726_v5, 0.0 }
 0x3cf   : > { %v3760_v21 = vmax.f32 %v4727_v8, 0.0 }
 0x3d0   : > { %v3761_v23 = vmax.f32 %v4728_v10, 0.0 }
 0x3d1   : > { %v3788_v25 = vpack.c.bf16 %v3760_v21, %v3758_v20 }
 0x3d2   : > { %v3789_v26 = vpack.c.bf16 %v3761_v23, %v3759_v17  ;;  %v3695_v32 = vpop.f32.mrb[40].mxu0 }
 0x3d3   : > { %v4729_v37 = vadd.f32 %v3695_v32, %v6563_v34  ;;  %v3697_v28 = vpop.f32.mrb[41].mxu0 }
 0x3d4   : > { %v4730_v29 = vadd.f32 %v3697_v28, %v6567_v30  ;;  %v3699_v56 = vpop.f32.mrb[42].mxu0  ;;  %3977 = vmatprep.mubr.bf16.mxu1 %v3789_v26 }
 0x3d5   : > { %v4731_v63 = vadd.f32 %v3699_v56, %v6563_v34  ;;  %v3701_v54 = vpop.f32.mrb[43].mxu0  ;;  %3978 = vmatmul.mubr.bf16.gmra.mrb[52].mxu1 %v3788_v25  ;;  %v3762_v58 = vmax.f32 %v4729_v37, 0.0 }
 0x3d6   : > { %v4732_v42 = vadd.f32 %v3701_v54, %v6567_v30  ;;  %v3763_v57 = vmax.f32 %v4730_v29, 0.0 }
 0x3d7   : > { %v3764_v33 = vmax.f32 %v4731_v63, 0.0 }
 0x3d8   : > { %v3765_v35 = vmax.f32 %v4732_v42, 0.0 }
 0x3d9   : > { %v3790_v31 = vpack.c.bf16 %v3764_v33, %v3762_v58 }
 0x3da   : > { %v3791_v13 = vpack.c.bf16 %v3765_v35, %v3763_v57  ;;  %v3705_v59 = vpop.f32.mrb[44].mxu0 }
 0x3db   : > { %v4733_v12 = vadd.f32 %v3705_v59, %v6563_v34  ;;  %v3707_v16 = vpop.f32.mrb[45].mxu0 }
 0x3dc   : > { %v4734_v39 = vadd.f32 %v3707_v16, %v6567_v30  ;;  %v3709_v40 = vpop.f32.mrb[46].mxu0  ;;  %3985 = vmatprep.mubr.bf16.mxu1 %v3791_v13 }
 0x3dd   : > { %v4735_v0 = vadd.f32 %v3709_v40, %v6563_v34  ;;  %v3711_v41 = vpop.f32.mrb[47].mxu0  ;;  %3986 = vmatmul.mubr.bf16.gmra.mrb[56].mxu1 %v3790_v31  ;;  %v3766_v43 = vmax.f32 %v4733_v12, 0.0 }
 0x3de   : > { %v4736_v1 = vadd.f32 %v3711_v41, %v6567_v30  ;;  %v3767_v24 = vmax.f32 %v4734_v39, 0.0  ;;  %v6626_v30 = vld [vmem:[#allocation13] ss:$0 sm:$0xff] }
 0x3df   : > { %v3768_v50 = vmax.f32 %v4735_v0, 0.0 }
 0x3e0   : > { %v3769_v36 = vmax.f32 %v4736_v1, 0.0 }
 0x3e1   : > { %v3792_v45 = vpack.c.bf16 %v3768_v50, %v3766_v43 }
 0x3e2   : > { %v3793_v2 = vpack.c.bf16 %v3769_v36, %v3767_v24 }
 0x3e4   : > { %3993 = vmatprep.mubr.bf16.mxu1 %v3793_v2 }
 0x3e5   : > { %3994 = vmatmul.mubr.bf16.gmra.mrb[60].mxu1 %v3792_v45 }
 0x3e6   : > { %4001 = vmatprep.mubr.bf16.mxu1 %v6576_v46 }
 0x3ed   : > { %4002 = vmatmul.mubr.bf16.gmra.mrb[64].mxu1 %v6573_v48 }
 0x3ee   : > { %4009 = vmatprep.mubr.bf16.mxu1 %v6584_v7 }
 0x3f5   : > { %4010 = vmatmul.mubr.bf16.gmra.mrb[68].mxu1 %v6581_v62 }
 0x3f6   : > { %4017 = vmatprep.mubr.bf16.mxu1 %v6592_v44 }
 0x3fd   : > { %4018 = vmatmul.mubr.bf16.gmra.mrb[72].mxu1 %v6589_v27 }
 0x3fe   : > { %4025 = vmatprep.mubr.bf16.mxu1 %v6600_v38 }
 0x405   : > { %4026 = vmatmul.mubr.bf16.gmra.mrb[76].mxu1 %v6597_v52 }
 0x4a0   : > { %v4577_v34 = vpop.f32.mrb[48].mxu1 }
 0x4a1   : > { %v4578_v47 = vpop.f32.mrb[49].mxu1 }
 0x4a2   : > { %v4579_v46 = vadd.f32 %v4578_v47, %v4577_v34  ;;  %v4580_v49 = vpop.f32.mrb[50].mxu1 }
 0x4a3   : > { %v4581_v48 = vpop.f32.mrb[51].mxu1 }
 0x4a4   : > { %v3972_v7 = vadd.f32 %v4579_v46, %v6626_v30  ;;  %v4582_v3 = vadd.f32 %v4581_v48, %v4580_v49 }
 0x4a6   : > { %4034 = vst [vmem:[%s6629_s10] sm:$0xff] %v3972_v7  ;;  %v3975_v62 = vadd.f32 %v4582_v3, %v6626_v30 }
 0x4a8   : > { %4035 = vst [vmem:[%s6629_s10 + $0x8] sm:$0xff] %v3975_v62  ;;  %v4583_v27 = vpop.f32.mrb[52].mxu1 }
 0x4a9   : > { %v4584_v44 = vpop.f32.mrb[53].mxu1 }
 0x4aa   : > { %v4585_v52 = vadd.f32 %v4584_v44, %v4583_v27  ;;  %v4586_v38 = vpop.f32.mrb[54].mxu1 }
 0x4ab   : > { %v4587_v60 = vpop.f32.mrb[55].mxu1 }
 0x4ac   : > { %v3980_v53 = vadd.f32 %v4585_v52, %v6626_v30  ;;  %v4588_v55 = vadd.f32 %v4587_v60, %v4586_v38 }
 0x4ae   : > { %4036 = vst [vmem:[%s6629_s10 + $0x10] sm:$0xff] %v3980_v53  ;;  %v3983_v11 = vadd.f32 %v4588_v55, %v6626_v30 }
 0x4b0   : > { %4037 = vst [vmem:[%s6629_s10 + $0x18] sm:$0xff] %v3983_v11  ;;  %v4589_v61 = vpop.f32.mrb[56].mxu1 }
 0x4b1   : > { %v4590_v18 = vpop.f32.mrb[57].mxu1 }
 0x4b2   : > { %v4591_v14 = vadd.f32 %v4590_v18, %v4589_v61  ;;  %v4592_v19 = vpop.f32.mrb[58].mxu1 }
 0x4b3   : > { %v4593_v22 = vpop.f32.mrb[59].mxu1 }
 0x4b4   : > { %v3988_v15 = vadd.f32 %v4591_v14, %v6626_v30  ;;  %v4594_v51 = vadd.f32 %v4593_v22, %v4592_v19 }
 0x4b6   : > { %4038 = vst [vmem:[%s6629_s10 + $0x20] sm:$0xff] %v3988_v15  ;;  %v3991_v4 = vadd.f32 %v4594_v51, %v6626_v30 }
 0x4b8   : > { %4039 = vst [vmem:[%s6629_s10 + $0x28] sm:$0xff] %v3991_v4  ;;  %v4595_v5 = vpop.f32.mrb[60].mxu1 }
 0x4b9   : > { %v4596_v6 = vpop.f32.mrb[61].mxu1 }
 0x4ba   : > { %v4597_v8 = vadd.f32 %v4596_v6, %v4595_v5  ;;  %v4598_v9 = vpop.f32.mrb[62].mxu1 }
 0x4bb   : > { %v4599_v10 = vpop.f32.mrb[63].mxu1 }
 0x4bc   : > { %v3996_v20 = vadd.f32 %v4597_v8, %v6626_v30  ;;  %v4600_v21 = vadd.f32 %v4599_v10, %v4598_v9 }
 0x4be   : > { %4040 = vst [vmem:[%s6629_s10 + $0x30] sm:$0xff] %v3996_v20  ;;  %v3999_v17 = vadd.f32 %v4600_v21, %v6626_v30 }
 0x4c0   : > { %4041 = vst [vmem:[%s6629_s10 + $0x38] sm:$0xff] %v3999_v17  ;;  %v4601_v23 = vpop.f32.mrb[64].mxu1 }
 0x4c1   : > { %v4602_v25 = vpop.f32.mrb[65].mxu1 }
 0x4c2   : > { %v4603_v26 = vadd.f32 %v4602_v25, %v4601_v23  ;;  %v4604_v32 = vpop.f32.mrb[66].mxu1 }
 0x4c3   : > { %v4605_v37 = vpop.f32.mrb[67].mxu1 }
 0x4c4   : > { %v4004_v28 = vadd.f32 %v4603_v26, %v6626_v30  ;;  %v4606_v29 = vadd.f32 %v4605_v37, %v4604_v32 }
 0x4c6   : > { %4042 = vst [vmem:[%s6629_s10 + $0x40] sm:$0xff] %v4004_v28  ;;  %v4007_v56 = vadd.f32 %v4606_v29, %v6626_v30 }
 0x4c8   : > { %4043 = vst [vmem:[%s6629_s10 + $0x48] sm:$0xff] %v4007_v56  ;;  %v4607_v63 = vpop.f32.mrb[68].mxu1 }
 0x4c9   : > { %v4608_v54 = vpop.f32.mrb[69].mxu1 }
 0x4ca   : > { %v4609_v42 = vadd.f32 %v4608_v54, %v4607_v63  ;;  %v4610_v58 = vpop.f32.mrb[70].mxu1 }
 0x4cb   : > { %v4611_v33 = vpop.f32.mrb[71].mxu1 }
 0x4cc   : > { %v4012_v57 = vadd.f32 %v4609_v42, %v6626_v30  ;;  %v4612_v35 = vadd.f32 %v4611_v33, %v4610_v58 }
 0x4ce   : > { %4044 = vst [vmem:[%s6629_s10 + $0x50] sm:$0xff] %v4012_v57  ;;  %v4015_v31 = vadd.f32 %v4612_v35, %v6626_v30 }
 0x4d0   : > { %4045 = vst [vmem:[%s6629_s10 + $0x58] sm:$0xff] %v4015_v31  ;;  %v4613_v13 = vpop.f32.mrb[72].mxu1 }
 0x4d1   : > { %v4614_v59 = vpop.f32.mrb[73].mxu1 }
 0x4d2   : > { %v4615_v12 = vadd.f32 %v4614_v59, %v4613_v13  ;;  %v4616_v16 = vpop.f32.mrb[74].mxu1 }
 0x4d3   : > { %v4617_v39 = vpop.f32.mrb[75].mxu1 }
 0x4d4   : > { %v4020_v40 = vadd.f32 %v4615_v12, %v6626_v30  ;;  %v4618_v0 = vadd.f32 %v4617_v39, %v4616_v16 }
 0x4d6   : > { %4046 = vst [vmem:[%s6629_s10 + $0x60] sm:$0xff] %v4020_v40  ;;  %v4023_v41 = vadd.f32 %v4618_v0, %v6626_v30 }
 0x4d8   : > { %4047 = vst [vmem:[%s6629_s10 + $0x68] sm:$0xff] %v4023_v41  ;;  %v4619_v1 = vpop.f32.mrb[76].mxu1 }
 0x4d9   : > { %v4620_v43 = vpop.f32.mrb[77].mxu1 }
 0x4da   : > { %v4621_v50 = vadd.f32 %v4620_v43, %v4619_v1  ;;  %v4622_v24 = vpop.f32.mrb[78].mxu1 }
 0x4db   : > { %v4623_v36 = vpop.f32.mrb[79].mxu1 }
 0x4dc   : > { %v4028_v45 = vadd.f32 %v4621_v50, %v6626_v30  ;;  %v4624_v2 = vadd.f32 %v4623_v36, %v4622_v24 }
 0x4de   : > { %4048 = vst [vmem:[%s6629_s10 + $0x70] sm:$0xff] %v4028_v45  ;;  %v4031_v34 = vadd.f32 %v4624_v2, %v6626_v30 }
 0x4e0   : > { %4049 = vst [vmem:[%s6629_s10 + $0x78] sm:$0xff] %v4031_v34 }
 0x4e1   : > { %5800 = shalt.err (!%p5797_p7)
}
 0x4e2   : > { %s5801_s15 = scalar_lea.hbm %s6664_s9, 2048  ;;  %s5805_s8 = scalar_lea.hbm %s6719_s7, 6144 }
 0x4e3   : > { %p5802_p6 = scmp.ne.s32.totalorder %s6664_s9, %s5801_s15  ;;  %p5806_p3 = scmp.lt.u32.totalorder %s6664_s9, %s6719_s7 }
 0x4e4   : > { %p5807_p0 = scmp.lt.u32.totalorder %s5805_s8, %s5801_s15  ;;  %p5809_p5 = scmp.lt.u32.totalorder %s5801_s15, %s6664_s9 }
 0x4e5   : > { %p5803_p8 = pnand %p5802_p6, %p6741_p4 }
 0x4e6   : > { %p5808_p2 = por %p5807_p0, %p5806_p3 }
 0x4e7   : > { %p5804_p9 = pneg %p5803_p8 }
 0x4e8   : > { %p5810_p10 = por %p5809_p5, %p5808_p2 }
 0x4ea   : > { %p5811_p1 = pnand %p5810_p10, %p5804_p9 }
 0x4ec   : > { %5814 = shalt.err (!%p5811_p1)
}
 0x4ed   : > { %s5882_s18 = smov 128   ;;  %s5883_s19 = smov 8  }
 0x4ee   : > { %5003 = dma.vmem_to_hbm [thread:$0]  (%p6741_p4), %s6666_s16, 2048, %s6664_s9, %s4051_s30, %s5882_s18, %s5882_s18, %s5883_s19  }
 0x4ef PF: > { %p5045_p11 = scmp.ge.s32.totalorder %s5865_s27, 2  ;;  %s4079_s17 = sand.u32 1, %s5853_s24  }
 0x4f0   : > { %p6742_p12 = scmp.ne.s32.totalorder %s6732_s23, 0  ;;  %s4080_s28 = scalar_lea.sflag [#allocation4], %s4079_s17 }
 0x4f2   : > { %p5029_p13 = pnand %p5045_p11, %p6742_p12 }
 0x4f4   : > { %5848 = dma.done.wait (!%p5029_p13), %s4080_s28, 2048  }
 0x4f5   : > { %5850 = vsyncadd (!%p5029_p13), %s4080_s28, 4294965248  ;;  %p23_p7 = scmp.ge.s32.totalorder %s6097_s11, 5   ;;  %s6743_s24 = smov %s5857_s25 }
 0x4f6   : > { %s6744_s25 = smov %s5861_s26  ;;  %s6745_s26 = smov %s6108_s21 }
 0x4f7   : > { %s6746_s27 = smov %s6097_s11  ;;  %25 = sbr.rel (!%p23_p7) target bundleno = 10 (0xa), region = 117 }
 0x4fe   :  { %4085 = vsyncpa [#allocation3], 1 }
 0x4ff   :  { %4087 = vsyncpa [#allocation3 + $0x1], 1 }
 0x500   :  { %4088 = vsyncpa [#allocation6], 1 }
 0x501   :  { %4089 = vsyncpa [#allocation9], 1 }
 0x502   :  { %4090 = vsyncpa [#allocation12], 1 }
 0x503   :  { %4091 = vsyncpa [#allocation4], 1 }
 0x504   :  { %4093 = vsyncpa [#allocation4 + $0x1], 1 }

</bundles_post_ra>
